<compile_context>
chip_gen: v7x
topology: tpu7x:2x2x1
jax: 0.10.0
libtpu: 0.0.40
codegen_flags: <defaults>
</compile_context>

<pallas_src>
import jax
import jax.numpy as jnp
from jax import lax
from jax.experimental import pallas as pl
from jax.experimental.pallas import tpu as pltpu


def _round_up(x, m):
    return ((x + m - 1) // m) * m


def lstm_intent_kernel(x_ref, s_ref, w_ih_ref, w_hh_ref, b_ref,
                       w_lin_ref, b_lin_ref, out_ref,
                       gx_ref, h_ref, c_ref):
    # x_ref:     (Tc*tb, E)   bf16 embedded chunk, row = t_local*tb + b
    # s_ref:     (tb, 1)      int32 sequence lengths for this batch block
    # w_ih_ref:  (E, 4H)      bf16 input->gate weights, gate order (i, f, o, g)
    # w_hh_ref:  (H, 4H)      bf16 hidden->gate weights, gate order (i, f, o, g)
    # b_ref:     (1, 4H)      f32 combined bias (b_ih + b_hh), gate order (i, f, o, g)
    # w_lin_ref: (H, Cp)      bf16 classifier weights, lane-padded to Cp (>=128)
    # b_lin_ref: (1, Cp)      f32 classifier bias, lane-padded
    # out_ref:   (tb, Cp)     f32 logits (lane-padded)
    # gx_ref:    (Tc*tb, 4H)  f32 VMEM scratch: hoisted input projection for this chunk
    # h_ref:     (tb, H)      bf16 VMEM scratch: hidden state carried across time chunks
    # c_ref:     (tb, H)      f32  VMEM scratch: cell state carried across time chunks
    tb = s_ref.shape[0]
    half = tb // 2
    Tc = x_ref.shape[0] // tb
    H = w_hh_ref.shape[0]
    tc = pl.program_id(1)
    nt = pl.num_programs(1)

    # Initialize carried recurrent state at the first time chunk of each batch block.
    @pl.when(tc == 0)
    def _():
        h_ref[...] = jnp.zeros_like(h_ref)
        c_ref[...] = jnp.zeros_like(c_ref)

    # Hoisted input projection: one MXU matmul covering every timestep of this chunk,
    # bias folded in exactly once (nothing re-broadcast inside the serial loop).
    gx_ref[...] = (
        jnp.dot(x_ref[...], w_ih_ref[...], preferred_element_type=jnp.float32)
        + b_ref[...])

    w_hh = w_hh_ref[...]
    s = s_ref[...]                                  # (tb, 1) int32
    s0 = s[:half]
    s1 = s[half:]
    t_base = tc * Tc                                # global time offset of this chunk

    def cell(gates, c_prev_f32, h_prev_bf16, s_blk, t_glob):
        # Gate order (i, f, o, g): sigmoid over one contiguous 3H region, tanh on the rest.
        sig = jax.nn.sigmoid(gates[:, :3 * H])
        g_g = jnp.tanh(gates[:, 3 * H:])
        i_g = sig[:, 0:H]
        f_g = sig[:, H:2 * H]
        o_g = sig[:, 2 * H:3 * H]
        c_new = f_g * c_prev_f32 + i_g * g_g
        h_new = o_g * jnp.tanh(c_new)
        # pack_padded_sequence + ht[-1] semantics: state freezes once t >= length[b].
        mask = t_glob < s_blk                       # (half, 1) bool
        h_out = jnp.where(mask, h_new.astype(jnp.bfloat16), h_prev_bf16)
        c_out = jnp.where(mask, c_new, c_prev_f32)
        return h_out, c_out

    def step(i, carry):
        h0, c0, h1, c1 = carry
        t_glob = t_base + i
        row0 = pl.multiple_of(i * tb, tb)           # tb multiple of 32 -> aligned slices
        row1 = pl.multiple_of(i * tb + half, half)
        # Two independent sub-block recurrences interleaved: the second chain fills the
        # MXU/EUP latency bubbles of the first.
        g0 = gx_ref[pl.ds(row0, half), :] + jnp.dot(
            h0, w_hh, preferred_element_type=jnp.float32)
        g1 = gx_ref[pl.ds(row1, half), :] + jnp.dot(
            h1, w_hh, preferred_element_type=jnp.float32)
        h0n, c0n = cell(g0, c0, h0, s0, t_glob)
        h1n, c1n = cell(g1, c1, h1, s1, t_glob)
        return h0n, c0n, h1n, c1n

    init = (h_ref[:half, :], c_ref[:half, :], h_ref[half:, :], c_ref[half:, :])
    # Fully unrolled within-chunk recurrence (Tc is small and static) so the scheduler
    # can overlap adjacent steps of the two interleaved chains.
    h0, c0, h1, c1 = lax.fori_loop(0, Tc, step, init, unroll=True)

    h_ref[:half, :] = h0
    h_ref[half:, :] = h1
    c_ref[:half, :] = c0
    c_ref[half:, :] = c1

    # Classifier on the final hidden state, lane-dense output written on the last chunk.
    @pl.when(tc == nt - 1)
    def _():
        out_ref[...] = (
            jnp.dot(h_ref[...], w_lin_ref[...], preferred_element_type=jnp.float32)
            + b_lin_ref[...])


def _reorder_gates(w):
    """PyTorch LSTM gate order (i, f, g, o) -> (i, f, o, g) along axis 0."""
    i, f, g, o = jnp.split(w, 4, axis=0)
    return jnp.concatenate([i, f, o, g], axis=0)


def lstm_main_intent_forward(tokens, lengths, params, *,
                             batch_block=128, time_chunk=16,
                             mxu_dtype=jnp.bfloat16):
    """tokens: (B, T) int32, lengths: (B,) int32. Returns (B, num_class) f32 logits."""
    emb = params["embedding"]          # (V, E)
    B, T = tokens.shape
    E = emb.shape[1]
    H = params["w_hh"].shape[1]
    C = params["w_lin"].shape[0]
    G = 4 * H

    # Batch tile: multiple of 32 so each interleaved half is aligned even for bf16
    # packing; capped at batch_block (128 fills the MXU M dimension).
    tb = min(_round_up(batch_block, 32), _round_up(B, 32))
    tb = max(tb, 32)
    half = tb // 2
    assert half % 16 == 0
    nb = pl.cdiv(B, tb)
    b_pad = nb * tb

    # Time chunk: bounds the activation slab / gx scratch and lets the pipeline overlap
    # the next chunk's DMA with the current chunk's recurrence.
    Tc = min(time_chunk, T)
    nt = pl.cdiv(T, Tc)
    T_pad = nt * Tc

    tok = tokens.astype(jnp.int32)
    lens = lengths.astype(jnp.int32)
    if b_pad != B or T_pad != T:
        tok = jnp.pad(tok, ((0, b_pad - B), (0, T_pad - T)))  # pad token 0 (padding_idx)
        lens = jnp.pad(lens, (0, b_pad - B))                  # length 0 -> h stays 0, row dropped

    # Gather embeddings directly in (batch-block, time, batch-in-block) order:
    # no full-activation transpose, only a tiny int32 token permutation.
    tok_perm = tok.reshape(nb, tb, T_pad).transpose(0, 2, 1).reshape(nb * T_pad * tb)
    x_flat = jnp.take(emb, tok_perm, axis=0).astype(mxu_dtype)   # (nb*T_pad*tb, E)
    # TODO(synk): training-mode dropout not modeled (eval/identity semantics).

    s2 = lens.reshape(b_pad, 1)

    w_ih_t = _reorder_gates(params["w_ih"]).T.astype(mxu_dtype)      # (E, 4H)
    w_hh_t = _reorder_gates(params["w_hh"]).T.astype(mxu_dtype)      # (H, 4H)
    b_all = _reorder_gates(params["b_ih"] + params["b_hh"])
    b_all = b_all.astype(jnp.float32).reshape(1, G)

    # Lane-dense classifier output: pad num_class up to a multiple of 128.
    Cp = _round_up(max(C, 128), 128)
    w_lin_t = jnp.zeros((H, Cp), mxu_dtype).at[:, :C].set(
        params["w_lin"].T.astype(mxu_dtype))                         # (H, Cp)
    b_lin_r = jnp.zeros((1, Cp), jnp.float32).at[:, :C].set(
        params["b_lin"].astype(jnp.float32).reshape(1, C))

    grid_spec = pltpu.PrefetchScalarGridSpec(
        num_scalar_prefetch=0,
        grid=(nb, nt),
        in_specs=[
            pl.BlockSpec((Tc * tb, E), lambda b, t: (b * nt + t, 0)),  # chunk activation slab
            pl.BlockSpec((tb, 1), lambda b, t: (b, 0)),                # per-block lengths
            pl.BlockSpec((E, G), lambda b, t: (0, 0)),                 # weights replicated
            pl.BlockSpec((H, G), lambda b, t: (0, 0)),
            pl.BlockSpec((1, G), lambda b, t: (0, 0)),
            pl.BlockSpec((H, Cp), lambda b, t: (0, 0)),
            pl.BlockSpec((1, Cp), lambda b, t: (0, 0)),
        ],
        out_specs=pl.BlockSpec((tb, Cp), lambda b, t: (b, 0)),
        scratch_shapes=[
            pltpu.VMEM((Tc * tb, G), jnp.float32),    # hoisted input projection
            pltpu.VMEM((tb, H), jnp.bfloat16),        # carried hidden state (bf16)
            pltpu.VMEM((tb, H), jnp.float32),         # carried cell state (f32)
        ],
    )

    out = pl.pallas_call(
        lstm_intent_kernel,
        out_shape=jax.ShapeDtypeStruct((b_pad, Cp), jnp.float32),
        grid_spec=grid_spec,
        compiler_params=pltpu.CompilerParams(
            dimension_semantics=("parallel", "arbitrary"),
            vmem_limit_bytes=48 << 20),
    )(x_flat, s2, w_ih_t, w_hh_t, b_all, w_lin_t, b_lin_r)
    return out[:B, :C]


def reference_forward(tokens, lengths, params):
    """Pure-JAX f32 reference mirroring PyTorch LSTM_Main_Intent (eval-mode dropout),
    using the original PyTorch (i, f, g, o) gate layout (independent of the kernel's
    permutation)."""
    emb = params["embedding"]
    x = jnp.take(emb, tokens, axis=0)                 # (B, T, E)
    B, T, E = x.shape
    H = params["w_hh"].shape[1]
    w_ih_t = params["w_ih"].T
    w_hh_t = params["w_hh"].T
    b = (params["b_ih"] + params["b_hh"]).reshape(1, -1)

    h = jnp.zeros((B, H), jnp.float32)
    c = jnp.zeros((B, H), jnp.float32)
    for t in range(T):
        gates = x[:, t, :] @ w_ih_t + h @ w_hh_t + b
        i_g = jax.nn.sigmoid(gates[:, 0:H])
        f_g = jax.nn.sigmoid(gates[:, H:2 * H])
        g_g = jnp.tanh(gates[:, 2 * H:3 * H])
        o_g = jax.nn.sigmoid(gates[:, 3 * H:4 * H])
        c_new = f_g * c + i_g * g_g
        h_new = o_g * jnp.tanh(c_new)
        mask = (t < lengths).reshape(B, 1)
        h = jnp.where(mask, h_new, h)
        c = jnp.where(mask, c_new, c)
    return h @ params["w_lin"].T + params["b_lin"].reshape(1, -1)


if __name__ == "__main__":
    # Small, deterministic config.
    num_embeddings = 50
    embedding_dim = 16
    hidden_dim = 32
    num_class = 5
    batch = 2
    seq_len = 8

    key = jax.random.PRNGKey(0)
    ks = jax.random.split(key, 8)

    emb = 0.1 * jax.random.normal(ks[0], (num_embeddings, embedding_dim), jnp.float32)
    emb = emb.at[0].set(0.0)  # padding_idx=0

    params = {
        "embedding": emb,
        "w_ih": 0.1 * jax.random.normal(ks[1], (4 * hidden_dim, embedding_dim), jnp.float32),
        "w_hh": 0.1 * jax.random.normal(ks[2], (4 * hidden_dim, hidden_dim), jnp.float32),
        "b_ih": 0.1 * jax.random.normal(ks[3], (4 * hidden_dim,), jnp.float32),
        "b_hh": 0.1 * jax.random.normal(ks[4], (4 * hidden_dim,), jnp.float32),
        "w_lin": 0.1 * jax.random.normal(ks[5], (num_class, hidden_dim), jnp.float32),
        "b_lin": 0.1 * jax.random.normal(ks[6], (num_class,), jnp.float32),
    }

    lengths = jnp.array([8, 5], dtype=jnp.int32)     # variable-length sequences
    tokens = jax.random.randint(ks[7], (batch, seq_len), 1, num_embeddings, dtype=jnp.int32)
    # zero-pad past each sequence's length (like real padded batches)
    t_ids = jnp.arange(seq_len)[None, :]
    tokens = jnp.where(t_ids < lengths[:, None], tokens, 0)

    out = lstm_main_intent_forward(tokens, lengths, params)
    out = jax.block_until_ready(out)

    ref = reference_forward(tokens, lengths, params)
    assert out.shape == (batch, num_class)
    # bf16 MXU operands / bf16 hidden carry => loosened tolerance vs. pure-f32 reference.
    assert jnp.allclose(out, ref, rtol=2e-2, atol=2e-2), (out, ref)

    print("KERNEL_OK")
</pallas_src>

<mosaic_0001>
module attributes {stable_mosaic.version = 11 : i64} {
  func.func @lstm_intent_kernel(%arg0: i32, %arg1: i32, %arg2: memref<256x16xbf16, #tpu.memory_space<vmem>>, %arg3: memref<32x1xi32, #tpu.memory_space<vmem>>, %arg4: memref<16x128xbf16, #tpu.memory_space<vmem>>, %arg5: memref<32x128xbf16, #tpu.memory_space<vmem>>, %arg6: memref<1x128xf32, #tpu.memory_space<vmem>>, %arg7: memref<32x128xbf16, #tpu.memory_space<vmem>>, %arg8: memref<1x128xf32, #tpu.memory_space<vmem>>, %arg9: memref<32x128xf32, #tpu.memory_space<vmem>>, %arg10: memref<256x128xf32, #tpu.memory_space<vmem>>, %arg11: memref<32x32xbf16, #tpu.memory_space<vmem>>, %arg12: memref<32x32xf32, #tpu.memory_space<vmem>>) attributes {dimension_semantics = [#tpu.dimension_semantics<parallel>, #tpu.dimension_semantics<arbitrary>], iteration_bounds = array<i64: 1, 1>, scalar_prefetch = 0 : i64, scratch_operands = 3 : i64, tpu.core_type = #tpu.core_type<tc>, window_params = [{transform_indices = @transform_0, window_bounds = array<i64: 256, 16>}, {transform_indices = @transform_1, window_bounds = array<i64: 32, 1>}, {pipeline_mode = #tpu.pipeline_mode<synchronous>, transform_indices = @transform_2, window_bounds = array<i64: 16, 128>}, {pipeline_mode = #tpu.pipeline_mode<synchronous>, transform_indices = @transform_3, window_bounds = array<i64: 32, 128>}, {pipeline_mode = #tpu.pipeline_mode<synchronous>, transform_indices = @transform_4, window_bounds = array<i64: 1, 128>}, {pipeline_mode = #tpu.pipeline_mode<synchronous>, transform_indices = @transform_5, window_bounds = array<i64: 32, 128>}, {pipeline_mode = #tpu.pipeline_mode<synchronous>, transform_indices = @transform_6, window_bounds = array<i64: 1, 128>}, {transform_indices = @transform_7, window_bounds = array<i64: 32, 128>}]} {
    %c0_i32 = arith.constant 0 : i32
    %0 = arith.cmpi eq, %arg1, %c0_i32 : i32
    %1 = arith.extui %0 : i1 to i32
    %c0_i32_0 = arith.constant 0 : i32
    %2 = arith.cmpi ne, %1, %c0_i32_0 : i32
    scf.if %2 {
      %cst_101 = arith.constant 0.000000e+00 : bf16
      %538 = vector.broadcast %cst_101 : bf16 to vector<32x32xbf16>
      %c0_102 = arith.constant 0 : index
      %c0_103 = arith.constant 0 : index
      %539 = vector.load %arg11[%c0_102, %c0_103] : memref<32x32xbf16, #tpu.memory_space<vmem>>, vector<32x32xbf16>
      tpu.vector_store %arg11[%c0_102, %c0_103], %538 {strides = array<i32>} : memref<32x32xbf16, #tpu.memory_space<vmem>>, vector<32x32xbf16>,
      %cst_104 = arith.constant 0.000000e+00 : f32
      %540 = vector.broadcast %cst_104 : f32 to vector<32x32xf32>
      %c0_105 = arith.constant 0 : index
      %c0_106 = arith.constant 0 : index
      %541 = vector.load %arg12[%c0_105, %c0_106] : memref<32x32xf32, #tpu.memory_space<vmem>>, vector<32x32xf32>
      tpu.vector_store %arg12[%c0_105, %c0_106], %540 {strides = array<i32>} : memref<32x32xf32, #tpu.memory_space<vmem>>, vector<32x32xf32>,
    } else {
    }
    %c0 = arith.constant 0 : index
    %c0_1 = arith.constant 0 : index
    %3 = vector.load %arg2[%c0, %c0_1] : memref<256x16xbf16, #tpu.memory_space<vmem>>, vector<256x16xbf16>
    %c0_2 = arith.constant 0 : index
    %c0_3 = arith.constant 0 : index
    %4 = vector.load %arg4[%c0_2, %c0_3] : memref<16x128xbf16, #tpu.memory_space<vmem>>, vector<16x128xbf16>
    %cst = arith.constant dense<0.000000e+00> : vector<256x128xf32>
    %5 = tpu.matmul %3, %4, %cst {dimension_numbers = #tpu.dot_dimension_numbers<[1], [0], [0], [1], [0, 0, 1, 1], [], []>} : vector<256x16xbf16>, vector<16x128xbf16>, vector<256x128xf32> -> vector<256x128xf32>
    %c0_4 = arith.constant 0 : index
    %c0_5 = arith.constant 0 : index
    %6 = vector.load %arg6[%c0_4, %c0_5] : memref<1x128xf32, #tpu.memory_space<vmem>>, vector<1x128xf32>
    %7 = vector.broadcast %6 : vector<1x128xf32> to vector<256x128xf32>
    %8 = arith.addf %5, %7 : vector<256x128xf32>
    %c0_6 = arith.constant 0 : index
    %c0_7 = arith.constant 0 : index
    %9 = vector.load %arg10[%c0_6, %c0_7] : memref<256x128xf32, #tpu.memory_space<vmem>>, vector<256x128xf32>
    tpu.vector_store %arg10[%c0_6, %c0_7], %8 {strides = array<i32>} : memref<256x128xf32, #tpu.memory_space<vmem>>, vector<256x128xf32>,
    %c0_8 = arith.constant 0 : index
    %c0_9 = arith.constant 0 : index
    %10 = vector.load %arg5[%c0_8, %c0_9] : memref<32x128xbf16, #tpu.memory_space<vmem>>, vector<32x128xbf16>
    %c0_10 = arith.constant 0 : index
    %c0_11 = arith.constant 0 : index
    %11 = vector.load %arg3[%c0_10, %c0_11] : memref<32x1xi32, #tpu.memory_space<vmem>>, vector<32x1xi32>
    %12 = vector.extract_strided_slice %11 {offsets = [0, 0], sizes = [16, 1], strides = [1, 1]} : vector<32x1xi32> to vector<16x1xi32>
    %13 = vector.extract_strided_slice %11 {offsets = [16, 0], sizes = [16, 1], strides = [1, 1]} : vector<32x1xi32> to vector<16x1xi32>
    %c8_i32 = arith.constant 8 : i32
    %14 = arith.muli %arg1, %c8_i32 : i32
    %c0_12 = arith.constant 0 : index
    %c0_13 = arith.constant 0 : index
    %15 = vector.load %arg11[%c0_12, %c0_13] : memref<32x32xbf16, #tpu.memory_space<vmem>>, vector<16x32xbf16>
    %c0_14 = arith.constant 0 : index
    %c0_15 = arith.constant 0 : index
    %16 = vector.load %arg12[%c0_14, %c0_15] : memref<32x32xf32, #tpu.memory_space<vmem>>, vector<16x32xf32>
    %c16 = arith.constant 16 : index
    %c0_16 = arith.constant 0 : index
    %17 = vector.load %arg11[%c16, %c0_16] : memref<32x32xbf16, #tpu.memory_space<vmem>>, vector<16x32xbf16>
    %c16_17 = arith.constant 16 : index
    %c0_18 = arith.constant 0 : index
    %18 = vector.load %arg12[%c16_17, %c0_18] : memref<32x32xf32, #tpu.memory_space<vmem>>, vector<16x32xf32>
    %c0_i32_19 = arith.constant 0 : i32
    %19 = arith.addi %14, %c0_i32_19 : i32
    %c32_i32 = arith.constant 32 : i32
    %20 = arith.muli %c0_i32_19, %c32_i32 : i32
    %21 = tpu.assume_multiple %20, 32 : i32
    %c32_i32_20 = arith.constant 32 : i32
    %22 = arith.muli %c0_i32_19, %c32_i32_20 : i32
    %c16_i32 = arith.constant 16 : i32
    %23 = arith.addi %22, %c16_i32 : i32
    %24 = tpu.assume_multiple %23, 16 : i32
    %25 = arith.index_cast %21 : i32 to index
    %c0_21 = arith.constant 0 : index
    %26 = vector.load %arg10[%25, %c0_21] : memref<256x128xf32, #tpu.memory_space<vmem>>, vector<16x128xf32>
    %cst_22 = arith.constant dense<0.000000e+00> : vector<16x128xf32>
    %27 = tpu.matmul %15, %10, %cst_22 {dimension_numbers = #tpu.dot_dimension_numbers<[1], [0], [0], [1], [0, 0, 1, 1], [], []>} : vector<16x32xbf16>, vector<32x128xbf16>, vector<16x128xf32> -> vector<16x128xf32>
    %28 = arith.addf %26, %27 : vector<16x128xf32>
    %29 = arith.index_cast %24 : i32 to index
    %c0_23 = arith.constant 0 : index
    %30 = vector.load %arg10[%29, %c0_23] : memref<256x128xf32, #tpu.memory_space<vmem>>, vector<16x128xf32>
    %cst_24 = arith.constant dense<0.000000e+00> : vector<16x128xf32>
    %31 = tpu.matmul %17, %10, %cst_24 {dimension_numbers = #tpu.dot_dimension_numbers<[1], [0], [0], [1], [0, 0, 1, 1], [], []>} : vector<16x32xbf16>, vector<32x128xbf16>, vector<16x128xf32> -> vector<16x128xf32>
    %32 = arith.addf %30, %31 : vector<16x128xf32>
    %33 = vector.extract_strided_slice %28 {offsets = [0, 0], sizes = [16, 96], strides = [1, 1]} : vector<16x128xf32> to vector<16x96xf32>
    %34 = arith.negf %33 : vector<16x96xf32>
    %35 = math.exp %34 : vector<16x96xf32>
    %cst_25 = arith.constant 1.000000e+00 : f32
    %36 = vector.broadcast %cst_25 : f32 to vector<16x96xf32>
    %37 = arith.addf %36, %35 : vector<16x96xf32>
    %38 = arith.divf %36, %37 : vector<16x96xf32>
    %39 = vector.extract_strided_slice %28 {offsets = [0, 96], sizes = [16, 32], strides = [1, 1]} : vector<16x128xf32> to vector<16x32xf32>
    %40 = math.tanh %39 : vector<16x32xf32>
    %41 = vector.extract_strided_slice %38 {offsets = [0, 0], sizes = [16, 32], strides = [1, 1]} : vector<16x96xf32> to vector<16x32xf32>
    %42 = vector.extract_strided_slice %38 {offsets = [0, 32], sizes = [16, 32], strides = [1, 1]} : vector<16x96xf32> to vector<16x32xf32>
    %43 = vector.extract_strided_slice %38 {offsets = [0, 64], sizes = [16, 32], strides = [1, 1]} : vector<16x96xf32> to vector<16x32xf32>
    %44 = arith.mulf %42, %16 : vector<16x32xf32>
    %45 = arith.mulf %41, %40 : vector<16x32xf32>
    %46 = arith.addf %44, %45 : vector<16x32xf32>
    %47 = math.tanh %46 : vector<16x32xf32>
    %48 = arith.mulf %43, %47 : vector<16x32xf32>
    %49 = vector.broadcast %19 : i32 to vector<16x1xi32>
    %50 = arith.cmpi slt, %49, %12 : vector<16x1xi32>
    %51 = arith.truncf %48 : vector<16x32xf32> to vector<16x32xbf16>
    %52 = vector.shape_cast %50 : vector<16x1xi1> to vector<16x1xi1>
    %53 = vector.broadcast %52 : vector<16x1xi1> to vector<16x32xi1>
    %54 = arith.select %53, %51, %15 : vector<16x32xi1>, vector<16x32xbf16>
    %55 = vector.shape_cast %50 : vector<16x1xi1> to vector<16x1xi1>
    %56 = vector.broadcast %55 : vector<16x1xi1> to vector<16x32xi1>
    %57 = arith.select %56, %46, %16 : vector<16x32xi1>, vector<16x32xf32>
    %58 = vector.extract_strided_slice %32 {offsets = [0, 0], sizes = [16, 96], strides = [1, 1]} : vector<16x128xf32> to vector<16x96xf32>
    %59 = arith.negf %58 : vector<16x96xf32>
    %60 = math.exp %59 : vector<16x96xf32>
    %cst_26 = arith.constant 1.000000e+00 : f32
    %61 = vector.broadcast %cst_26 : f32 to vector<16x96xf32>
    %62 = arith.addf %61, %60 : vector<16x96xf32>
    %63 = arith.divf %61, %62 : vector<16x96xf32>
    %64 = vector.extract_strided_slice %32 {offsets = [0, 96], sizes = [16, 32], strides = [1, 1]} : vector<16x128xf32> to vector<16x32xf32>
    %65 = math.tanh %64 : vector<16x32xf32>
    %66 = vector.extract_strided_slice %63 {offsets = [0, 0], sizes = [16, 32], strides = [1, 1]} : vector<16x96xf32> to vector<16x32xf32>
    %67 = vector.extract_strided_slice %63 {offsets = [0, 32], sizes = [16, 32], strides = [1, 1]} : vector<16x96xf32> to vector<16x32xf32>
    %68 = vector.extract_strided_slice %63 {offsets = [0, 64], sizes = [16, 32], strides = [1, 1]} : vector<16x96xf32> to vector<16x32xf32>
    %69 = arith.mulf %67, %18 : vector<16x32xf32>
    %70 = arith.mulf %66, %65 : vector<16x32xf32>
    %71 = arith.addf %69, %70 : vector<16x32xf32>
    %72 = math.tanh %71 : vector<16x32xf32>
    %73 = arith.mulf %68, %72 : vector<16x32xf32>
    %74 = vector.broadcast %19 : i32 to vector<16x1xi32>
    %75 = arith.cmpi slt, %74, %13 : vector<16x1xi32>
    %76 = arith.truncf %73 : vector<16x32xf32> to vector<16x32xbf16>
    %77 = vector.shape_cast %75 : vector<16x1xi1> to vector<16x1xi1>
    %78 = vector.broadcast %77 : vector<16x1xi1> to vector<16x32xi1>
    %79 = arith.select %78, %76, %17 : vector<16x32xi1>, vector<16x32xbf16>
    %80 = vector.shape_cast %75 : vector<16x1xi1> to vector<16x1xi1>
    %81 = vector.broadcast %80 : vector<16x1xi1> to vector<16x32xi1>
    %82 = arith.select %81, %71, %18 : vector<16x32xi1>, vector<16x32xf32>
    %c1_i32 = arith.constant 1 : i32
    %83 = arith.addi %14, %c1_i32 : i32
    %c32_i32_27 = arith.constant 32 : i32
    %84 = arith.muli %c1_i32, %c32_i32_27 : i32
    %85 = tpu.assume_multiple %84, 32 : i32
    %c32_i32_28 = arith.constant 32 : i32
    %86 = arith.muli %c1_i32, %c32_i32_28 : i32
    %c16_i32_29 = arith.constant 16 : i32
    %87 = arith.addi %86, %c16_i32_29 : i32
    %88 = tpu.assume_multiple %87, 16 : i32
    %89 = arith.index_cast %85 : i32 to index
    %c0_30 = arith.constant 0 : index
    %90 = vector.load %arg10[%89, %c0_30] : memref<256x128xf32, #tpu.memory_space<vmem>>, vector<16x128xf32>
    %cst_31 = arith.constant dense<0.000000e+00> : vector<16x128xf32>
    %91 = tpu.matmul %54, %10, %cst_31 {dimension_numbers = #tpu.dot_dimension_numbers<[1], [0], [0], [1], [0, 0, 1, 1], [], []>} : vector<16x32xbf16>, vector<32x128xbf16>, vector<16x128xf32> -> vector<16x128xf32>
    %92 = arith.addf %90, %91 : vector<16x128xf32>
    %93 = arith.index_cast %88 : i32 to index
    %c0_32 = arith.constant 0 : index
    %94 = vector.load %arg10[%93, %c0_32] : memref<256x128xf32, #tpu.memory_space<vmem>>, vector<16x128xf32>
    %cst_33 = arith.constant dense<0.000000e+00> : vector<16x128xf32>
    %95 = tpu.matmul %79, %10, %cst_33 {dimension_numbers = #tpu.dot_dimension_numbers<[1], [0], [0], [1], [0, 0, 1, 1], [], []>} : vector<16x32xbf16>, vector<32x128xbf16>, vector<16x128xf32> -> vector<16x128xf32>
    %96 = arith.addf %94, %95 : vector<16x128xf32>
    %97 = vector.extract_strided_slice %92 {offsets = [0, 0], sizes = [16, 96], strides = [1, 1]} : vector<16x128xf32> to vector<16x96xf32>
    %98 = arith.negf %97 : vector<16x96xf32>
    %99 = math.exp %98 : vector<16x96xf32>
    %cst_34 = arith.constant 1.000000e+00 : f32
    %100 = vector.broadcast %cst_34 : f32 to vector<16x96xf32>
    %101 = arith.addf %100, %99 : vector<16x96xf32>
    %102 = arith.divf %100, %101 : vector<16x96xf32>
    %103 = vector.extract_strided_slice %92 {offsets = [0, 96], sizes = [16, 32], strides = [1, 1]} : vector<16x128xf32> to vector<16x32xf32>
    %104 = math.tanh %103 : vector<16x32xf32>
    %105 = vector.extract_strided_slice %102 {offsets = [0, 0], sizes = [16, 32], strides = [1, 1]} : vector<16x96xf32> to vector<16x32xf32>
    %106 = vector.extract_strided_slice %102 {offsets = [0, 32], sizes = [16, 32], strides = [1, 1]} : vector<16x96xf32> to vector<16x32xf32>
    %107 = vector.extract_strided_slice %102 {offsets = [0, 64], sizes = [16, 32], strides = [1, 1]} : vector<16x96xf32> to vector<16x32xf32>
    %108 = arith.mulf %106, %57 : vector<16x32xf32>
    %109 = arith.mulf %105, %104 : vector<16x32xf32>
    %110 = arith.addf %108, %109 : vector<16x32xf32>
    %111 = math.tanh %110 : vector<16x32xf32>
    %112 = arith.mulf %107, %111 : vector<16x32xf32>
    %113 = vector.broadcast %83 : i32 to vector<16x1xi32>
    %114 = arith.cmpi slt, %113, %12 : vector<16x1xi32>
    %115 = arith.truncf %112 : vector<16x32xf32> to vector<16x32xbf16>
    %116 = vector.shape_cast %114 : vector<16x1xi1> to vector<16x1xi1>
    %117 = vector.broadcast %116 : vector<16x1xi1> to vector<16x32xi1>
    %118 = arith.select %117, %115, %54 : vector<16x32xi1>, vector<16x32xbf16>
    %119 = vector.shape_cast %114 : vector<16x1xi1> to vector<16x1xi1>
    %120 = vector.broadcast %119 : vector<16x1xi1> to vector<16x32xi1>
    %121 = arith.select %120, %110, %57 : vector<16x32xi1>, vector<16x32xf32>
    %122 = vector.extract_strided_slice %96 {offsets = [0, 0], sizes = [16, 96], strides = [1, 1]} : vector<16x128xf32> to vector<16x96xf32>
    %123 = arith.negf %122 : vector<16x96xf32>
    %124 = math.exp %123 : vector<16x96xf32>
    %cst_35 = arith.constant 1.000000e+00 : f32
    %125 = vector.broadcast %cst_35 : f32 to vector<16x96xf32>
    %126 = arith.addf %125, %124 : vector<16x96xf32>
    %127 = arith.divf %125, %126 : vector<16x96xf32>
    %128 = vector.extract_strided_slice %96 {offsets = [0, 96], sizes = [16, 32], strides = [1, 1]} : vector<16x128xf32> to vector<16x32xf32>
    %129 = math.tanh %128 : vector<16x32xf32>
    %130 = vector.extract_strided_slice %127 {offsets = [0, 0], sizes = [16, 32], strides = [1, 1]} : vector<16x96xf32> to vector<16x32xf32>
    %131 = vector.extract_strided_slice %127 {offsets = [0, 32], sizes = [16, 32], strides = [1, 1]} : vector<16x96xf32> to vector<16x32xf32>
    %132 = vector.extract_strided_slice %127 {offsets = [0, 64], sizes = [16, 32], strides = [1, 1]} : vector<16x96xf32> to vector<16x32xf32>
    %133 = arith.mulf %131, %82 : vector<16x32xf32>
    %134 = arith.mulf %130, %129 : vector<16x32xf32>
    %135 = arith.addf %133, %134 : vector<16x32xf32>
    %136 = math.tanh %135 : vector<16x32xf32>
    %137 = arith.mulf %132, %136 : vector<16x32xf32>
    %138 = vector.broadcast %83 : i32 to vector<16x1xi32>
    %139 = arith.cmpi slt, %138, %13 : vector<16x1xi32>
    %140 = arith.truncf %137 : vector<16x32xf32> to vector<16x32xbf16>
    %141 = vector.shape_cast %139 : vector<16x1xi1> to vector<16x1xi1>
    %142 = vector.broadcast %141 : vector<16x1xi1> to vector<16x32xi1>
    %143 = arith.select %142, %140, %79 : vector<16x32xi1>, vector<16x32xbf16>
    %144 = vector.shape_cast %139 : vector<16x1xi1> to vector<16x1xi1>
    %145 = vector.broadcast %144 : vector<16x1xi1> to vector<16x32xi1>
    %146 = arith.select %145, %135, %82 : vector<16x32xi1>, vector<16x32xf32>
    %c2_i32 = arith.constant 2 : i32
    %147 = arith.addi %14, %c2_i32 : i32
    %c32_i32_36 = arith.constant 32 : i32
    %148 = arith.muli %c2_i32, %c32_i32_36 : i32
    %149 = tpu.assume_multiple %148, 32 : i32
    %c32_i32_37 = arith.constant 32 : i32
    %150 = arith.muli %c2_i32, %c32_i32_37 : i32
    %c16_i32_38 = arith.constant 16 : i32
    %151 = arith.addi %150, %c16_i32_38 : i32
    %152 = tpu.assume_multiple %151, 16 : i32
    %153 = arith.index_cast %149 : i32 to index
    %c0_39 = arith.constant 0 : index
    %154 = vector.load %arg10[%153, %c0_39] : memref<256x128xf32, #tpu.memory_space<vmem>>, vector<16x128xf32>
    %cst_40 = arith.constant dense<0.000000e+00> : vector<16x128xf32>
    %155 = tpu.matmul %118, %10, %cst_40 {dimension_numbers = #tpu.dot_dimension_numbers<[1], [0], [0], [1], [0, 0, 1, 1], [], []>} : vector<16x32xbf16>, vector<32x128xbf16>, vector<16x128xf32> -> vector<16x128xf32>
    %156 = arith.addf %154, %155 : vector<16x128xf32>
    %157 = arith.index_cast %152 : i32 to index
    %c0_41 = arith.constant 0 : index
    %158 = vector.load %arg10[%157, %c0_41] : memref<256x128xf32, #tpu.memory_space<vmem>>, vector<16x128xf32>
    %cst_42 = arith.constant dense<0.000000e+00> : vector<16x128xf32>
    %159 = tpu.matmul %143, %10, %cst_42 {dimension_numbers = #tpu.dot_dimension_numbers<[1], [0], [0], [1], [0, 0, 1, 1], [], []>} : vector<16x32xbf16>, vector<32x128xbf16>, vector<16x128xf32> -> vector<16x128xf32>
    %160 = arith.addf %158, %159 : vector<16x128xf32>
    %161 = vector.extract_strided_slice %156 {offsets = [0, 0], sizes = [16, 96], strides = [1, 1]} : vector<16x128xf32> to vector<16x96xf32>
    %162 = arith.negf %161 : vector<16x96xf32>
    %163 = math.exp %162 : vector<16x96xf32>
    %cst_43 = arith.constant 1.000000e+00 : f32
    %164 = vector.broadcast %cst_43 : f32 to vector<16x96xf32>
    %165 = arith.addf %164, %163 : vector<16x96xf32>
    %166 = arith.divf %164, %165 : vector<16x96xf32>
    %167 = vector.extract_strided_slice %156 {offsets = [0, 96], sizes = [16, 32], strides = [1, 1]} : vector<16x128xf32> to vector<16x32xf32>
    %168 = math.tanh %167 : vector<16x32xf32>
    %169 = vector.extract_strided_slice %166 {offsets = [0, 0], sizes = [16, 32], strides = [1, 1]} : vector<16x96xf32> to vector<16x32xf32>
    %170 = vector.extract_strided_slice %166 {offsets = [0, 32], sizes = [16, 32], strides = [1, 1]} : vector<16x96xf32> to vector<16x32xf32>
    %171 = vector.extract_strided_slice %166 {offsets = [0, 64], sizes = [16, 32], strides = [1, 1]} : vector<16x96xf32> to vector<16x32xf32>
    %172 = arith.mulf %170, %121 : vector<16x32xf32>
    %173 = arith.mulf %169, %168 : vector<16x32xf32>
    %174 = arith.addf %172, %173 : vector<16x32xf32>
    %175 = math.tanh %174 : vector<16x32xf32>
    %176 = arith.mulf %171, %175 : vector<16x32xf32>
    %177 = vector.broadcast %147 : i32 to vector<16x1xi32>
    %178 = arith.cmpi slt, %177, %12 : vector<16x1xi32>
    %179 = arith.truncf %176 : vector<16x32xf32> to vector<16x32xbf16>
    %180 = vector.shape_cast %178 : vector<16x1xi1> to vector<16x1xi1>
    %181 = vector.broadcast %180 : vector<16x1xi1> to vector<16x32xi1>
    %182 = arith.select %181, %179, %118 : vector<16x32xi1>, vector<16x32xbf16>
    %183 = vector.shape_cast %178 : vector<16x1xi1> to vector<16x1xi1>
    %184 = vector.broadcast %183 : vector<16x1xi1> to vector<16x32xi1>
    %185 = arith.select %184, %174, %121 : vector<16x32xi1>, vector<16x32xf32>
    %186 = vector.extract_strided_slice %160 {offsets = [0, 0], sizes = [16, 96], strides = [1, 1]} : vector<16x128xf32> to vector<16x96xf32>
    %187 = arith.negf %186 : vector<16x96xf32>
    %188 = math.exp %187 : vector<16x96xf32>
    %cst_44 = arith.constant 1.000000e+00 : f32
    %189 = vector.broadcast %cst_44 : f32 to vector<16x96xf32>
    %190 = arith.addf %189, %188 : vector<16x96xf32>
    %191 = arith.divf %189, %190 : vector<16x96xf32>
    %192 = vector.extract_strided_slice %160 {offsets = [0, 96], sizes = [16, 32], strides = [1, 1]} : vector<16x128xf32> to vector<16x32xf32>
    %193 = math.tanh %192 : vector<16x32xf32>
    %194 = vector.extract_strided_slice %191 {offsets = [0, 0], sizes = [16, 32], strides = [1, 1]} : vector<16x96xf32> to vector<16x32xf32>
    %195 = vector.extract_strided_slice %191 {offsets = [0, 32], sizes = [16, 32], strides = [1, 1]} : vector<16x96xf32> to vector<16x32xf32>
    %196 = vector.extract_strided_slice %191 {offsets = [0, 64], sizes = [16, 32], strides = [1, 1]} : vector<16x96xf32> to vector<16x32xf32>
    %197 = arith.mulf %195, %146 : vector<16x32xf32>
    %198 = arith.mulf %194, %193 : vector<16x32xf32>
    %199 = arith.addf %197, %198 : vector<16x32xf32>
    %200 = math.tanh %199 : vector<16x32xf32>
    %201 = arith.mulf %196, %200 : vector<16x32xf32>
    %202 = vector.broadcast %147 : i32 to vector<16x1xi32>
    %203 = arith.cmpi slt, %202, %13 : vector<16x1xi32>
    %204 = arith.truncf %201 : vector<16x32xf32> to vector<16x32xbf16>
    %205 = vector.shape_cast %203 : vector<16x1xi1> to vector<16x1xi1>
    %206 = vector.broadcast %205 : vector<16x1xi1> to vector<16x32xi1>
    %207 = arith.select %206, %204, %143 : vector<16x32xi1>, vector<16x32xbf16>
    %208 = vector.shape_cast %203 : vector<16x1xi1> to vector<16x1xi1>
    %209 = vector.broadcast %208 : vector<16x1xi1> to vector<16x32xi1>
    %210 = arith.select %209, %199, %146 : vector<16x32xi1>, vector<16x32xf32>
    %c3_i32 = arith.constant 3 : i32
    %211 = arith.addi %14, %c3_i32 : i32
    %c32_i32_45 = arith.constant 32 : i32
    %212 = arith.muli %c3_i32, %c32_i32_45 : i32
    %213 = tpu.assume_multiple %212, 32 : i32
    %c32_i32_46 = arith.constant 32 : i32
    %214 = arith.muli %c3_i32, %c32_i32_46 : i32
    %c16_i32_47 = arith.constant 16 : i32
    %215 = arith.addi %214, %c16_i32_47 : i32
    %216 = tpu.assume_multiple %215, 16 : i32
    %217 = arith.index_cast %213 : i32 to index
    %c0_48 = arith.constant 0 : index
    %218 = vector.load %arg10[%217, %c0_48] : memref<256x128xf32, #tpu.memory_space<vmem>>, vector<16x128xf32>
    %cst_49 = arith.constant dense<0.000000e+00> : vector<16x128xf32>
    %219 = tpu.matmul %182, %10, %cst_49 {dimension_numbers = #tpu.dot_dimension_numbers<[1], [0], [0], [1], [0, 0, 1, 1], [], []>} : vector<16x32xbf16>, vector<32x128xbf16>, vector<16x128xf32> -> vector<16x128xf32>
    %220 = arith.addf %218, %219 : vector<16x128xf32>
    %221 = arith.index_cast %216 : i32 to index
    %c0_50 = arith.constant 0 : index
    %222 = vector.load %arg10[%221, %c0_50] : memref<256x128xf32, #tpu.memory_space<vmem>>, vector<16x128xf32>
    %cst_51 = arith.constant dense<0.000000e+00> : vector<16x128xf32>
    %223 = tpu.matmul %207, %10, %cst_51 {dimension_numbers = #tpu.dot_dimension_numbers<[1], [0], [0], [1], [0, 0, 1, 1], [], []>} : vector<16x32xbf16>, vector<32x128xbf16>, vector<16x128xf32> -> vector<16x128xf32>
    %224 = arith.addf %222, %223 : vector<16x128xf32>
    %225 = vector.extract_strided_slice %220 {offsets = [0, 0], sizes = [16, 96], strides = [1, 1]} : vector<16x128xf32> to vector<16x96xf32>
    %226 = arith.negf %225 : vector<16x96xf32>
    %227 = math.exp %226 : vector<16x96xf32>
    %cst_52 = arith.constant 1.000000e+00 : f32
    %228 = vector.broadcast %cst_52 : f32 to vector<16x96xf32>
    %229 = arith.addf %228, %227 : vector<16x96xf32>
    %230 = arith.divf %228, %229 : vector<16x96xf32>
    %231 = vector.extract_strided_slice %220 {offsets = [0, 96], sizes = [16, 32], strides = [1, 1]} : vector<16x128xf32> to vector<16x32xf32>
    %232 = math.tanh %231 : vector<16x32xf32>
    %233 = vector.extract_strided_slice %230 {offsets = [0, 0], sizes = [16, 32], strides = [1, 1]} : vector<16x96xf32> to vector<16x32xf32>
    %234 = vector.extract_strided_slice %230 {offsets = [0, 32], sizes = [16, 32], strides = [1, 1]} : vector<16x96xf32> to vector<16x32xf32>
    %235 = vector.extract_strided_slice %230 {offsets = [0, 64], sizes = [16, 32], strides = [1, 1]} : vector<16x96xf32> to vector<16x32xf32>
    %236 = arith.mulf %234, %185 : vector<16x32xf32>
    %237 = arith.mulf %233, %232 : vector<16x32xf32>
    %238 = arith.addf %236, %237 : vector<16x32xf32>
    %239 = math.tanh %238 : vector<16x32xf32>
    %240 = arith.mulf %235, %239 : vector<16x32xf32>
    %241 = vector.broadcast %211 : i32 to vector<16x1xi32>
    %242 = arith.cmpi slt, %241, %12 : vector<16x1xi32>
    %243 = arith.truncf %240 : vector<16x32xf32> to vector<16x32xbf16>
    %244 = vector.shape_cast %242 : vector<16x1xi1> to vector<16x1xi1>
    %245 = vector.broadcast %244 : vector<16x1xi1> to vector<16x32xi1>
    %246 = arith.select %245, %243, %182 : vector<16x32xi1>, vector<16x32xbf16>
    %247 = vector.shape_cast %242 : vector<16x1xi1> to vector<16x1xi1>
    %248 = vector.broadcast %247 : vector<16x1xi1> to vector<16x32xi1>
    %249 = arith.select %248, %238, %185 : vector<16x32xi1>, vector<16x32xf32>
    %250 = vector.extract_strided_slice %224 {offsets = [0, 0], sizes = [16, 96], strides = [1, 1]} : vector<16x128xf32> to vector<16x96xf32>
    %251 = arith.negf %250 : vector<16x96xf32>
    %252 = math.exp %251 : vector<16x96xf32>
    %cst_53 = arith.constant 1.000000e+00 : f32
    %253 = vector.broadcast %cst_53 : f32 to vector<16x96xf32>
    %254 = arith.addf %253, %252 : vector<16x96xf32>
    %255 = arith.divf %253, %254 : vector<16x96xf32>
    %256 = vector.extract_strided_slice %224 {offsets = [0, 96], sizes = [16, 32], strides = [1, 1]} : vector<16x128xf32> to vector<16x32xf32>
    %257 = math.tanh %256 : vector<16x32xf32>
    %258 = vector.extract_strided_slice %255 {offsets = [0, 0], sizes = [16, 32], strides = [1, 1]} : vector<16x96xf32> to vector<16x32xf32>
    %259 = vector.extract_strided_slice %255 {offsets = [0, 32], sizes = [16, 32], strides = [1, 1]} : vector<16x96xf32> to vector<16x32xf32>
    %260 = vector.extract_strided_slice %255 {offsets = [0, 64], sizes = [16, 32], strides = [1, 1]} : vector<16x96xf32> to vector<16x32xf32>
    %261 = arith.mulf %259, %210 : vector<16x32xf32>
    %262 = arith.mulf %258, %257 : vector<16x32xf32>
    %263 = arith.addf %261, %262 : vector<16x32xf32>
    %264 = math.tanh %263 : vector<16x32xf32>
    %265 = arith.mulf %260, %264 : vector<16x32xf32>
    %266 = vector.broadcast %211 : i32 to vector<16x1xi32>
    %267 = arith.cmpi slt, %266, %13 : vector<16x1xi32>
    %268 = arith.truncf %265 : vector<16x32xf32> to vector<16x32xbf16>
    %269 = vector.shape_cast %267 : vector<16x1xi1> to vector<16x1xi1>
    %270 = vector.broadcast %269 : vector<16x1xi1> to vector<16x32xi1>
    %271 = arith.select %270, %268, %207 : vector<16x32xi1>, vector<16x32xbf16>
    %272 = vector.shape_cast %267 : vector<16x1xi1> to vector<16x1xi1>
    %273 = vector.broadcast %272 : vector<16x1xi1> to vector<16x32xi1>
    %274 = arith.select %273, %263, %210 : vector<16x32xi1>, vector<16x32xf32>
    %c4_i32 = arith.constant 4 : i32
    %275 = arith.addi %14, %c4_i32 : i32
    %c32_i32_54 = arith.constant 32 : i32
    %276 = arith.muli %c4_i32, %c32_i32_54 : i32
    %277 = tpu.assume_multiple %276, 32 : i32
    %c32_i32_55 = arith.constant 32 : i32
    %278 = arith.muli %c4_i32, %c32_i32_55 : i32
    %c16_i32_56 = arith.constant 16 : i32
    %279 = arith.addi %278, %c16_i32_56 : i32
    %280 = tpu.assume_multiple %279, 16 : i32
    %281 = arith.index_cast %277 : i32 to index
    %c0_57 = arith.constant 0 : index
    %282 = vector.load %arg10[%281, %c0_57] : memref<256x128xf32, #tpu.memory_space<vmem>>, vector<16x128xf32>
    %cst_58 = arith.constant dense<0.000000e+00> : vector<16x128xf32>
    %283 = tpu.matmul %246, %10, %cst_58 {dimension_numbers = #tpu.dot_dimension_numbers<[1], [0], [0], [1], [0, 0, 1, 1], [], []>} : vector<16x32xbf16>, vector<32x128xbf16>, vector<16x128xf32> -> vector<16x128xf32>
    %284 = arith.addf %282, %283 : vector<16x128xf32>
    %285 = arith.index_cast %280 : i32 to index
    %c0_59 = arith.constant 0 : index
    %286 = vector.load %arg10[%285, %c0_59] : memref<256x128xf32, #tpu.memory_space<vmem>>, vector<16x128xf32>
    %cst_60 = arith.constant dense<0.000000e+00> : vector<16x128xf32>
    %287 = tpu.matmul %271, %10, %cst_60 {dimension_numbers = #tpu.dot_dimension_numbers<[1], [0], [0], [1], [0, 0, 1, 1], [], []>} : vector<16x32xbf16>, vector<32x128xbf16>, vector<16x128xf32> -> vector<16x128xf32>
    %288 = arith.addf %286, %287 : vector<16x128xf32>
    %289 = vector.extract_strided_slice %284 {offsets = [0, 0], sizes = [16, 96], strides = [1, 1]} : vector<16x128xf32> to vector<16x96xf32>
    %290 = arith.negf %289 : vector<16x96xf32>
    %291 = math.exp %290 : vector<16x96xf32>
    %cst_61 = arith.constant 1.000000e+00 : f32
    %292 = vector.broadcast %cst_61 : f32 to vector<16x96xf32>
    %293 = arith.addf %292, %291 : vector<16x96xf32>
    %294 = arith.divf %292, %293 : vector<16x96xf32>
    %295 = vector.extract_strided_slice %284 {offsets = [0, 96], sizes = [16, 32], strides = [1, 1]} : vector<16x128xf32> to vector<16x32xf32>
    %296 = math.tanh %295 : vector<16x32xf32>
    %297 = vector.extract_strided_slice %294 {offsets = [0, 0], sizes = [16, 32], strides = [1, 1]} : vector<16x96xf32> to vector<16x32xf32>
    %298 = vector.extract_strided_slice %294 {offsets = [0, 32], sizes = [16, 32], strides = [1, 1]} : vector<16x96xf32> to vector<16x32xf32>
    %299 = vector.extract_strided_slice %294 {offsets = [0, 64], sizes = [16, 32], strides = [1, 1]} : vector<16x96xf32> to vector<16x32xf32>
    %300 = arith.mulf %298, %249 : vector<16x32xf32>
    %301 = arith.mulf %297, %296 : vector<16x32xf32>
    %302 = arith.addf %300, %301 : vector<16x32xf32>
    %303 = math.tanh %302 : vector<16x32xf32>
    %304 = arith.mulf %299, %303 : vector<16x32xf32>
    %305 = vector.broadcast %275 : i32 to vector<16x1xi32>
    %306 = arith.cmpi slt, %305, %12 : vector<16x1xi32>
    %307 = arith.truncf %304 : vector<16x32xf32> to vector<16x32xbf16>
    %308 = vector.shape_cast %306 : vector<16x1xi1> to vector<16x1xi1>
    %309 = vector.broadcast %308 : vector<16x1xi1> to vector<16x32xi1>
    %310 = arith.select %309, %307, %246 : vector<16x32xi1>, vector<16x32xbf16>
    %311 = vector.shape_cast %306 : vector<16x1xi1> to vector<16x1xi1>
    %312 = vector.broadcast %311 : vector<16x1xi1> to vector<16x32xi1>
    %313 = arith.select %312, %302, %249 : vector<16x32xi1>, vector<16x32xf32>
    %314 = vector.extract_strided_slice %288 {offsets = [0, 0], sizes = [16, 96], strides = [1, 1]} : vector<16x128xf32> to vector<16x96xf32>
    %315 = arith.negf %314 : vector<16x96xf32>
    %316 = math.exp %315 : vector<16x96xf32>
    %cst_62 = arith.constant 1.000000e+00 : f32
    %317 = vector.broadcast %cst_62 : f32 to vector<16x96xf32>
    %318 = arith.addf %317, %316 : vector<16x96xf32>
    %319 = arith.divf %317, %318 : vector<16x96xf32>
    %320 = vector.extract_strided_slice %288 {offsets = [0, 96], sizes = [16, 32], strides = [1, 1]} : vector<16x128xf32> to vector<16x32xf32>
    %321 = math.tanh %320 : vector<16x32xf32>
    %322 = vector.extract_strided_slice %319 {offsets = [0, 0], sizes = [16, 32], strides = [1, 1]} : vector<16x96xf32> to vector<16x32xf32>
    %323 = vector.extract_strided_slice %319 {offsets = [0, 32], sizes = [16, 32], strides = [1, 1]} : vector<16x96xf32> to vector<16x32xf32>
    %324 = vector.extract_strided_slice %319 {offsets = [0, 64], sizes = [16, 32], strides = [1, 1]} : vector<16x96xf32> to vector<16x32xf32>
    %325 = arith.mulf %323, %274 : vector<16x32xf32>
    %326 = arith.mulf %322, %321 : vector<16x32xf32>
    %327 = arith.addf %325, %326 : vector<16x32xf32>
    %328 = math.tanh %327 : vector<16x32xf32>
    %329 = arith.mulf %324, %328 : vector<16x32xf32>
    %330 = vector.broadcast %275 : i32 to vector<16x1xi32>
    %331 = arith.cmpi slt, %330, %13 : vector<16x1xi32>
    %332 = arith.truncf %329 : vector<16x32xf32> to vector<16x32xbf16>
    %333 = vector.shape_cast %331 : vector<16x1xi1> to vector<16x1xi1>
    %334 = vector.broadcast %333 : vector<16x1xi1> to vector<16x32xi1>
    %335 = arith.select %334, %332, %271 : vector<16x32xi1>, vector<16x32xbf16>
    %336 = vector.shape_cast %331 : vector<16x1xi1> to vector<16x1xi1>
    %337 = vector.broadcast %336 : vector<16x1xi1> to vector<16x32xi1>
    %338 = arith.select %337, %327, %274 : vector<16x32xi1>, vector<16x32xf32>
    %c5_i32 = arith.constant 5 : i32
    %339 = arith.addi %14, %c5_i32 : i32
    %c32_i32_63 = arith.constant 32 : i32
    %340 = arith.muli %c5_i32, %c32_i32_63 : i32
    %341 = tpu.assume_multiple %340, 32 : i32
    %c32_i32_64 = arith.constant 32 : i32
    %342 = arith.muli %c5_i32, %c32_i32_64 : i32
    %c16_i32_65 = arith.constant 16 : i32
    %343 = arith.addi %342, %c16_i32_65 : i32
    %344 = tpu.assume_multiple %343, 16 : i32
    %345 = arith.index_cast %341 : i32 to index
    %c0_66 = arith.constant 0 : index
    %346 = vector.load %arg10[%345, %c0_66] : memref<256x128xf32, #tpu.memory_space<vmem>>, vector<16x128xf32>
    %cst_67 = arith.constant dense<0.000000e+00> : vector<16x128xf32>
    %347 = tpu.matmul %310, %10, %cst_67 {dimension_numbers = #tpu.dot_dimension_numbers<[1], [0], [0], [1], [0, 0, 1, 1], [], []>} : vector<16x32xbf16>, vector<32x128xbf16>, vector<16x128xf32> -> vector<16x128xf32>
    %348 = arith.addf %346, %347 : vector<16x128xf32>
    %349 = arith.index_cast %344 : i32 to index
    %c0_68 = arith.constant 0 : index
    %350 = vector.load %arg10[%349, %c0_68] : memref<256x128xf32, #tpu.memory_space<vmem>>, vector<16x128xf32>
    %cst_69 = arith.constant dense<0.000000e+00> : vector<16x128xf32>
    %351 = tpu.matmul %335, %10, %cst_69 {dimension_numbers = #tpu.dot_dimension_numbers<[1], [0], [0], [1], [0, 0, 1, 1], [], []>} : vector<16x32xbf16>, vector<32x128xbf16>, vector<16x128xf32> -> vector<16x128xf32>
    %352 = arith.addf %350, %351 : vector<16x128xf32>
    %353 = vector.extract_strided_slice %348 {offsets = [0, 0], sizes = [16, 96], strides = [1, 1]} : vector<16x128xf32> to vector<16x96xf32>
    %354 = arith.negf %353 : vector<16x96xf32>
    %355 = math.exp %354 : vector<16x96xf32>
    %cst_70 = arith.constant 1.000000e+00 : f32
    %356 = vector.broadcast %cst_70 : f32 to vector<16x96xf32>
    %357 = arith.addf %356, %355 : vector<16x96xf32>
    %358 = arith.divf %356, %357 : vector<16x96xf32>
    %359 = vector.extract_strided_slice %348 {offsets = [0, 96], sizes = [16, 32], strides = [1, 1]} : vector<16x128xf32> to vector<16x32xf32>
    %360 = math.tanh %359 : vector<16x32xf32>
    %361 = vector.extract_strided_slice %358 {offsets = [0, 0], sizes = [16, 32], strides = [1, 1]} : vector<16x96xf32> to vector<16x32xf32>
    %362 = vector.extract_strided_slice %358 {offsets = [0, 32], sizes = [16, 32], strides = [1, 1]} : vector<16x96xf32> to vector<16x32xf32>
    %363 = vector.extract_strided_slice %358 {offsets = [0, 64], sizes = [16, 32], strides = [1, 1]} : vector<16x96xf32> to vector<16x32xf32>
    %364 = arith.mulf %362, %313 : vector<16x32xf32>
    %365 = arith.mulf %361, %360 : vector<16x32xf32>
    %366 = arith.addf %364, %365 : vector<16x32xf32>
    %367 = math.tanh %366 : vector<16x32xf32>
    %368 = arith.mulf %363, %367 : vector<16x32xf32>
    %369 = vector.broadcast %339 : i32 to vector<16x1xi32>
    %370 = arith.cmpi slt, %369, %12 : vector<16x1xi32>
    %371 = arith.truncf %368 : vector<16x32xf32> to vector<16x32xbf16>
    %372 = vector.shape_cast %370 : vector<16x1xi1> to vector<16x1xi1>
    %373 = vector.broadcast %372 : vector<16x1xi1> to vector<16x32xi1>
    %374 = arith.select %373, %371, %310 : vector<16x32xi1>, vector<16x32xbf16>
    %375 = vector.shape_cast %370 : vector<16x1xi1> to vector<16x1xi1>
    %376 = vector.broadcast %375 : vector<16x1xi1> to vector<16x32xi1>
    %377 = arith.select %376, %366, %313 : vector<16x32xi1>, vector<16x32xf32>
    %378 = vector.extract_strided_slice %352 {offsets = [0, 0], sizes = [16, 96], strides = [1, 1]} : vector<16x128xf32> to vector<16x96xf32>
    %379 = arith.negf %378 : vector<16x96xf32>
    %380 = math.exp %379 : vector<16x96xf32>
    %cst_71 = arith.constant 1.000000e+00 : f32
    %381 = vector.broadcast %cst_71 : f32 to vector<16x96xf32>
    %382 = arith.addf %381, %380 : vector<16x96xf32>
    %383 = arith.divf %381, %382 : vector<16x96xf32>
    %384 = vector.extract_strided_slice %352 {offsets = [0, 96], sizes = [16, 32], strides = [1, 1]} : vector<16x128xf32> to vector<16x32xf32>
    %385 = math.tanh %384 : vector<16x32xf32>
    %386 = vector.extract_strided_slice %383 {offsets = [0, 0], sizes = [16, 32], strides = [1, 1]} : vector<16x96xf32> to vector<16x32xf32>
    %387 = vector.extract_strided_slice %383 {offsets = [0, 32], sizes = [16, 32], strides = [1, 1]} : vector<16x96xf32> to vector<16x32xf32>
    %388 = vector.extract_strided_slice %383 {offsets = [0, 64], sizes = [16, 32], strides = [1, 1]} : vector<16x96xf32> to vector<16x32xf32>
    %389 = arith.mulf %387, %338 : vector<16x32xf32>
    %390 = arith.mulf %386, %385 : vector<16x32xf32>
    %391 = arith.addf %389, %390 : vector<16x32xf32>
    %392 = math.tanh %391 : vector<16x32xf32>
    %393 = arith.mulf %388, %392 : vector<16x32xf32>
    %394 = vector.broadcast %339 : i32 to vector<16x1xi32>
    %395 = arith.cmpi slt, %394, %13 : vector<16x1xi32>
    %396 = arith.truncf %393 : vector<16x32xf32> to vector<16x32xbf16>
    %397 = vector.shape_cast %395 : vector<16x1xi1> to vector<16x1xi1>
    %398 = vector.broadcast %397 : vector<16x1xi1> to vector<16x32xi1>
    %399 = arith.select %398, %396, %335 : vector<16x32xi1>, vector<16x32xbf16>
    %400 = vector.shape_cast %395 : vector<16x1xi1> to vector<16x1xi1>
    %401 = vector.broadcast %400 : vector<16x1xi1> to vector<16x32xi1>
    %402 = arith.select %401, %391, %338 : vector<16x32xi1>, vector<16x32xf32>
    %c6_i32 = arith.constant 6 : i32
    %403 = arith.addi %14, %c6_i32 : i32
    %c32_i32_72 = arith.constant 32 : i32
    %404 = arith.muli %c6_i32, %c32_i32_72 : i32
    %405 = tpu.assume_multiple %404, 32 : i32
    %c32_i32_73 = arith.constant 32 : i32
    %406 = arith.muli %c6_i32, %c32_i32_73 : i32
    %c16_i32_74 = arith.constant 16 : i32
    %407 = arith.addi %406, %c16_i32_74 : i32
    %408 = tpu.assume_multiple %407, 16 : i32
    %409 = arith.index_cast %405 : i32 to index
    %c0_75 = arith.constant 0 : index
    %410 = vector.load %arg10[%409, %c0_75] : memref<256x128xf32, #tpu.memory_space<vmem>>, vector<16x128xf32>
    %cst_76 = arith.constant dense<0.000000e+00> : vector<16x128xf32>
    %411 = tpu.matmul %374, %10, %cst_76 {dimension_numbers = #tpu.dot_dimension_numbers<[1], [0], [0], [1], [0, 0, 1, 1], [], []>} : vector<16x32xbf16>, vector<32x128xbf16>, vector<16x128xf32> -> vector<16x128xf32>
    %412 = arith.addf %410, %411 : vector<16x128xf32>
    %413 = arith.index_cast %408 : i32 to index
    %c0_77 = arith.constant 0 : index
    %414 = vector.load %arg10[%413, %c0_77] : memref<256x128xf32, #tpu.memory_space<vmem>>, vector<16x128xf32>
    %cst_78 = arith.constant dense<0.000000e+00> : vector<16x128xf32>
    %415 = tpu.matmul %399, %10, %cst_78 {dimension_numbers = #tpu.dot_dimension_numbers<[1], [0], [0], [1], [0, 0, 1, 1], [], []>} : vector<16x32xbf16>, vector<32x128xbf16>, vector<16x128xf32> -> vector<16x128xf32>
    %416 = arith.addf %414, %415 : vector<16x128xf32>
    %417 = vector.extract_strided_slice %412 {offsets = [0, 0], sizes = [16, 96], strides = [1, 1]} : vector<16x128xf32> to vector<16x96xf32>
    %418 = arith.negf %417 : vector<16x96xf32>
    %419 = math.exp %418 : vector<16x96xf32>
    %cst_79 = arith.constant 1.000000e+00 : f32
    %420 = vector.broadcast %cst_79 : f32 to vector<16x96xf32>
    %421 = arith.addf %420, %419 : vector<16x96xf32>
    %422 = arith.divf %420, %421 : vector<16x96xf32>
    %423 = vector.extract_strided_slice %412 {offsets = [0, 96], sizes = [16, 32], strides = [1, 1]} : vector<16x128xf32> to vector<16x32xf32>
    %424 = math.tanh %423 : vector<16x32xf32>
    %425 = vector.extract_strided_slice %422 {offsets = [0, 0], sizes = [16, 32], strides = [1, 1]} : vector<16x96xf32> to vector<16x32xf32>
    %426 = vector.extract_strided_slice %422 {offsets = [0, 32], sizes = [16, 32], strides = [1, 1]} : vector<16x96xf32> to vector<16x32xf32>
    %427 = vector.extract_strided_slice %422 {offsets = [0, 64], sizes = [16, 32], strides = [1, 1]} : vector<16x96xf32> to vector<16x32xf32>
    %428 = arith.mulf %426, %377 : vector<16x32xf32>
    %429 = arith.mulf %425, %424 : vector<16x32xf32>
    %430 = arith.addf %428, %429 : vector<16x32xf32>
    %431 = math.tanh %430 : vector<16x32xf32>
    %432 = arith.mulf %427, %431 : vector<16x32xf32>
    %433 = vector.broadcast %403 : i32 to vector<16x1xi32>
    %434 = arith.cmpi slt, %433, %12 : vector<16x1xi32>
    %435 = arith.truncf %432 : vector<16x32xf32> to vector<16x32xbf16>
    %436 = vector.shape_cast %434 : vector<16x1xi1> to vector<16x1xi1>
    %437 = vector.broadcast %436 : vector<16x1xi1> to vector<16x32xi1>
    %438 = arith.select %437, %435, %374 : vector<16x32xi1>, vector<16x32xbf16>
    %439 = vector.shape_cast %434 : vector<16x1xi1> to vector<16x1xi1>
    %440 = vector.broadcast %439 : vector<16x1xi1> to vector<16x32xi1>
    %441 = arith.select %440, %430, %377 : vector<16x32xi1>, vector<16x32xf32>
    %442 = vector.extract_strided_slice %416 {offsets = [0, 0], sizes = [16, 96], strides = [1, 1]} : vector<16x128xf32> to vector<16x96xf32>
    %443 = arith.negf %442 : vector<16x96xf32>
    %444 = math.exp %443 : vector<16x96xf32>
    %cst_80 = arith.constant 1.000000e+00 : f32
    %445 = vector.broadcast %cst_80 : f32 to vector<16x96xf32>
    %446 = arith.addf %445, %444 : vector<16x96xf32>
    %447 = arith.divf %445, %446 : vector<16x96xf32>
    %448 = vector.extract_strided_slice %416 {offsets = [0, 96], sizes = [16, 32], strides = [1, 1]} : vector<16x128xf32> to vector<16x32xf32>
    %449 = math.tanh %448 : vector<16x32xf32>
    %450 = vector.extract_strided_slice %447 {offsets = [0, 0], sizes = [16, 32], strides = [1, 1]} : vector<16x96xf32> to vector<16x32xf32>
    %451 = vector.extract_strided_slice %447 {offsets = [0, 32], sizes = [16, 32], strides = [1, 1]} : vector<16x96xf32> to vector<16x32xf32>
    %452 = vector.extract_strided_slice %447 {offsets = [0, 64], sizes = [16, 32], strides = [1, 1]} : vector<16x96xf32> to vector<16x32xf32>
    %453 = arith.mulf %451, %402 : vector<16x32xf32>
    %454 = arith.mulf %450, %449 : vector<16x32xf32>
    %455 = arith.addf %453, %454 : vector<16x32xf32>
    %456 = math.tanh %455 : vector<16x32xf32>
    %457 = arith.mulf %452, %456 : vector<16x32xf32>
    %458 = vector.broadcast %403 : i32 to vector<16x1xi32>
    %459 = arith.cmpi slt, %458, %13 : vector<16x1xi32>
    %460 = arith.truncf %457 : vector<16x32xf32> to vector<16x32xbf16>
    %461 = vector.shape_cast %459 : vector<16x1xi1> to vector<16x1xi1>
    %462 = vector.broadcast %461 : vector<16x1xi1> to vector<16x32xi1>
    %463 = arith.select %462, %460, %399 : vector<16x32xi1>, vector<16x32xbf16>
    %464 = vector.shape_cast %459 : vector<16x1xi1> to vector<16x1xi1>
    %465 = vector.broadcast %464 : vector<16x1xi1> to vector<16x32xi1>
    %466 = arith.select %465, %455, %402 : vector<16x32xi1>, vector<16x32xf32>
    %c7_i32 = arith.constant 7 : i32
    %467 = arith.addi %14, %c7_i32 : i32
    %c32_i32_81 = arith.constant 32 : i32
    %468 = arith.muli %c7_i32, %c32_i32_81 : i32
    %469 = tpu.assume_multiple %468, 32 : i32
    %c32_i32_82 = arith.constant 32 : i32
    %470 = arith.muli %c7_i32, %c32_i32_82 : i32
    %c16_i32_83 = arith.constant 16 : i32
    %471 = arith.addi %470, %c16_i32_83 : i32
    %472 = tpu.assume_multiple %471, 16 : i32
    %473 = arith.index_cast %469 : i32 to index
    %c0_84 = arith.constant 0 : index
    %474 = vector.load %arg10[%473, %c0_84] : memref<256x128xf32, #tpu.memory_space<vmem>>, vector<16x128xf32>
    %cst_85 = arith.constant dense<0.000000e+00> : vector<16x128xf32>
    %475 = tpu.matmul %438, %10, %cst_85 {dimension_numbers = #tpu.dot_dimension_numbers<[1], [0], [0], [1], [0, 0, 1, 1], [], []>} : vector<16x32xbf16>, vector<32x128xbf16>, vector<16x128xf32> -> vector<16x128xf32>
    %476 = arith.addf %474, %475 : vector<16x128xf32>
    %477 = arith.index_cast %472 : i32 to index
    %c0_86 = arith.constant 0 : index
    %478 = vector.load %arg10[%477, %c0_86] : memref<256x128xf32, #tpu.memory_space<vmem>>, vector<16x128xf32>
    %cst_87 = arith.constant dense<0.000000e+00> : vector<16x128xf32>
    %479 = tpu.matmul %463, %10, %cst_87 {dimension_numbers = #tpu.dot_dimension_numbers<[1], [0], [0], [1], [0, 0, 1, 1], [], []>} : vector<16x32xbf16>, vector<32x128xbf16>, vector<16x128xf32> -> vector<16x128xf32>
    %480 = arith.addf %478, %479 : vector<16x128xf32>
    %481 = vector.extract_strided_slice %476 {offsets = [0, 0], sizes = [16, 96], strides = [1, 1]} : vector<16x128xf32> to vector<16x96xf32>
    %482 = arith.negf %481 : vector<16x96xf32>
    %483 = math.exp %482 : vector<16x96xf32>
    %cst_88 = arith.constant 1.000000e+00 : f32
    %484 = vector.broadcast %cst_88 : f32 to vector<16x96xf32>
    %485 = arith.addf %484, %483 : vector<16x96xf32>
    %486 = arith.divf %484, %485 : vector<16x96xf32>
    %487 = vector.extract_strided_slice %476 {offsets = [0, 96], sizes = [16, 32], strides = [1, 1]} : vector<16x128xf32> to vector<16x32xf32>
    %488 = math.tanh %487 : vector<16x32xf32>
    %489 = vector.extract_strided_slice %486 {offsets = [0, 0], sizes = [16, 32], strides = [1, 1]} : vector<16x96xf32> to vector<16x32xf32>
    %490 = vector.extract_strided_slice %486 {offsets = [0, 32], sizes = [16, 32], strides = [1, 1]} : vector<16x96xf32> to vector<16x32xf32>
    %491 = vector.extract_strided_slice %486 {offsets = [0, 64], sizes = [16, 32], strides = [1, 1]} : vector<16x96xf32> to vector<16x32xf32>
    %492 = arith.mulf %490, %441 : vector<16x32xf32>
    %493 = arith.mulf %489, %488 : vector<16x32xf32>
    %494 = arith.addf %492, %493 : vector<16x32xf32>
    %495 = math.tanh %494 : vector<16x32xf32>
    %496 = arith.mulf %491, %495 : vector<16x32xf32>
    %497 = vector.broadcast %467 : i32 to vector<16x1xi32>
    %498 = arith.cmpi slt, %497, %12 : vector<16x1xi32>
    %499 = arith.truncf %496 : vector<16x32xf32> to vector<16x32xbf16>
    %500 = vector.shape_cast %498 : vector<16x1xi1> to vector<16x1xi1>
    %501 = vector.broadcast %500 : vector<16x1xi1> to vector<16x32xi1>
    %502 = arith.select %501, %499, %438 : vector<16x32xi1>, vector<16x32xbf16>
    %503 = vector.shape_cast %498 : vector<16x1xi1> to vector<16x1xi1>
    %504 = vector.broadcast %503 : vector<16x1xi1> to vector<16x32xi1>
    %505 = arith.select %504, %494, %441 : vector<16x32xi1>, vector<16x32xf32>
    %506 = vector.extract_strided_slice %480 {offsets = [0, 0], sizes = [16, 96], strides = [1, 1]} : vector<16x128xf32> to vector<16x96xf32>
    %507 = arith.negf %506 : vector<16x96xf32>
    %508 = math.exp %507 : vector<16x96xf32>
    %cst_89 = arith.constant 1.000000e+00 : f32
    %509 = vector.broadcast %cst_89 : f32 to vector<16x96xf32>
    %510 = arith.addf %509, %508 : vector<16x96xf32>
    %511 = arith.divf %509, %510 : vector<16x96xf32>
    %512 = vector.extract_strided_slice %480 {offsets = [0, 96], sizes = [16, 32], strides = [1, 1]} : vector<16x128xf32> to vector<16x32xf32>
    %513 = math.tanh %512 : vector<16x32xf32>
    %514 = vector.extract_strided_slice %511 {offsets = [0, 0], sizes = [16, 32], strides = [1, 1]} : vector<16x96xf32> to vector<16x32xf32>
    %515 = vector.extract_strided_slice %511 {offsets = [0, 32], sizes = [16, 32], strides = [1, 1]} : vector<16x96xf32> to vector<16x32xf32>
    %516 = vector.extract_strided_slice %511 {offsets = [0, 64], sizes = [16, 32], strides = [1, 1]} : vector<16x96xf32> to vector<16x32xf32>
    %517 = arith.mulf %515, %466 : vector<16x32xf32>
    %518 = arith.mulf %514, %513 : vector<16x32xf32>
    %519 = arith.addf %517, %518 : vector<16x32xf32>
    %520 = math.tanh %519 : vector<16x32xf32>
    %521 = arith.mulf %516, %520 : vector<16x32xf32>
    %522 = vector.broadcast %467 : i32 to vector<16x1xi32>
    %523 = arith.cmpi slt, %522, %13 : vector<16x1xi32>
    %524 = arith.truncf %521 : vector<16x32xf32> to vector<16x32xbf16>
    %525 = vector.shape_cast %523 : vector<16x1xi1> to vector<16x1xi1>
    %526 = vector.broadcast %525 : vector<16x1xi1> to vector<16x32xi1>
    %527 = arith.select %526, %524, %463 : vector<16x32xi1>, vector<16x32xbf16>
    %528 = vector.shape_cast %523 : vector<16x1xi1> to vector<16x1xi1>
    %529 = vector.broadcast %528 : vector<16x1xi1> to vector<16x32xi1>
    %530 = arith.select %529, %519, %466 : vector<16x32xi1>, vector<16x32xf32>
    %c8_i32_90 = arith.constant 8 : i32
    %c0_91 = arith.constant 0 : index
    %c0_92 = arith.constant 0 : index
    %531 = vector.load %arg11[%c0_91, %c0_92] : memref<32x32xbf16, #tpu.memory_space<vmem>>, vector<16x32xbf16>
    tpu.vector_store %arg11[%c0_91, %c0_92], %502 {strides = array<i32>} : memref<32x32xbf16, #tpu.memory_space<vmem>>, vector<16x32xbf16>,
    %c16_93 = arith.constant 16 : index
    %c0_94 = arith.constant 0 : index
    %532 = vector.load %arg11[%c16_93, %c0_94] : memref<32x32xbf16, #tpu.memory_space<vmem>>, vector<16x32xbf16>
    tpu.vector_store %arg11[%c16_93, %c0_94], %527 {strides = array<i32>} : memref<32x32xbf16, #tpu.memory_space<vmem>>, vector<16x32xbf16>,
    %c0_95 = arith.constant 0 : index
    %c0_96 = arith.constant 0 : index
    %533 = vector.load %arg12[%c0_95, %c0_96] : memref<32x32xf32, #tpu.memory_space<vmem>>, vector<16x32xf32>
    tpu.vector_store %arg12[%c0_95, %c0_96], %505 {strides = array<i32>} : memref<32x32xf32, #tpu.memory_space<vmem>>, vector<16x32xf32>,
    %c16_97 = arith.constant 16 : index
    %c0_98 = arith.constant 0 : index
    %534 = vector.load %arg12[%c16_97, %c0_98] : memref<32x32xf32, #tpu.memory_space<vmem>>, vector<16x32xf32>
    tpu.vector_store %arg12[%c16_97, %c0_98], %530 {strides = array<i32>} : memref<32x32xf32, #tpu.memory_space<vmem>>, vector<16x32xf32>,
    %c0_i32_99 = arith.constant 0 : i32
    %535 = arith.cmpi eq, %arg1, %c0_i32_99 : i32
    %536 = arith.extui %535 : i1 to i32
    %c0_i32_100 = arith.constant 0 : i32
    %537 = arith.cmpi ne, %536, %c0_i32_100 : i32
    scf.if %537 {
      %c0_101 = arith.constant 0 : index
      %c0_102 = arith.constant 0 : index
      %538 = vector.load %arg11[%c0_101, %c0_102] : memref<32x32xbf16, #tpu.memory_space<vmem>>, vector<32x32xbf16>
      %c0_103 = arith.constant 0 : index
      %c0_104 = arith.constant 0 : index
      %539 = vector.load %arg7[%c0_103, %c0_104] : memref<32x128xbf16, #tpu.memory_space<vmem>>, vector<32x128xbf16>
      %cst_105 = arith.constant dense<0.000000e+00> : vector<32x128xf32>
      %540 = tpu.matmul %538, %539, %cst_105 {dimension_numbers = #tpu.dot_dimension_numbers<[1], [0], [0], [1], [0, 0, 1, 1], [], []>} : vector<32x32xbf16>, vector<32x128xbf16>, vector<32x128xf32> -> vector<32x128xf32>
      %c0_106 = arith.constant 0 : index
      %c0_107 = arith.constant 0 : index
      %541 = vector.load %arg8[%c0_106, %c0_107] : memref<1x128xf32, #tpu.memory_space<vmem>>, vector<1x128xf32>
      %542 = vector.broadcast %541 : vector<1x128xf32> to vector<32x128xf32>
      %543 = arith.addf %540, %542 : vector<32x128xf32>
      %c0_108 = arith.constant 0 : index
      %c0_109 = arith.constant 0 : index
      %544 = vector.load %arg9[%c0_108, %c0_109] : memref<32x128xf32, #tpu.memory_space<vmem>>, vector<32x128xf32>
      tpu.vector_store %arg9[%c0_108, %c0_109], %543 {strides = array<i32>} : memref<32x128xf32, #tpu.memory_space<vmem>>, vector<32x128xf32>,
    } else {
    }
    return
  }
  func.func @transform_0(%arg0: i32, %arg1: i32) -> (i32, i32) {
    %c1_i32 = arith.constant 1 : i32
    %0 = arith.muli %arg0, %c1_i32 : i32
    %1 = arith.addi %0, %arg1 : i32
    %c0_i32 = arith.constant 0 : i32
    %c0_i32_0 = arith.constant 0 : i32
    return %1, %c0_i32 : i32, i32
  }
  func.func @transform_1(%arg0: i32, %arg1: i32) -> (i32, i32) {
    %c0_i32 = arith.constant 0 : i32
    %c0_i32_0 = arith.constant 0 : i32
    return %arg0, %c0_i32 : i32, i32
  }
  func.func @transform_2(%arg0: i32, %arg1: i32) -> (i32, i32) {
    %c0_i32 = arith.constant 0 : i32
    %c0_i32_0 = arith.constant 0 : i32
    %c0_i32_1 = arith.constant 0 : i32
    return %c0_i32, %c0_i32_0 : i32, i32
  }
  func.func @transform_3(%arg0: i32, %arg1: i32) -> (i32, i32) {
    %c0_i32 = arith.constant 0 : i32
    %c0_i32_0 = arith.constant 0 : i32
    %c0_i32_1 = arith.constant 0 : i32
    return %c0_i32, %c0_i32_0 : i32, i32
  }
  func.func @transform_4(%arg0: i32, %arg1: i32) -> (i32, i32) {
    %c0_i32 = arith.constant 0 : i32
    %c0_i32_0 = arith.constant 0 : i32
    %c0_i32_1 = arith.constant 0 : i32
    return %c0_i32, %c0_i32_0 : i32, i32
  }
  func.func @transform_5(%arg0: i32, %arg1: i32) -> (i32, i32) {
    %c0_i32 = arith.constant 0 : i32
    %c0_i32_0 = arith.constant 0 : i32
    %c0_i32_1 = arith.constant 0 : i32
    return %c0_i32, %c0_i32_0 : i32, i32
  }
  func.func @transform_6(%arg0: i32, %arg1: i32) -> (i32, i32) {
    %c0_i32 = arith.constant 0 : i32
    %c0_i32_0 = arith.constant 0 : i32
    %c0_i32_1 = arith.constant 0 : i32
    return %c0_i32, %c0_i32_0 : i32, i32
  }
  func.func @transform_7(%arg0: i32, %arg1: i32) -> (i32, i32) {
    %c0_i32 = arith.constant 0 : i32
    %c0_i32_0 = arith.constant 0 : i32
    return %arg0, %c0_i32 : i32, i32
  }
}

</mosaic_0001>

<bundles_post_ra>
// kernel: tpu_custom_call.1
= control target key start
LH: loop header
LB: loop body
LE: loop exit
PB: predicated region body
PF: predicated region fallthrough
CT: control target
= control target key end

     0   :  { %v3311_v1 = vmov 0.0   ;;  %vm190_vm0 = vcmask 130048   ;;  %vm56_vm1 = vcmask 261120   ;;  %vm3312_vm2 = vmmov 0   ;;  %s4312_s0 = inlined_call_operand.vmem [shape: bf16[256,16], index: 0, kind: input, shape index: {}]   ;;  %s4313_s1 = inlined_call_operand.vmem [shape: s32[32,1], index: 1, kind: input, shape index: {}]   ;;  %s4314_s2 = inlined_call_operand.vmem [shape: bf16[16,128], index: 2, kind: input, shape index: {}]   ;;  %s4315_s3 = inlined_call_operand.vmem [shape: bf16[32,128], index: 3, kind: input, shape index: {}]   ;;  %s4316_s4 = inlined_call_operand.vmem [shape: f32[1,128], index: 4, kind: input, shape index: {}]   ;;  %s4317_s5 = inlined_call_operand.vmem [shape: bf16[32,128], index: 5, kind: input, shape index: {}]   ;;  %s4318_s6 = inlined_call_operand.vmem [shape: f32[1,128], index: 6, kind: input, shape index: {}]   ;;  %s4319_s7 = inlined_call_operand.hbm [shape: f32[32,128], index: 7, kind: output, shape index: {}]  }
   0x1   :  { %v3002_v0 = vld [vmem:[%s4314_s2] sm:$0xff]   ;;  %2855 = vmatprep.subr.bf16.mxu1 %v3311_v1  ;;  %v3005_v4 = vld [vmem:[%s4312_s0 + $0x8] sm:$0xff]   ;;  %59 = vst.msk [vmem:[#allocation4] sm:$0xff] %vm56_vm1, %v3311_v1  ;;  %60 = vst.msk [vmem:[#allocation4 + $0x8] sm:$0xff] %vm56_vm1, %v3311_v1  ;;  %2859 = vmatprep.mubr.msk.bf16.mxu1 %vm3312_vm2, %v3311_v1  ;;  %v3313_v6 = vmov 0  }
   0x2   :  { %v3367_v2 = vld [vmem:[%s4315_s3] sm:$0xff]   ;;  %2821 = vmatprep.subr.bf16.mxu0 %v3002_v0  ;;  %v3381_v5 = vld [vmem:[%s4315_s3 + $0x8] sm:$0xff]   ;;  %61 = vst.msk [vmem:[#allocation4 + $0x10] sm:$0xff] %vm56_vm1, %v3311_v1  ;;  %62 = vst.msk [vmem:[#allocation4 + $0x18] sm:$0xff] %vm56_vm1, %v3311_v1  ;;  %3000 = vset.pattern.permute.xlu0 %v3313_v6 }
   0x3   :  { %v3004_v3 = vld [vmem:[%s4312_s0] sm:$0xff]   ;;  %2856 = vmatpush3.bf16.msra.mxu1 %v3367_v2  ;;  %2822 = vmatpush3.bf16.msra.mxu0 %v3002_v0  ;;  %57 = vst.msk [vmem:[#allocation3] sm:$0xff] %vm56_vm1, %v3313_v6  ;;  %58 = vst.msk [vmem:[#allocation3 + $0x8] sm:$0xff] %vm56_vm1, %v3313_v6 }
   0x4   :  { %2823 = vmatprep.mubr.msk.bf16.mxu0 %vm190_vm0, %v3004_v3  ;;  %2857 = vmatprep.subr.bf16.mxu1 %v3311_v1 }
   0x5   :  { %3001 = vset.pattern.permute.xlu1 %v3313_v6  ;;  %2919 = vmatprep.subr.bf16.mxu0 %v3311_v1 }
   0x6   :  { %2824 = vmatmul.mubr.msk.bf16.vlgmr.msra.gmra.mrb[0].mxu0 %vm190_vm0, %v3005_v4 }
   0x7   :  { %2858 = vmatpush3.bf16.msra.mxu1 %v3381_v5  ;;  %2920 = vmatpush3.bf16.msra.mxu0 %v3367_v2 }
   0x8   :  { %2863 = vmatprep.subr.bf16.mxu1 %v3311_v1  ;;  %2921 = vmatprep.subr.bf16.mxu0 %v3311_v1 }
   0xa   :  { %v3405_v7 = vld [vmem:[#allocation3] sm:$0xff] }
   0xb   :  { %2922 = vmatpush3.bf16.msra.mxu0 %v3381_v5  ;;  %2860 = vmatmul.mubr.msk.bf16.vlgmr.msra.gmra.mrb[0].mxu1 %vm56_vm1, %v3405_v7 }
   0xc   :  { %2935 = vmatprep.subr.bf16.mxu0 %v3311_v1  ;;  %2864 = vmatpush3.bf16.msra.mxu1 %v3367_v2 }
   0xd   :  { %2867 = vmatprep.mubr.msk.bf16.mxu1 %vm3312_vm2, %v3311_v1  ;;  %2865 = vmatprep.subr.bf16.mxu1 %v3311_v1 }
   0xe   :  { %12 = vsyncpa [#allocation6], 0  ;;  %v3416_v8 = vld [vmem:[#allocation3 + $0x8] sm:$0xff]  ;;  %v3430_v10 = vld [vmem:[%s4316_s4] ss:$0 sm:$0xff]  ;;  %s3314_s12 = smov 32  }
   0xf   :  { %v442_v32 = vld [vmem:[#allocation4] sm:$0xff]  ;;  %v443_v35 = vld [vmem:[#allocation4 + $0x8] sm:$0xff]  ;;  %v445_v53 = vld [vmem:[#allocation4 + $0x10] sm:$0xff]  ;;  %s3315_s21 = smov 64   ;;  %s3317_s20 = smov [#allocation5]  }
  0x10   :  { %2866 = vmatpush3.bf16.msra.mxu1 %v3381_v5  ;;  %v3452_v55 = vld [vmem:[%s4313_s1] sm:$0xff]  ;;  %v446_v58 = vld [vmem:[#allocation4 + $0x18] sm:$0xff]  ;;  %v3463_v60 = vld [vmem:[%s4313_s1 + $0x18] sm:$0xff]  ;;  %s2598_s22 = sshll.u32 %s3317_s20, 4  ;;  %s2599_s22 = int_to_ptr.vmem [resolvable:$true] %s2598_s22 }
  0x11   :  { %2871 = vmatprep.subr.bf16.mxu1 %v3311_v1  ;;  %vm2655_vm3 = vcmp.gt.s32.totalorder %v3452_v55, 0  ;;  %v3468_v61 = vld [vmem:[%s4313_s1 + $0x8] sm:$0xff]  ;;  %vm2661_vm4 = vcmp.gt.s32.totalorder %v3463_v60, 0  ;;  %v3481_v4 = vld [vmem:[%s4313_s1 + $0x10] sm:$0xff]  ;;  %s3287_s23 = scalar_lea.vmem %s2599_s22, 512  ;;  %p3292_p1 = scmp.lt.s32.totalorder %s2599_s22, %s2599_s22 }
  0x12   :  { %v617_v0 = vsel %vm2655_vm3, 1, %v3313_v6  ;;  %vm2656_vm5 = vcmp.gt.s32.totalorder %v3468_v61, 0  ;;  %vm2660_vm6 = vcmp.gt.s32.totalorder %v3481_v4, 0  ;;  %p3288_p0 = scmp.ne.s32.totalorder %s2599_s22, %s3287_s23  ;;  %p3293_p2 = scmp.lt.s32.totalorder %s3287_s23, %s3287_s23 }
  0x13   :  { %2868 = vmatmul.mubr.msk.bf16.vlgmr.msra.gmra.mrb[4].mxu1 %vm56_vm1, %v3416_v8 }
  0x14   :  { %2872 = vmatpush3.bf16.msra.mxu1 %v3367_v2  ;;  %2875 = vmatprep.mubr.msk.bf16.mxu1 %vm3312_vm2, %v3311_v1  ;;  %p3294_p3 = por %p3293_p2, %p3292_p1 }
  0x15   :  { %2873 = vmatprep.subr.bf16.mxu1 %v3311_v1 }
  0x16   :  { %p3295_p4 = pnand %p3294_p3, %p3288_p0 }
  0x18   :  { %2874 = vmatpush3.bf16.msra.mxu1 %v3381_v5 }
  0x19   :  { %2879 = vmatprep.subr.bf16.mxu1 %v3311_v1 }
  0xd9   :  { %v2825_v9 = vpop.f32.mrb[0].mxu0 }
  0xda   :  { %v273_v11 = vpop.f32.mrb[1].mxu0  ;;  %v282_v22 = vadd.f32 %v2825_v9, %v3430_v10  ;;  %v702_v9 = vsel %vm2661_vm4, 1, %v3313_v6  ;;  %vm2667_vm4 = vcmp.gt.s32.totalorder %v3452_v55, 1 }
  0xdb   :  { %v2826_v12 = vpop.f32.mrb[2].mxu0  ;;  %v274_v14 = vadd.f32 %v3430_v10, %v273_v11  ;;  %v618_v11 = vsel %vm2656_vm5, 1, %v3313_v6  ;;  %vm2668_vm5 = vcmp.gt.s32.totalorder %v3468_v61, 1 }
  0xdc   :  { %v276_v13 = vpop.f32.mrb[3].mxu0  ;;  %v285_v24 = vadd.f32 %v2826_v12, %v3430_v10  ;;  %v701_v12 = vsel %vm2660_vm6, 1, %v3313_v6  ;;  %vm2672_vm6 = vcmp.gt.s32.totalorder %v3481_v4, 1 }
  0xdd   :  { %v277_v15 = vadd.f32 %v3430_v10, %v276_v13 }
  0xde   :  { %v499_v16 = vpop.f32.mrb[0].mxu1 }
  0xdf   :  { %v506_v17 = vadd.f32 %v499_v16, %v274_v14  ;;  %v2861_v18 = vpop.f32.mrb[1].mxu1 }
  0xe0   :  { %v502_v19 = vpop.f32.mrb[2].mxu1 }
  0xe1   :  { %3023 = vtanh.f32 %v506_v17  ;;  %v507_v20 = vadd.f32 %v502_v19, %v277_v15  ;;  %v2862_v21 = vpop.f32.mrb[3].mxu1  ;;  %v2653_v36 = vmul.f32 -1.442695, %v506_v17 }
  0xe3   :  { %3025 = vtanh.f32 %v507_v20  ;;  %v2654_v37 = vmul.f32 -1.442695, %v507_v20 }
  0xe6   :  { %v548_v23 = vpop.f32.mrb[4].mxu1 }
  0xe7   :  { %v555_v25 = vadd.f32 %v548_v23, %v282_v22  ;;  %v2869_v26 = vpop.f32.mrb[5].mxu1 }
  0xe8   :  { %v551_v27 = vpop.f32.mrb[6].mxu1 }
  0xe9   :  { %3027 = vtanh.f32 %v555_v25  ;;  %v556_v28 = vadd.f32 %v551_v27, %v285_v24  ;;  %v2870_v29 = vpop.f32.mrb[7].mxu1  ;;  %v2658_v38 = vmul.f32 -1.442695, %v555_v25 }
  0xeb   :  { %v3024_v30 = vpop.eup %3023  ;;  %3029 = vtanh.f32 %v556_v28  ;;  %v2659_v39 = vmul.f32 -1.442695, %v556_v28 }
  0xec   :  { %583 = vrot.lane.b32.xlu0 %v3024_v30, %s3314_s12  ;;  %3031 = vpow2.f32 %v2653_v36 }
  0xed   :  { %v3026_v31 = vpop.eup %3025  ;;  %3033 = vpow2.f32 %v2654_v37 }
  0xee   :  { %3035 = vpow2.f32 %v2658_v38 }
  0xef   :  { %3037 = vpow2.f32 %v2659_v39 }
  0xf0   :  { %585 = vrot.lane.b32.xlu0 %v3026_v31, %s3314_s12  ;;  %v3007_v31 = vld [vmem:[%s4312_s0 + $0x10] sm:$0xff]  }
  0xf1   :  { %2827 = vmatprep.mubr.msk.bf16.mxu0 %vm190_vm0, %v3007_v31 }
  0xf3   :  { %v3028_v33 = vpop.eup %3027 }
  0xf4   :  { %573 = vrot.lane.b32.xlu0 %v442_v32, %s3314_s12  ;;  %668 = vrot.lane.b32.xlu1 %v3028_v33, %s3314_s12  ;;  %v3008_v32 = vld [vmem:[%s4312_s0 + $0x18] sm:$0xff]  }
  0xf5   :  { %v3030_v34 = vpop.eup %3029  ;;  %2828 = vmatmul.mubr.msk.bf16.gmra.mrb[4].mxu0 %vm190_vm0, %v3008_v32 }
  0xf6   :  { %v3032_v40 = vpop.eup %3031 }
  0xf7   :  { %v563_v41 = vadd.f32 1.0, %v3032_v40  ;;  %v3034_v42 = vpop.eup %3033 }
  0xf8   :  { %670 = vrot.lane.b32.xlu1 %v3030_v34, %s3314_s12  ;;  %v564_v43 = vadd.f32 1.0, %v3034_v42  ;;  %v3036_v44 = vpop.eup %3035 }
  0xf9   :  { %3039 = vrcp.f32 %v563_v41  ;;  %v648_v45 = vadd.f32 1.0, %v3036_v44  ;;  %v3038_v46 = vpop.eup %3037 }
  0xfa   :  { %3041 = vrcp.f32 %v564_v43  ;;  %v649_v47 = vadd.f32 1.0, %v3038_v46 }
  0xfb   :  { %3043 = vrcp.f32 %v648_v45 }
  0xfc   :  { %575 = vrot.lane.b32.xlu1 %v443_v35, %s3314_s12  ;;  %3045 = vrcp.f32 %v649_v47 }
 0x103   :  { %v3442_v48 = vpop.eup %3039 }
 0x104   :  { %v3446_v51 = vpop.eup %3041 }
 0x105   :  { %v3456_v56 = vpop.eup %3043 }
 0x106   :  { %v3472_v62 = vpop.eup %3045 }
 0x15e   :  { %v584_v49 = vpop.permute.xlu0 %583 }
 0x15f   :  { %v589_v50 = vmul.f32 %v3442_v48, %v584_v49 }
 0x161   :  { %593 = vrot.lane.b32.xlu0 %v589_v50, %s3314_s12 }
 0x162   :  { %v586_v52 = vpop.permute.xlu0 %585 }
 0x163   :  { %v590_v54 = vmul.f32 %v3446_v51, %v586_v52 }
 0x165   :  { %658 = vrot.lane.b32.xlu0 %v445_v53, %s3314_s12  ;;  %595 = vrot.lane.b32.xlu1 %v590_v54, %s3314_s12 }
 0x166   :  { %v669_v57 = vpop.permute.xlu1 %668  ;;  %v574_v13 = vpop.permute.xlu0 %573 }
 0x167   :  { %v674_v59 = vmul.f32 %v3456_v56, %v669_v57  ;;  %v579_v14 = vmul.f32 %v3442_v48, %v574_v13 }
 0x169   :  { %678 = vrot.lane.b32.xlu0 %v674_v59, %s3314_s12  ;;  %660 = vrot.lane.b32.xlu1 %v446_v58, %s3314_s12 }
 0x16a   :  { %v671_v63 = vpop.permute.xlu1 %670 }
 0x16b   :  { %v675_v3 = vmul.f32 %v3472_v62, %v671_v63 }
 0x16d   :  { %620 = vperm.xlu0 %3000, %v617_v0   ;;  %680 = vrot.lane.b32.xlu1 %v675_v3, %s3314_s12 }
 0x16e   :  { %v576_v15 = vpop.permute.xlu1 %575 }
 0x16f   :  { %v580_v18 = vmul.f32 %v3446_v51, %v576_v15 }
 0x171   :  { %707 = vperm.xlu0 %3000, %v702_v9   ;;  %623 = vperm.xlu1 %3001, %v618_v11  }
 0x175   :  { %704 = vperm.xlu1 %3001, %v701_v12  }
 0x1c8   :  { %v2829_v9 = vpop.f32.mrb[4].mxu0 }
 0x1c9   :  { %v289_v11 = vpop.f32.mrb[5].mxu0 }
 0x1ca   :  { %v2830_v12 = vpop.f32.mrb[6].mxu0 }
 0x1d3   :  { %v594_v16 = vpop.permute.xlu0 %593 }
 0x1d4   :  { %v599_v17 = vadd.f32 %v594_v16, %v579_v14 }
 0x1d6   :  { %3047 = vtanh.f32 %v599_v17 }
 0x1d7   :  { %v659_v19 = vpop.permute.xlu0 %658  ;;  %v596_v20 = vpop.permute.xlu1 %595 }
 0x1d8   :  { %v600_v21 = vadd.f32 %v596_v20, %v580_v18  ;;  %v664_v22 = vmul.f32 %v3456_v56, %v659_v19 }
 0x1da   :  { %3049 = vtanh.f32 %v600_v21 }
 0x1db   :  { %v679_v23 = vpop.permute.xlu0 %678  ;;  %v661_v24 = vpop.permute.xlu1 %660 }
 0x1dc   :  { %v684_v25 = vadd.f32 %v679_v23, %v664_v22  ;;  %v665_v26 = vmul.f32 %v3472_v62, %v661_v24  ;;  %v298_v22 = vadd.f32 %v2829_v9, %v3430_v10 }
 0x1de   :  { %3051 = vtanh.f32 %v684_v25 }
 0x1df   :  { %v681_v27 = vpop.permute.xlu1 %680 }
 0x1e0   :  { %v3048_v28 = vpop.eup %3047  ;;  %v685_v29 = vadd.f32 %v681_v27, %v665_v26 }
 0x1e1   :  { %605 = vrot.lane.b32.xlu1 %v3048_v28, %s3314_s12 }
 0x1e2   :  { %3053 = vtanh.f32 %v685_v29 }
 0x1e4   :  { %v3050_v30 = vpop.eup %3049 }
 0x1e5   :  { %607 = vrot.lane.b32.xlu0 %v3050_v30, %s3314_s12  ;;  %636 = vrot.lane.b32.xlu1 %v3405_v7, %s3315_s21 }
 0x1e8   :  { %v3052_v33 = vpop.eup %3051 }
 0x1e9   :  { %690 = vrot.lane.b32.xlu0 %v3052_v33, %s3314_s12 }
 0x1ec   :  { %v3054_v34 = vpop.eup %3053  ;;  %v621_v35 = vpop.permute.xlu0 %620 }
 0x1ed   :  { %vm625_vm7 = vcmp.eq.s32.totalorder %v621_v35, 1  ;;  %692 = vrot.lane.b32.xlu1 %v3054_v34, %s3314_s12  ;;  %720 = vrot.lane.b32.xlu0 %v3416_v8, %s3315_s21 }
 0x1ee   :  { %v3508_v7 = vsel %vm625_vm7, %v599_v17, %v574_v13  ;;  %vm627_vm11 = vmpackc.low %vm625_vm7, %vm625_vm7  ;;  %v292_v13 = vpop.f32.mrb[7].mxu0  ;;  %vm2673_vm7 = vcmp.gt.s32.totalorder %v3463_v60, 1 }
 0x1ef   :  { %v629_v42 = vsel %vm627_vm11, 65537, %v3313_v6  ;;  %v293_v16 = vadd.f32 %v3430_v10, %v292_v13  ;;  %v955_v13 = vsel %vm2672_vm6, 1, %v3313_v6  ;;  %vm2680_vm6 = vcmp.gt.s32.totalorder %v3468_v61, 2 }
 0x1f0   :  { %v708_v36 = vpop.permute.xlu0 %707  ;;  %v624_v37 = vpop.permute.xlu1 %623 }
 0x1f1   :  { %vm710_vm8 = vcmp.eq.s32.totalorder %v708_v36, 1  ;;  %vm626_vm9 = vcmp.eq.s32.totalorder %v624_v37, 1 }
 0x1f2   :  { %v3510_v38 = vsel %vm710_vm8, %v685_v29, %v661_v24  ;;  %v3512_v39 = vsel %vm626_vm9, %v600_v21, %v576_v15  ;;  %vm628_vm12 = vmpackc.low %vm626_vm9, %vm626_vm9  ;;  %v301_v24 = vadd.f32 %v2830_v12, %v3430_v10  ;;  %v884_v12 = vsel %vm2668_vm5, 1, %v3313_v6 }
 0x1f3   :  { %v630_v8 = vsel %vm628_vm12, 65537, %v3313_v6  ;;  %vm712_vm13 = vmpackc.low %vm710_vm8, %vm710_vm8  ;;  %vm2679_vm5 = vcmp.gt.s32.totalorder %v3452_v55, 2 }
 0x1f4   :  { %v705_v40 = vpop.permute.xlu1 %704  ;;  %v2657_v45 = vcombine.low %v629_v42, %v630_v8  ;;  %v714_v52 = vsel %vm712_vm13, 65537, %v3313_v6 }
 0x1f5   :  { %vm709_vm10 = vcmp.eq.s32.totalorder %v705_v40, 1 }
 0x1f6   :  { %v3514_v41 = vsel %vm709_vm10, %v684_v25, %v659_v19  ;;  %vm711_vm14 = vmpackc.low %vm709_vm10, %vm709_vm10  ;;  %vm634_vm15 = vcmp.ne.s16.totalorder %v2657_v45, 0 }
 0x1f7   :  { %v713_v53 = vsel %vm711_vm14, 65537, %v3313_v6 }
 0x1f8   :  { %v2662_v59 = vcombine.low %v713_v53, %v714_v52 }
 0x1fa   :  { %vm718_vm3 = vcmp.ne.s16.totalorder %v2662_v59, 0 }
 0x253   :  { %v606_v43 = vpop.permute.xlu1 %605 }
 0x254   :  { %v611_v46 = vmul.f32 %v3442_v48, %v606_v43 }
 0x257   :  { %v608_v44 = vpop.permute.xlu0 %607  ;;  %v637_v49 = vpop.permute.xlu1 %636 }
 0x258   :  { %v612_v47 = vmul.f32 %v3446_v51, %v608_v44 }
 0x25a   :  { %v616_v50 = vpack.c.bf16 %v612_v47, %v611_v46 }
 0x25b   :  { %v691_v57 = vpop.permute.xlu0 %690 }
 0x25c   :  { %v3522_v54 = vsel %vm634_vm15, %v616_v50, %v637_v49  ;;  %v696_v48 = vmul.f32 %v3456_v56, %v691_v57 }
 0x25d   :  { %731 = vrot.lane.b32.xlu1 %v3522_v54, %s3315_s21 }
 0x25f   :  { %v693_v58 = vpop.permute.xlu1 %692  ;;  %v721_v63 = vpop.permute.xlu0 %720 }
 0x260   :  { %v697_v51 = vmul.f32 %v3472_v62, %v693_v58  ;;  %v290_v62 = vadd.f32 %v3430_v10, %v289_v11  ;;  %v883_v11 = vsel %vm2667_vm4, 1, %v3313_v6 }
 0x262   :  { %v700_v0 = vpack.c.bf16 %v697_v51, %v696_v48 }
 0x264   :  { %v3528_v3 = vsel %vm718_vm3, %v700_v0, %v721_v63 }
 0x265   :  { %783 = vrot.lane.b32.xlu0 %v3528_v3, %s3315_s21 }
 0x2cf   :  { %v732_v14 = vpop.permute.xlu1 %731 }
 0x2d0   :  { %2876 = vmatmul.mubr.msk.bf16.vlgmr.msra.gmra.mrb[8].mxu1 %vm56_vm1, %v732_v14  ;;  %v956_v14 = vsel %vm2673_vm7, 1, %v3313_v6  ;;  %vm2684_vm7 = vcmp.gt.s32.totalorder %v3481_v4, 2 }
 0x2d1   :  { %2880 = vmatpush3.bf16.msra.mxu1 %v3367_v2  ;;  %2883 = vmatprep.mubr.msk.bf16.mxu1 %vm3312_vm2, %v3311_v1 }
 0x2d2   :  { %2881 = vmatprep.subr.bf16.mxu1 %v3311_v1 }
 0x2d5   :  { %2882 = vmatpush3.bf16.msra.mxu1 %v3381_v5 }
 0x2d6   :  { %2887 = vmatprep.subr.bf16.mxu1 %v3311_v1 }
 0x2d7   :  { %v784_v56 = vpop.permute.xlu0 %783 }
 0x2d8   :  { %2884 = vmatmul.mubr.msk.bf16.vlgmr.msra.gmra.mrb[12].mxu1 %vm56_vm1, %v784_v56 }
 0x2d9   :  { %2888 = vmatpush3.bf16.msra.mxu1 %v3367_v2  ;;  %2891 = vmatprep.mubr.msk.bf16.mxu1 %vm3312_vm2, %v3311_v1 }
 0x2da   :  { %2889 = vmatprep.subr.bf16.mxu1 %v3311_v1 }
 0x2dd   :  { %2890 = vmatpush3.bf16.msra.mxu1 %v3381_v5 }
 0x2de   :  { %2895 = vmatprep.subr.bf16.mxu1 %v3311_v1 }
 0x3a3   :  { %v770_v15 = vpop.f32.mrb[8].mxu1 }
 0x3a4   :  { %v777_v17 = vadd.f32 %v770_v15, %v290_v62  ;;  %v2877_v18 = vpop.f32.mrb[9].mxu1 }
 0x3a5   :  { %v773_v19 = vpop.f32.mrb[10].mxu1 }
 0x3a6   :  { %3055 = vtanh.f32 %v777_v17  ;;  %v778_v20 = vadd.f32 %v773_v19, %v293_v16  ;;  %v2878_v21 = vpop.f32.mrb[11].mxu1  ;;  %v2665_v34 = vmul.f32 -1.442695, %v777_v17 }
 0x3a8   :  { %3057 = vtanh.f32 %v778_v20  ;;  %v2666_v35 = vmul.f32 -1.442695, %v778_v20 }
 0x3ab   :  { %v822_v23 = vpop.f32.mrb[12].mxu1 }
 0x3ac   :  { %v829_v25 = vadd.f32 %v822_v23, %v298_v22  ;;  %v2885_v26 = vpop.f32.mrb[13].mxu1 }
 0x3ad   :  { %v825_v27 = vpop.f32.mrb[14].mxu1 }
 0x3ae   :  { %3059 = vtanh.f32 %v829_v25  ;;  %v830_v28 = vadd.f32 %v825_v27, %v301_v24  ;;  %v2886_v29 = vpop.f32.mrb[15].mxu1  ;;  %v2670_v36 = vmul.f32 -1.442695, %v829_v25  ;;  %v3009_v27 = vld [vmem:[%s4312_s0 + $0x20] sm:$0xff]  }
 0x3af   :  { %2831 = vmatprep.mubr.msk.bf16.mxu0 %vm190_vm0, %v3009_v27 }
 0x3b0   :  { %v3056_v30 = vpop.eup %3055  ;;  %3061 = vtanh.f32 %v830_v28  ;;  %v2671_v37 = vmul.f32 -1.442695, %v830_v28  ;;  %v3010_v28 = vld [vmem:[%s4312_s0 + $0x28] sm:$0xff]  }
 0x3b1   :  { %849 = vrot.lane.b32.xlu1 %v3056_v30, %s3314_s12  ;;  %3063 = vpow2.f32 %v2665_v34  ;;  %2832 = vmatmul.mubr.msk.bf16.gmra.mrb[8].mxu0 %vm190_vm0, %v3010_v28 }
 0x3b2   :  { %v3058_v31 = vpop.eup %3057  ;;  %3065 = vpow2.f32 %v2666_v35 }
 0x3b3   :  { %851 = vrot.lane.b32.xlu0 %v3058_v31, %s3314_s12  ;;  %3067 = vpow2.f32 %v2670_v36 }
 0x3b4   :  { %3069 = vpow2.f32 %v2671_v37 }
 0x3b8   :  { %v3060_v32 = vpop.eup %3059 }
 0x3b9   :  { %922 = vrot.lane.b32.xlu1 %v3060_v32, %s3314_s12 }
 0x3ba   :  { %v3062_v33 = vpop.eup %3061 }
 0x3bb   :  { %924 = vrot.lane.b32.xlu0 %v3062_v33, %s3314_s12  ;;  %v3064_v40 = vpop.eup %3063 }
 0x3bc   :  { %v3066_v42 = vpop.eup %3065  ;;  %v837_v8 = vadd.f32 1.0, %v3064_v40 }
 0x3bd   :  { %v838_v43 = vadd.f32 1.0, %v3066_v42  ;;  %v3068_v44 = vpop.eup %3067 }
 0x3be   :  { %3071 = vrcp.f32 %v837_v8  ;;  %v3070_v45 = vpop.eup %3069  ;;  %v910_v46 = vadd.f32 1.0, %v3068_v44 }
 0x3bf   :  { %3073 = vrcp.f32 %v838_v43  ;;  %v911_v47 = vadd.f32 1.0, %v3070_v45 }
 0x3c0   :  { %3075 = vrcp.f32 %v910_v46 }
 0x3c1   :  { %3077 = vrcp.f32 %v911_v47 }
 0x3c8   :  { %v3554_v49 = vpop.eup %3071 }
 0x3c9   :  { %v3557_v53 = vpop.eup %3073  ;;  %v845_v56 = vmul.f32 %v3554_v49, %v3508_v7 }
 0x3ca   :  { %v3562_v59 = vpop.eup %3075  ;;  %v846_v16 = vmul.f32 %v3557_v53, %v3512_v39 }
 0x3cb   :  { %v3566_v63 = vpop.eup %3077  ;;  %v918_v19 = vmul.f32 %v3562_v59, %v3514_v41 }
 0x3cc   :  { %v919_v22 = vmul.f32 %v3566_v63, %v3510_v38 }
 0x423   :  { %v850_v50 = vpop.permute.xlu1 %849 }
 0x424   :  { %v855_v52 = vmul.f32 %v3554_v49, %v850_v50 }
 0x425   :  { %v852_v57 = vpop.permute.xlu0 %851 }
 0x426   :  { %859 = vrot.lane.b32.xlu1 %v855_v52, %s3314_s12  ;;  %v856_v58 = vmul.f32 %v3557_v53, %v852_v57 }
 0x428   :  { %861 = vrot.lane.b32.xlu0 %v856_v58, %s3314_s12 }
 0x42b   :  { %v923_v48 = vpop.permute.xlu1 %922 }
 0x42c   :  { %v928_v51 = vmul.f32 %v3562_v59, %v923_v48 }
 0x42d   :  { %v925_v0 = vpop.permute.xlu0 %924 }
 0x42e   :  { %932 = vrot.lane.b32.xlu1 %v928_v51, %s3314_s12  ;;  %v929_v9 = vmul.f32 %v3566_v63, %v925_v0 }
 0x430   :  { %934 = vrot.lane.b32.xlu0 %v929_v9, %s3314_s12 }
 0x432   :  { %886 = vperm.xlu1 %3001, %v883_v11  }
 0x434   :  { %889 = vperm.xlu0 %3000, %v884_v12  }
 0x436   :  { %958 = vperm.xlu1 %3001, %v955_v13  }
 0x438   :  { %961 = vperm.xlu0 %3000, %v956_v14  }
 0x498   :  { %v860_v62 = vpop.permute.xlu1 %859 }
 0x499   :  { %v865_v15 = vadd.f32 %v860_v62, %v845_v56 }
 0x49a   :  { %v862_v17 = vpop.permute.xlu0 %861 }
 0x49b   :  { %3079 = vtanh.f32 %v865_v15  ;;  %v866_v18 = vadd.f32 %v862_v17, %v846_v16 }
 0x49d   :  { %3081 = vtanh.f32 %v866_v18 }
 0x4a0   :  { %v933_v20 = vpop.permute.xlu1 %932 }
 0x4a1   :  { %v938_v21 = vadd.f32 %v933_v20, %v918_v19 }
 0x4a2   :  { %v935_v23 = vpop.permute.xlu0 %934 }
 0x4a3   :  { %3083 = vtanh.f32 %v938_v21  ;;  %v939_v24 = vadd.f32 %v935_v23, %v919_v22 }
 0x4a5   :  { %v3080_v25 = vpop.eup %3079  ;;  %3085 = vtanh.f32 %v939_v24 }
 0x4a6   :  { %871 = vrot.lane.b32.xlu1 %v3080_v25, %s3314_s12 }
 0x4a7   :  { %v3082_v26 = vpop.eup %3081 }
 0x4a8   :  { %873 = vrot.lane.b32.xlu0 %v3082_v26, %s3314_s12 }
 0x4ad   :  { %v3084_v29 = vpop.eup %3083 }
 0x4ae   :  { %944 = vrot.lane.b32.xlu1 %v3084_v29, %s3314_s12 }
 0x4af   :  { %v3086_v30 = vpop.eup %3085 }
 0x4b0   :  { %946 = vrot.lane.b32.xlu0 %v3086_v30, %s3314_s12 }
 0x4b1   :  { %v887_v31 = vpop.permute.xlu1 %886 }
 0x4b2   :  { %vm891_vm8 = vcmp.eq.s32.totalorder %v887_v31, 1 }
 0x4b3   :  { %v3599_v32 = vsel %vm891_vm8, %v865_v15, %v3508_v7  ;;  %v890_v33 = vpop.permute.xlu0 %889  ;;  %vm893_vm13 = vmpackc.low %vm891_vm8, %vm891_vm8  ;;  %vm2685_vm8 = vcmp.gt.s32.totalorder %v3463_v60, 2 }
 0x4b4   :  { %vm892_vm9 = vcmp.eq.s32.totalorder %v890_v33, 1  ;;  %v895_v8 = vsel %vm893_vm13, 65537, %v3313_v6 }
 0x4b5   :  { %v959_v34 = vpop.permute.xlu1 %958  ;;  %v3602_v35 = vsel %vm892_vm9, %v866_v18, %v3512_v39  ;;  %vm894_vm12 = vmpackc.low %vm892_vm9, %vm892_vm9 }
 0x4b6   :  { %vm963_vm10 = vcmp.eq.s32.totalorder %v959_v34, 1  ;;  %v896_v7 = vsel %vm894_vm12, 65537, %v3313_v6 }
 0x4b7   :  { %v3606_v36 = vsel %vm963_vm10, %v938_v21, %v3514_v41  ;;  %v962_v37 = vpop.permute.xlu0 %961  ;;  %v2669_v39 = vcombine.low %v895_v8, %v896_v7  ;;  %vm965_vm15 = vmpackc.low %vm963_vm10, %vm963_vm10 }
 0x4b8   :  { %vm964_vm11 = vcmp.eq.s32.totalorder %v962_v37, 1  ;;  %v967_v50 = vsel %vm965_vm15, 65537, %v3313_v6 }
 0x4b9   :  { %v3609_v40 = vsel %vm964_vm11, %v939_v24, %v3510_v38  ;;  %vm966_vm14 = vmpackc.low %vm964_vm11, %vm964_vm11  ;;  %vm900_vm3 = vcmp.ne.s16.totalorder %v2669_v39, 0 }
 0x4ba   :  { %v968_v38 = vsel %vm966_vm14, 65537, %v3313_v6 }
 0x4bb   :  { %v2674_v52 = vcombine.low %v967_v50, %v968_v38 }
 0x4bd   :  { %vm972_vm4 = vcmp.ne.s16.totalorder %v2674_v52, 0 }
 0x518   :  { %v872_v42 = vpop.permute.xlu1 %871 }
 0x519   :  { %v877_v44 = vmul.f32 %v3554_v49, %v872_v42 }
 0x51a   :  { %v874_v43 = vpop.permute.xlu0 %873 }
 0x51b   :  { %v878_v45 = vmul.f32 %v3557_v53, %v874_v43 }
 0x51d   :  { %v882_v41 = vpack.c.bf16 %v878_v45, %v877_v44 }
 0x51f   :  { %v3619_v46 = vsel %vm900_vm3, %v882_v41, %v3522_v54  ;;  %v2833_v54 = vpop.f32.mrb[8].mxu0 }
 0x520   :  { %v945_v47 = vpop.permute.xlu1 %944  ;;  %981 = vrot.lane.b32.xlu1 %v3619_v46, %s3315_s21  ;;  %v305_v51 = vpop.f32.mrb[9].mxu0  ;;  %v314_v15 = vadd.f32 %v2833_v54, %v3430_v10  ;;  %v1134_v54 = vsel %vm2680_vm6, 1, %v3313_v6  ;;  %vm2691_vm6 = vcmp.gt.s32.totalorder %v3452_v55, 3 }
 0x521   :  { %v950_v53 = vmul.f32 %v3562_v59, %v945_v47  ;;  %v2834_v0 = vpop.f32.mrb[10].mxu0  ;;  %v306_v59 = vadd.f32 %v3430_v10, %v305_v51  ;;  %v1205_v51 = vsel %vm2684_vm7, 1, %v3313_v6  ;;  %vm2692_vm7 = vcmp.gt.s32.totalorder %v3468_v61, 3 }
 0x522   :  { %v947_v49 = vpop.permute.xlu0 %946  ;;  %v308_v9 = vpop.f32.mrb[11].mxu0  ;;  %v317_v17 = vadd.f32 %v2834_v0, %v3430_v10  ;;  %v1206_v0 = vsel %vm2685_vm8, 1, %v3313_v6  ;;  %vm2696_vm8 = vcmp.gt.s32.totalorder %v3481_v4, 3 }
 0x523   :  { %v951_v57 = vmul.f32 %v3566_v63, %v947_v49  ;;  %v309_v12 = vadd.f32 %v3430_v10, %v308_v9  ;;  %v1455_v55 = vsel %vm2696_vm8, 1, %v3313_v6 }
 0x525   :  { %v954_v58 = vpack.c.bf16 %v951_v57, %v950_v53 }
 0x527   :  { %v3627_v48 = vsel %vm972_vm4, %v954_v58, %v3528_v3  ;;  %v1133_v58 = vsel %vm2679_vm5, 1, %v3313_v6 }
 0x528   :  { %1033 = vrot.lane.b32.xlu0 %v3627_v48, %s3315_s21 }
 0x592   :  { %v982_v11 = vpop.permute.xlu1 %981 }
 0x593   :  { %2892 = vmatmul.mubr.msk.bf16.vlgmr.msra.gmra.mrb[16].mxu1 %vm56_vm1, %v982_v11 }
 0x594   :  { %2896 = vmatpush3.bf16.msra.mxu1 %v3367_v2  ;;  %2899 = vmatprep.mubr.msk.bf16.mxu1 %vm3312_vm2, %v3311_v1 }
 0x595   :  { %2897 = vmatprep.subr.bf16.mxu1 %v3311_v1 }
 0x598   :  { %2898 = vmatpush3.bf16.msra.mxu1 %v3381_v5 }
 0x599   :  { %2903 = vmatprep.subr.bf16.mxu1 %v3311_v1 }
 0x59a   :  { %v1034_v3 = vpop.permute.xlu0 %1033 }
 0x59b   :  { %2900 = vmatmul.mubr.msk.bf16.vlgmr.msra.gmra.mrb[20].mxu1 %vm56_vm1, %v1034_v3 }
 0x59c   :  { %2904 = vmatpush3.bf16.msra.mxu1 %v3367_v2  ;;  %2907 = vmatprep.mubr.msk.bf16.mxu1 %vm3312_vm2, %v3311_v1 }
 0x59d   :  { %2905 = vmatprep.subr.bf16.mxu1 %v3311_v1 }
 0x5a0   :  { %2906 = vmatpush3.bf16.msra.mxu1 %v3381_v5 }
 0x5a1   :  { %2911 = vmatprep.subr.bf16.mxu1 %v3311_v1 }
 0x666   :  { %v1020_v63 = vpop.f32.mrb[16].mxu1 }
 0x667   :  { %v1027_v13 = vadd.f32 %v1020_v63, %v306_v59  ;;  %v2893_v14 = vpop.f32.mrb[17].mxu1 }
 0x668   :  { %v1023_v56 = vpop.f32.mrb[18].mxu1 }
 0x669   :  { %3087 = vtanh.f32 %v1027_v13  ;;  %v1028_v62 = vadd.f32 %v1023_v56, %v309_v12  ;;  %v2894_v2 = vpop.f32.mrb[19].mxu1  ;;  %v2677_v26 = vmul.f32 -1.442695, %v1027_v13 }
 0x66b   :  { %3089 = vtanh.f32 %v1028_v62  ;;  %v2678_v27 = vmul.f32 -1.442695, %v1028_v62 }
 0x66e   :  { %v1072_v16 = vpop.f32.mrb[20].mxu1 }
 0x66f   :  { %v1079_v5 = vadd.f32 %v1072_v16, %v314_v15  ;;  %v2901_v18 = vpop.f32.mrb[21].mxu1 }
 0x670   :  { %v1075_v19 = vpop.f32.mrb[22].mxu1  ;;  %v3012_v18 = vld [vmem:[%s4312_s0 + $0x38] sm:$0xff]  }
 0x671   :  { %3091 = vtanh.f32 %v1079_v5  ;;  %v1080_v20 = vadd.f32 %v1075_v19, %v317_v17  ;;  %v2902_v21 = vpop.f32.mrb[23].mxu1  ;;  %v2682_v28 = vmul.f32 -1.442695, %v1079_v5  ;;  %v3011_v5 = vld [vmem:[%s4312_s0 + $0x30] sm:$0xff]  }
 0x672   :  { %2835 = vmatprep.mubr.msk.bf16.mxu0 %vm190_vm0, %v3011_v5 }
 0x673   :  { %v3088_v22 = vpop.eup %3087  ;;  %3093 = vtanh.f32 %v1080_v20  ;;  %v2683_v29 = vmul.f32 -1.442695, %v1080_v20  ;;  %2836 = vmatmul.mubr.msk.bf16.gmra.mrb[12].mxu0 %vm190_vm0, %v3012_v18 }
 0x674   :  { %1099 = vrot.lane.b32.xlu1 %v3088_v22, %s3314_s12  ;;  %3095 = vpow2.f32 %v2677_v26 }
 0x675   :  { %v3090_v23 = vpop.eup %3089  ;;  %3097 = vpow2.f32 %v2678_v27 }
 0x676   :  { %1101 = vrot.lane.b32.xlu0 %v3090_v23, %s3314_s12  ;;  %3099 = vpow2.f32 %v2682_v28 }
 0x677   :  { %3101 = vpow2.f32 %v2683_v29 }
 0x67b   :  { %v3092_v24 = vpop.eup %3091 }
 0x67c   :  { %1172 = vrot.lane.b32.xlu1 %v3092_v24, %s3314_s12 }
 0x67d   :  { %v3094_v25 = vpop.eup %3093 }
 0x67e   :  { %1174 = vrot.lane.b32.xlu0 %v3094_v25, %s3314_s12  ;;  %v3096_v30 = vpop.eup %3095 }
 0x67f   :  { %v3098_v31 = vpop.eup %3097  ;;  %v1087_v33 = vadd.f32 1.0, %v3096_v30 }
 0x680   :  { %v1088_v34 = vadd.f32 1.0, %v3098_v31  ;;  %v3100_v37 = vpop.eup %3099 }
 0x681   :  { %3103 = vrcp.f32 %v1087_v33  ;;  %v3102_v7 = vpop.eup %3101  ;;  %v1160_v42 = vadd.f32 1.0, %v3100_v37 }
 0x682   :  { %3105 = vrcp.f32 %v1088_v34  ;;  %v1161_v8 = vadd.f32 1.0, %v3102_v7 }
 0x683   :  { %3107 = vrcp.f32 %v1160_v42 }
 0x684   :  { %3109 = vrcp.f32 %v1161_v8 }
 0x68b   :  { %v3653_v43 = vpop.eup %3103 }
 0x68c   :  { %v3656_v45 = vpop.eup %3105  ;;  %v1095_v9 = vmul.f32 %v3653_v43, %v3599_v32 }
 0x68d   :  { %v3661_v47 = vpop.eup %3107  ;;  %v1096_v59 = vmul.f32 %v3656_v45, %v3602_v35 }
 0x68e   :  { %v3665_v52 = vpop.eup %3109  ;;  %v1168_v13 = vmul.f32 %v3661_v47, %v3606_v36 }
 0x68f   :  { %v1169_v62 = vmul.f32 %v3665_v52, %v3609_v40 }
 0x6e6   :  { %v1100_v39 = vpop.permute.xlu1 %1099 }
 0x6e7   :  { %v1105_v44 = vmul.f32 %v3653_v43, %v1100_v39 }
 0x6e8   :  { %v1102_v41 = vpop.permute.xlu0 %1101 }
 0x6e9   :  { %1109 = vrot.lane.b32.xlu1 %v1105_v44, %s3314_s12  ;;  %v1106_v38 = vmul.f32 %v3656_v45, %v1102_v41 }
 0x6eb   :  { %1111 = vrot.lane.b32.xlu0 %v1106_v38, %s3314_s12 }
 0x6ee   :  { %v1173_v50 = vpop.permute.xlu1 %1172 }
 0x6ef   :  { %v1178_v49 = vmul.f32 %v3661_v47, %v1173_v50 }
 0x6f0   :  { %v1175_v53 = vpop.permute.xlu0 %1174 }
 0x6f1   :  { %1182 = vrot.lane.b32.xlu1 %v1178_v49, %s3314_s12  ;;  %v1179_v57 = vmul.f32 %v3665_v52, %v1175_v53 }
 0x6f3   :  { %1184 = vrot.lane.b32.xlu0 %v1179_v57, %s3314_s12 }
 0x6f5   :  { %1136 = vperm.xlu1 %3001, %v1133_v58  }
 0x6f7   :  { %1139 = vperm.xlu0 %3000, %v1134_v54  }
 0x6f9   :  { %1208 = vperm.xlu1 %3001, %v1205_v51  }
 0x6fb   :  { %1211 = vperm.xlu0 %3000, %v1206_v0  }
 0x75b   :  { %v1110_v11 = vpop.permute.xlu1 %1109 }
 0x75c   :  { %v1115_v3 = vadd.f32 %v1110_v11, %v1095_v9 }
 0x75d   :  { %v1112_v63 = vpop.permute.xlu0 %1111 }
 0x75e   :  { %3111 = vtanh.f32 %v1115_v3  ;;  %v1116_v12 = vadd.f32 %v1112_v63, %v1096_v59  ;;  %v3759_v59 = vld [vmem:[%s4316_s4] ss:$0 sm:$0xff] }
 0x760   :  { %3113 = vtanh.f32 %v1116_v12 }
 0x763   :  { %v1183_v14 = vpop.permute.xlu1 %1182 }
 0x764   :  { %v1188_v56 = vadd.f32 %v1183_v14, %v1168_v13 }
 0x765   :  { %v1185_v2 = vpop.permute.xlu0 %1184 }
 0x766   :  { %3115 = vtanh.f32 %v1188_v56  ;;  %v1189_v15 = vadd.f32 %v1185_v2, %v1169_v62 }
 0x768   :  { %v3112_v16 = vpop.eup %3111  ;;  %3117 = vtanh.f32 %v1189_v15 }
 0x769   :  { %1121 = vrot.lane.b32.xlu1 %v3112_v16, %s3314_s12 }
 0x76a   :  { %v3114_v17 = vpop.eup %3113 }
 0x76b   :  { %1123 = vrot.lane.b32.xlu0 %v3114_v17, %s3314_s12 }
 0x770   :  { %v3116_v19 = vpop.eup %3115 }
 0x771   :  { %1194 = vrot.lane.b32.xlu1 %v3116_v19, %s3314_s12 }
 0x772   :  { %v3118_v20 = vpop.eup %3117 }
 0x773   :  { %1196 = vrot.lane.b32.xlu0 %v3118_v20, %s3314_s12 }
 0x774   :  { %v1137_v21 = vpop.permute.xlu1 %1136 }
 0x775   :  { %vm1141_vm9 = vcmp.eq.s32.totalorder %v1137_v21, 1 }
 0x776   :  { %v3698_v22 = vsel %vm1141_vm9, %v1115_v3, %v3599_v32  ;;  %v1140_v23 = vpop.permute.xlu0 %1139  ;;  %vm1143_vm14 = vmpackc.low %vm1141_vm9, %vm1141_vm9  ;;  %vm2697_vm9 = vcmp.gt.s32.totalorder %v3463_v60, 3 }
 0x777   :  { %vm1142_vm10 = vcmp.eq.s32.totalorder %v1140_v23, 1  ;;  %v1145_v30 = vsel %vm1143_vm14, 65537, %v3313_v6 }
 0x778   :  { %v1209_v24 = vpop.permute.xlu1 %1208  ;;  %v3701_v25 = vsel %vm1142_vm10, %v1116_v12, %v3602_v35  ;;  %vm1144_vm13 = vmpackc.low %vm1142_vm10, %vm1142_vm10 }
 0x779   :  { %vm1213_vm11 = vcmp.eq.s32.totalorder %v1209_v24, 1  ;;  %v1146_v32 = vsel %vm1144_vm13, 65537, %v3313_v6 }
 0x77a   :  { %v3705_v26 = vsel %vm1213_vm11, %v1188_v56, %v3606_v36  ;;  %v1212_v27 = vpop.permute.xlu0 %1211  ;;  %v2681_v33 = vcombine.low %v1145_v30, %v1146_v32  ;;  %vm1215_vm3 = vmpackc.low %vm1213_vm11, %vm1213_vm11 }
 0x77b   :  { %vm1214_vm12 = vcmp.eq.s32.totalorder %v1212_v27, 1  ;;  %v1217_v42 = vsel %vm1215_vm3, 65537, %v3313_v6 }
 0x77c   :  { %v3708_v28 = vsel %vm1214_vm12, %v1189_v15, %v3609_v40  ;;  %vm1216_vm15 = vmpackc.low %vm1214_vm12, %vm1214_vm12  ;;  %vm1150_vm4 = vcmp.ne.s16.totalorder %v2681_v33, 0 }
 0x77d   :  { %v1218_v40 = vsel %vm1216_vm15, 65537, %v3313_v6 }
 0x7db   :  { %v1122_v29 = vpop.permute.xlu1 %1121 }
 0x7dc   :  { %v1127_v35 = vmul.f32 %v3653_v43, %v1122_v29  ;;  %v2686_v43 = vcombine.low %v1217_v42, %v1218_v40 }
 0x7dd   :  { %v1124_v31 = vpop.permute.xlu0 %1123 }
 0x7de   :  { %v1128_v34 = vmul.f32 %v3656_v45, %v1124_v31  ;;  %vm1222_vm5 = vcmp.ne.s16.totalorder %v2686_v43, 0 }
 0x7e0   :  { %v1132_v36 = vpack.c.bf16 %v1128_v34, %v1127_v35 }
 0x7e2   :  { %v3718_v37 = vsel %vm1150_vm4, %v1132_v36, %v3619_v46  ;;  %v2837_v46 = vpop.f32.mrb[12].mxu0 }
 0x7e3   :  { %v1195_v7 = vpop.permute.xlu1 %1194  ;;  %1231 = vrot.lane.b32.xlu1 %v3718_v37, %s3315_s21  ;;  %v321_v38 = vpop.f32.mrb[13].mxu0  ;;  %v330_v63 = vadd.f32 %v3759_v59, %v2837_v46 }
 0x7e4   :  { %v1200_v39 = vmul.f32 %v3661_v47, %v1195_v7  ;;  %v2838_v50 = vpop.f32.mrb[14].mxu0  ;;  %v3734_v47 = vld [vmem:[%s4315_s3] sm:$0xff]   ;;  %v322_v57 = vadd.f32 %v3430_v10, %v321_v38  ;;  %v1383_v38 = vsel %vm2691_vm6, 1, %v3313_v6 }
 0x7e5   :  { %v1197_v8 = vpop.permute.xlu0 %1196  ;;  %v324_v49 = vpop.f32.mrb[15].mxu0  ;;  %v333_v13 = vadd.f32 %v3759_v59, %v2838_v50  ;;  %v1384_v50 = vsel %vm2692_vm7, 1, %v3313_v6 }
 0x7e6   :  { %v1201_v44 = vmul.f32 %v3665_v52, %v1197_v8  ;;  %v325_v58 = vadd.f32 %v3430_v10, %v324_v49  ;;  %v1456_v49 = vsel %vm2697_vm9, 1, %v3313_v6 }
 0x7e8   :  { %v1204_v45 = vpack.c.bf16 %v1201_v44, %v1200_v39 }
 0x7ea   :  { %v3726_v41 = vsel %vm1222_vm5, %v1204_v45, %v3627_v48  ;;  %v3743_v48 = vld [vmem:[%s4315_s3 + $0x8] sm:$0xff]  }
 0x7eb   :  { %1283 = vrot.lane.b32.xlu0 %v3726_v41, %s3315_s21 }
 0x855   :  { %v1232_v53 = vpop.permute.xlu1 %1231 }
 0x856   :  { %2908 = vmatmul.mubr.msk.bf16.vlgmr.msra.gmra.mrb[24].mxu1 %vm56_vm1, %v1232_v53 }
 0x857   :  { %2912 = vmatpush3.bf16.msra.mxu1 %v3734_v47  ;;  %2915 = vmatprep.mubr.msk.bf16.mxu1 %vm3312_vm2, %v3311_v1 }
 0x858   :  { %2913 = vmatprep.subr.bf16.mxu1 %v3311_v1 }
 0x85b   :  { %2914 = vmatpush3.bf16.msra.mxu1 %v3743_v48 }
 0x85c   :  { %2927 = vmatprep.subr.bf16.mxu1 %v3311_v1 }
 0x85d   :  { %v1284_v52 = vpop.permute.xlu0 %1283 }
 0x85e   :  { %2916 = vmatmul.mubr.msk.bf16.vlgmr.msra.gmra.mrb[28].mxu1 %vm56_vm1, %v1284_v52 }
 0x85f   :  { %2928 = vmatpush3.bf16.msra.mxu1 %v3734_v47  ;;  %2931 = vmatprep.mubr.msk.bf16.mxu1 %vm3312_vm2, %v3311_v1 }
 0x860   :  { %2929 = vmatprep.subr.bf16.mxu1 %v3311_v1 }
 0x863   :  { %2930 = vmatpush3.bf16.msra.mxu1 %v3743_v48 }
 0x864   :  { %2943 = vmatprep.subr.bf16.mxu1 %v3311_v1 }
 0x929   :  { %v1270_v54 = vpop.f32.mrb[24].mxu1 }
 0x92a   :  { %v1277_v51 = vadd.f32 %v1270_v54, %v322_v57  ;;  %v2909_v0 = vpop.f32.mrb[25].mxu1 }
 0x92b   :  { %v1273_v9 = vpop.f32.mrb[26].mxu1 }
 0x92c   :  { %3119 = vtanh.f32 %v1277_v51  ;;  %v1278_v11 = vadd.f32 %v1273_v9, %v325_v58  ;;  %v2910_v3 = vpop.f32.mrb[27].mxu1  ;;  %v2689_v18 = vmul.f32 -1.442695, %v1277_v51 }
 0x92e   :  { %3121 = vtanh.f32 %v1278_v11  ;;  %v2690_v19 = vmul.f32 -1.442695, %v1278_v11 }
 0x931   :  { %v1322_v12 = vpop.f32.mrb[28].mxu1 }
 0x932   :  { %v1329_v14 = vadd.f32 %v1322_v12, %v330_v63  ;;  %v2917_v10 = vpop.f32.mrb[29].mxu1  ;;  %v3013_v12 = vld [vmem:[%s4312_s0 + $0x40] sm:$0xff]  }
 0x933   :  { %v1325_v56 = vpop.f32.mrb[30].mxu1  ;;  %2839 = vmatprep.mubr.msk.bf16.mxu0 %vm190_vm0, %v3013_v12 }
 0x934   :  { %3123 = vtanh.f32 %v1329_v14  ;;  %v1330_v62 = vadd.f32 %v1325_v56, %v333_v13  ;;  %v2918_v2 = vpop.f32.mrb[31].mxu1  ;;  %v2694_v20 = vmul.f32 -1.442695, %v1329_v14  ;;  %v3014_v13 = vld [vmem:[%s4312_s0 + $0x48] sm:$0xff]   ;;  %v3015_v14 = vld [vmem:[%s4312_s0 + $0x50] sm:$0xff]  }
 0x935   :  { %2840 = vmatmul.mubr.msk.bf16.gmra.mrb[16].mxu0 %vm190_vm0, %v3014_v13 }
 0x936   :  { %v3120_v15 = vpop.eup %3119  ;;  %3125 = vtanh.f32 %v1330_v62  ;;  %v2695_v21 = vmul.f32 -1.442695, %v1330_v62  ;;  %2843 = vmatprep.mubr.msk.bf16.mxu0 %vm190_vm0, %v3015_v14  ;;  %v3016_v62 = vld [vmem:[%s4312_s0 + $0x58] sm:$0xff]  }
 0x937   :  { %1349 = vrot.lane.b32.xlu1 %v3120_v15, %s3314_s12  ;;  %3127 = vpow2.f32 %v2689_v18  ;;  %v3017_v15 = vld [vmem:[%s4312_s0 + $0x60] sm:$0xff]  }
 0x938   :  { %v3122_v16 = vpop.eup %3121  ;;  %3129 = vpow2.f32 %v2690_v19 }
 0x939   :  { %1351 = vrot.lane.b32.xlu0 %v3122_v16, %s3314_s12  ;;  %3131 = vpow2.f32 %v2694_v20 }
 0x93a   :  { %3133 = vpow2.f32 %v2695_v21  ;;  %v3019_v21 = vld [vmem:[%s4312_s0 + $0x70] sm:$0xff]  }
 0x93d   :  { %2844 = vmatmul.mubr.msk.bf16.gmra.mrb[20].mxu0 %vm190_vm0, %v3016_v62 }
 0x93e   :  { %v3124_v17 = vpop.eup %3123  ;;  %2847 = vmatprep.mubr.msk.bf16.mxu0 %vm190_vm0, %v3017_v15 }
 0x93f   :  { %1422 = vrot.lane.b32.xlu1 %v3124_v17, %s3314_s12 }
 0x940   :  { %v3126_v5 = vpop.eup %3125 }
 0x941   :  { %1424 = vrot.lane.b32.xlu0 %v3126_v5, %s3314_s12  ;;  %v3128_v23 = vpop.eup %3127 }
 0x942   :  { %v3130_v24 = vpop.eup %3129  ;;  %v1337_v27 = vadd.f32 1.0, %v3128_v23 }
 0x943   :  { %v1338_v32 = vadd.f32 1.0, %v3130_v24  ;;  %v3132_v29 = vpop.eup %3131 }
 0x944   :  { %3135 = vrcp.f32 %v1337_v27  ;;  %v3134_v30 = vpop.eup %3133  ;;  %v1410_v31 = vadd.f32 1.0, %v3132_v29 }
 0x945   :  { %3137 = vrcp.f32 %v1338_v32  ;;  %v1411_v33 = vadd.f32 1.0, %v3134_v30 }
 0x946   :  { %3139 = vrcp.f32 %v1410_v31 }
 0x947   :  { %3141 = vrcp.f32 %v1411_v33 }
 0x94e   :  { %v3767_v35 = vpop.eup %3135 }
 0x94f   :  { %v3770_v40 = vpop.eup %3137  ;;  %v1345_v53 = vmul.f32 %v3767_v35, %v3698_v22 }
 0x950   :  { %v3775_v8 = vpop.eup %3139  ;;  %v1346_v4 = vmul.f32 %v3770_v40, %v3701_v25 }
 0x951   :  { %v3779_v44 = vpop.eup %3141  ;;  %v1418_v60 = vmul.f32 %v3775_v8, %v3705_v26 }
 0x952   :  { %v1419_v0 = vmul.f32 %v3779_v44, %v3708_v28 }
 0x9a9   :  { %v1350_v34 = vpop.permute.xlu1 %1349 }
 0x9aa   :  { %v1355_v36 = vmul.f32 %v3767_v35, %v1350_v34 }
 0x9ab   :  { %v1352_v7 = vpop.permute.xlu0 %1351 }
 0x9ac   :  { %1359 = vrot.lane.b32.xlu1 %v1355_v36, %s3314_s12  ;;  %v1356_v42 = vmul.f32 %v3770_v40, %v1352_v7 }
 0x9ae   :  { %1361 = vrot.lane.b32.xlu0 %v1356_v42, %s3314_s12 }
 0x9b1   :  { %v1423_v43 = vpop.permute.xlu1 %1422 }
 0x9b2   :  { %v1428_v39 = vmul.f32 %v3775_v8, %v1423_v43 }
 0x9b3   :  { %v1425_v45 = vpop.permute.xlu0 %1424 }
 0x9b4   :  { %1432 = vrot.lane.b32.xlu1 %v1428_v39, %s3314_s12  ;;  %v1429_v46 = vmul.f32 %v3779_v44, %v1425_v45 }
 0x9b6   :  { %1434 = vrot.lane.b32.xlu0 %v1429_v46, %s3314_s12 }
 0x9b8   :  { %1386 = vperm.xlu1 %3001, %v1383_v38  }
 0x9ba   :  { %1389 = vperm.xlu0 %3000, %v1384_v50  }
 0x9bc   :  { %1458 = vperm.xlu1 %3001, %v1455_v55  }
 0x9be   :  { %1461 = vperm.xlu0 %3000, %v1456_v49  }
 0xa1e   :  { %v1360_v61 = vpop.permute.xlu1 %1359 }
 0xa1f   :  { %v1365_v52 = vadd.f32 %v1360_v61, %v1345_v53 }
 0xa20   :  { %v1362_v57 = vpop.permute.xlu0 %1361 }
 0xa21   :  { %3143 = vtanh.f32 %v1365_v52  ;;  %v1366_v58 = vadd.f32 %v1362_v57, %v1346_v4 }
 0xa23   :  { %3145 = vtanh.f32 %v1366_v58 }
 0xa26   :  { %v1433_v54 = vpop.permute.xlu1 %1432 }
 0xa27   :  { %v1438_v51 = vadd.f32 %v1433_v54, %v1418_v60 }
 0xa28   :  { %v1435_v9 = vpop.permute.xlu0 %1434 }
 0xa29   :  { %3147 = vtanh.f32 %v1438_v51  ;;  %v1439_v11 = vadd.f32 %v1435_v9, %v1419_v0 }
 0xa2b   :  { %v3144_v3 = vpop.eup %3143  ;;  %3149 = vtanh.f32 %v1439_v11 }
 0xa2c   :  { %1371 = vrot.lane.b32.xlu1 %v3144_v3, %s3314_s12 }
 0xa2d   :  { %v3146_v63 = vpop.eup %3145 }
 0xa2e   :  { %1373 = vrot.lane.b32.xlu0 %v3146_v63, %s3314_s12 }
 0xa33   :  { %v3148_v10 = vpop.eup %3147 }
 0xa34   :  { %1444 = vrot.lane.b32.xlu1 %v3148_v10, %s3314_s12 }
 0xa35   :  { %v3150_v56 = vpop.eup %3149 }
 0xa36   :  { %1446 = vrot.lane.b32.xlu0 %v3150_v56, %s3314_s12 }
 0xa37   :  { %v1387_v2 = vpop.permute.xlu1 %1386 }
 0xa38   :  { %vm1391_vm10 = vcmp.eq.s32.totalorder %v1387_v2, 1 }
 0xa39   :  { %v3823_v16 = vsel %vm1391_vm10, %v1365_v52, %v3698_v22  ;;  %v1390_v17 = vpop.permute.xlu0 %1389  ;;  %v3018_v22 = vld [vmem:[%s4312_s0 + $0x68] sm:$0xff]   ;;  %vm1393_vm15 = vmpackc.low %vm1391_vm10, %vm1391_vm10 }
 0xa3a   :  { %vm1392_vm11 = vcmp.eq.s32.totalorder %v1390_v17, 1  ;;  %2848 = vmatmul.mubr.msk.bf16.gmra.mrb[24].mxu0 %vm190_vm0, %v3018_v22  ;;  %v1395_v24 = vsel %vm1393_vm15, 65537, %v3313_v6 }
 0xa3b   :  { %v1459_v5 = vpop.permute.xlu1 %1458  ;;  %v3829_v18 = vsel %vm1392_vm11, %v1366_v58, %v3701_v25  ;;  %2851 = vmatprep.mubr.msk.bf16.mxu0 %vm190_vm0, %v3019_v21  ;;  %v3020_v25 = vld [vmem:[%s4312_s0 + $0x78] sm:$0xff]   ;;  %vm1394_vm14 = vmpackc.low %vm1392_vm11, %vm1392_vm11 }
 0xa3c   :  { %vm1463_vm12 = vcmp.eq.s32.totalorder %v1459_v5, 1 }
 0xa3d   :  { %v3833_v19 = vsel %vm1463_vm12, %v1438_v51, %v3705_v26  ;;  %v1462_v20 = vpop.permute.xlu0 %1461  ;;  %v1396_v26 = vsel %vm1394_vm14, 65537, %v3313_v6  ;;  %vm1465_vm3 = vmpackc.low %vm1463_vm12, %vm1463_vm12 }
 0xa3e   :  { %vm1464_vm13 = vcmp.eq.s32.totalorder %v1462_v20, 1  ;;  %v2693_v27 = vcombine.low %v1395_v24, %v1396_v26 }
 0xa3f   :  { %v3843_v23 = vsel %vm1464_vm13, %v1439_v11, %v3708_v28 }
 0xa40   :  { %vm1400_vm4 = vcmp.ne.s16.totalorder %v2693_v27, 0 }
 0xa42   :  { %2852 = vmatmul.mubr.msk.bf16.gmra.mrb[28].mxu0 %vm190_vm0, %v3020_v25  ;;  %vm1466_vm0 = vmpackc.low %vm1464_vm13, %vm1464_vm13 }
 0xa43   :  { %2923 = vmatprep.mubr.msk.bf16.mxu0 %vm3312_vm2, %v3311_v1  ;;  %v1468_v33 = vsel %vm1466_vm0, 65537, %v3313_v6 }
 0xa9e   :  { %v1372_v28 = vpop.permute.xlu1 %1371 }
 0xa9f   :  { %v1377_v29 = vmul.f32 %v3767_v35, %v1372_v28  ;;  %v1467_v35 = vsel %vm1465_vm3, 65537, %v3313_v6 }
 0xaa0   :  { %v1374_v32 = vpop.permute.xlu0 %1373 }
 0xaa1   :  { %v1378_v30 = vmul.f32 %v3770_v40, %v1374_v32  ;;  %v2698_v40 = vcombine.low %v1467_v35, %v1468_v33 }
 0xaa3   :  { %v1382_v31 = vpack.c.bf16 %v1378_v30, %v1377_v29  ;;  %vm1472_vm5 = vcmp.ne.s16.totalorder %v2698_v40, 0 }
 0xaa5   :  { %v3867_v34 = vsel %vm1400_vm4, %v1382_v31, %v3718_v37  ;;  %v2841_v37 = vpop.f32.mrb[16].mxu0 }
 0xaa6   :  { %v1445_v36 = vpop.permute.xlu1 %1444  ;;  %1481 = vrot.lane.b32.xlu1 %v3867_v34, %s3315_s21  ;;  %v337_v46 = vpop.f32.mrb[17].mxu0  ;;  %v346_v10 = vadd.f32 %v3759_v59, %v2841_v37 }
 0xaa7   :  { %v1450_v42 = vmul.f32 %v3775_v8, %v1445_v36  ;;  %v2842_v38 = vpop.f32.mrb[18].mxu0  ;;  %v338_v0 = vadd.f32 %v3759_v59, %v337_v46 }
 0xaa8   :  { %v1447_v7 = vpop.permute.xlu0 %1446  ;;  %v340_v50 = vpop.f32.mrb[19].mxu0  ;;  %v349_v62 = vadd.f32 %v3759_v59, %v2842_v38 }
 0xaa9   :  { %v1451_v43 = vmul.f32 %v3779_v44, %v1447_v7  ;;  %v3879_v55 = vpop.f32.mrb[20].mxu0  ;;  %v341_v11 = vadd.f32 %v3759_v59, %v340_v50 }
 0xaaa   :  { %v3881_v49 = vpop.f32.mrb[21].mxu0 }
 0xaab   :  { %v1454_v39 = vpack.c.bf16 %v1451_v43, %v1450_v42  ;;  %v3883_v53 = vpop.f32.mrb[22].mxu0 }
 0xaac   :  { %v3885_v8 = vpop.f32.mrb[23].mxu0 }
 0xaad   :  { %v3875_v45 = vsel %vm1472_vm5, %v1454_v39, %v3726_v41 }
 0xaae   :  { %1533 = vrot.lane.b32.xlu0 %v3875_v45, %s3315_s21 }
 0xb0d   :  { %v3887_v44 = vpop.f32.mrb[24].mxu0 }
 0xb0e   :  { %v3889_v61 = vpop.f32.mrb[25].mxu0 }
 0xb0f   :  { %v3891_v41 = vpop.f32.mrb[26].mxu0 }
 0xb10   :  { %v3893_v52 = vpop.f32.mrb[27].mxu0 }
 0xb15   :  { %v3900_v57 = vpop.f32.mrb[28].mxu0 }
 0xb16   :  { %v3902_v58 = vpop.f32.mrb[29].mxu0 }
 0xb17   :  { %v3904_v60 = vpop.f32.mrb[30].mxu0 }
 0xb18   :  { %v1482_v4 = vpop.permute.xlu1 %1481  ;;  %v3907_v54 = vpop.f32.mrb[31].mxu0 }
 0xb19   :  { %2924 = vmatmul.mubr.msk.bf16.vlgmr.msra.gmra.mrb[32].mxu0 %vm56_vm1, %v1482_v4 }
 0xb1a   :  { %2936 = vmatpush3.bf16.msra.mxu0 %v3734_v47  ;;  %2939 = vmatprep.mubr.msk.bf16.mxu0 %vm3312_vm2, %v3311_v1 }
 0xb1b   :  { %2937 = vmatprep.subr.bf16.mxu0 %v3311_v1 }
 0xb1e   :  { %2938 = vmatpush3.bf16.msra.mxu0 %v3743_v48 }
 0xb1f   :  { %2951 = vmatprep.subr.bf16.mxu0 %v3311_v1 }
 0xb20   :  { %v1534_v51 = vpop.permute.xlu0 %1533 }
 0xb21   :  { %2932 = vmatmul.mubr.msk.bf16.vlgmr.msra.gmra.mrb[32].mxu1 %vm56_vm1, %v1534_v51 }
 0xb22   :  { %2944 = vmatpush3.bf16.msra.mxu1 %v3734_v47  ;;  %2947 = vmatprep.mubr.msk.bf16.mxu1 %vm3312_vm2, %v3311_v1 }
 0xb23   :  { %2945 = vmatprep.subr.bf16.mxu1 %v3311_v1 }
 0xb26   :  { %2946 = vmatpush3.bf16.msra.mxu1 %v3743_v48 }
 0xb27   :  { %2959 = vmatprep.subr.bf16.mxu1 %v3311_v1 }
 0xbec   :  { %v1520_v9 = vpop.f32.mrb[32].mxu0 }
 0xbed   :  { %v1527_v3 = vadd.f32 %v1520_v9, %v338_v0  ;;  %v2925_v63 = vpop.f32.mrb[33].mxu0  ;;  %v3939_v0 = vld [vmem:[%s4313_s1] sm:$0xff] }
 0xbee   :  { %v1523_v12 = vpop.f32.mrb[34].mxu0  ;;  %vm2703_vm6 = vcmp.gt.s32.totalorder %v3939_v0, 4 }
 0xbef   :  { %3151 = vtanh.f32 %v1527_v3  ;;  %v1528_v13 = vadd.f32 %v1523_v12, %v341_v11  ;;  %v2926_v14 = vpop.f32.mrb[35].mxu0  ;;  %v2701_v28 = vmul.f32 -1.442695, %v1527_v3  ;;  %v1633_v63 = vsel %vm2703_vm6, 1, %v3313_v6  ;;  %v3950_v12 = vld [vmem:[%s4313_s1 + $0x8] sm:$0xff] }
 0xbf0   :  { %vm2704_vm7 = vcmp.gt.s32.totalorder %v3950_v12, 4  ;;  %vm2715_vm6 = vcmp.gt.s32.totalorder %v3939_v0, 5 }
 0xbf1   :  { %3153 = vtanh.f32 %v1528_v13  ;;  %v2702_v24 = vmul.f32 -1.442695, %v1528_v13  ;;  %v3956_v13 = vld [vmem:[%s4313_s1 + $0x10] sm:$0xff]  ;;  %v1634_v14 = vsel %vm2704_vm7, 1, %v3313_v6  ;;  %vm2716_vm7 = vcmp.gt.s32.totalorder %v3950_v12, 5 }
 0xbf2   :  { %vm2708_vm8 = vcmp.gt.s32.totalorder %v3956_v13, 4 }
 0xbf4   :  { %v1572_v56 = vpop.f32.mrb[32].mxu1 }
 0xbf5   :  { %v1579_v2 = vadd.f32 %v1572_v56, %v346_v10  ;;  %v2933_v15 = vpop.f32.mrb[33].mxu1  ;;  %v1705_v10 = vsel %vm2708_vm8, 1, %v3313_v6  ;;  %v3965_v56 = vld [vmem:[%s4313_s1 + $0x18] sm:$0xff]  ;;  %vm2720_vm8 = vcmp.gt.s32.totalorder %v3956_v13, 5 }
 0xbf6   :  { %v1575_v17 = vpop.f32.mrb[34].mxu1  ;;  %vm2709_vm9 = vcmp.gt.s32.totalorder %v3965_v56, 4 }
 0xbf7   :  { %3155 = vtanh.f32 %v1579_v2  ;;  %v1580_v5 = vadd.f32 %v1575_v17, %v349_v62  ;;  %v2934_v20 = vpop.f32.mrb[35].mxu1  ;;  %v2706_v27 = vmul.f32 -1.442695, %v1579_v2  ;;  %v1706_v62 = vsel %vm2709_vm9, 1, %v3313_v6 }
 0xbf8   :  { %vm2721_vm9 = vcmp.gt.s32.totalorder %v3965_v56, 5 }
 0xbf9   :  { %v3152_v22 = vpop.eup %3151  ;;  %3157 = vtanh.f32 %v1580_v5  ;;  %v2707_v32 = vmul.f32 -1.442695, %v1580_v5 }
 0xbfa   :  { %1599 = vrot.lane.b32.xlu1 %v3152_v22, %s3314_s12  ;;  %3159 = vpow2.f32 %v2701_v28 }
 0xbfb   :  { %v3154_v21 = vpop.eup %3153  ;;  %3161 = vpow2.f32 %v2702_v24 }
 0xbfc   :  { %1601 = vrot.lane.b32.xlu0 %v3154_v21, %s3314_s12  ;;  %3163 = vpow2.f32 %v2706_v27 }
 0xbfd   :  { %3165 = vpow2.f32 %v2707_v32 }
 0xc01   :  { %v3156_v25 = vpop.eup %3155 }
 0xc02   :  { %1672 = vrot.lane.b32.xlu1 %v3156_v25, %s3314_s12 }
 0xc03   :  { %v3158_v26 = vpop.eup %3157 }
 0xc04   :  { %1674 = vrot.lane.b32.xlu0 %v3158_v26, %s3314_s12  ;;  %v3160_v29 = vpop.eup %3159 }
 0xc05   :  { %v3162_v30 = vpop.eup %3161  ;;  %v1587_v31 = vadd.f32 1.0, %v3160_v29 }
 0xc06   :  { %v1588_v33 = vadd.f32 1.0, %v3162_v30  ;;  %v3164_v36 = vpop.eup %3163 }
 0xc07   :  { %3167 = vrcp.f32 %v1587_v31  ;;  %v3166_v35 = vpop.eup %3165  ;;  %v1660_v40 = vadd.f32 1.0, %v3164_v36 }
 0xc08   :  { %3169 = vrcp.f32 %v1588_v33  ;;  %v1661_v7 = vadd.f32 1.0, %v3166_v35 }
 0xc09   :  { %3171 = vrcp.f32 %v1660_v40 }
 0xc0a   :  { %3173 = vrcp.f32 %v1661_v7 }
 0xc11   :  { %v3925_v42 = vpop.eup %3167 }
 0xc12   :  { %v3928_v37 = vpop.eup %3169  ;;  %v1595_v2 = vmul.f32 %v3925_v42, %v3823_v16 }
 0xc13   :  { %v3933_v50 = vpop.eup %3171  ;;  %v1596_v5 = vmul.f32 %v3928_v37, %v3829_v18 }
 0xc14   :  { %v3942_v9 = vpop.eup %3173  ;;  %v1668_v21 = vmul.f32 %v3933_v50, %v3833_v19 }
 0xc15   :  { %v1669_v28 = vmul.f32 %v3942_v9, %v3843_v23 }
 0xc6c   :  { %v1600_v43 = vpop.permute.xlu1 %1599 }
 0xc6d   :  { %v1605_v39 = vmul.f32 %v3925_v42, %v1600_v43 }
 0xc6e   :  { %v1602_v46 = vpop.permute.xlu0 %1601 }
 0xc6f   :  { %1609 = vrot.lane.b32.xlu1 %v1605_v39, %s3314_s12  ;;  %v1606_v38 = vmul.f32 %v3928_v37, %v1602_v46 }
 0xc71   :  { %1611 = vrot.lane.b32.xlu0 %v1606_v38, %s3314_s12 }
 0xc74   :  { %v1673_v4 = vpop.permute.xlu1 %1672 }
 0xc75   :  { %v1678_v51 = vmul.f32 %v3933_v50, %v1673_v4 }
 0xc76   :  { %v1675_v11 = vpop.permute.xlu0 %1674 }
 0xc77   :  { %1682 = vrot.lane.b32.xlu1 %v1678_v51, %s3314_s12  ;;  %v1679_v3 = vmul.f32 %v3942_v9, %v1675_v11 }
 0xc79   :  { %1684 = vrot.lane.b32.xlu0 %v1679_v3, %s3314_s12 }
 0xc7b   :  { %1636 = vperm.xlu1 %3001, %v1633_v63  }
 0xc7d   :  { %1639 = vperm.xlu0 %3000, %v1634_v14  }
 0xc7f   :  { %1708 = vperm.xlu1 %3001, %v1705_v10  }
 0xc81   :  { %1711 = vperm.xlu0 %3000, %v1706_v62  }
 0xce1   :  { %v1610_v15 = vpop.permute.xlu1 %1609 }
 0xce2   :  { %v1615_v17 = vadd.f32 %v1610_v15, %v1595_v2 }
 0xce3   :  { %v1612_v20 = vpop.permute.xlu0 %1611 }
 0xce4   :  { %3175 = vtanh.f32 %v1615_v17  ;;  %v1616_v22 = vadd.f32 %v1612_v20, %v1596_v5  ;;  %v357_v5 = vadd.f32 %v3759_v59, %v3885_v8 }
 0xce6   :  { %3177 = vtanh.f32 %v1616_v22 }
 0xce9   :  { %v1683_v25 = vpop.permute.xlu1 %1682 }
 0xcea   :  { %v1688_v26 = vadd.f32 %v1683_v25, %v1668_v21 }
 0xceb   :  { %v1685_v24 = vpop.permute.xlu0 %1684 }
 0xcec   :  { %3179 = vtanh.f32 %v1688_v26  ;;  %v1689_v27 = vadd.f32 %v1685_v24, %v1669_v28  ;;  %v362_v28 = vadd.f32 %v3759_v59, %v3879_v55 }
 0xcee   :  { %v3176_v32 = vpop.eup %3175  ;;  %3181 = vtanh.f32 %v1689_v27 }
 0xcef   :  { %1621 = vrot.lane.b32.xlu1 %v3176_v32, %s3314_s12 }
 0xcf0   :  { %v3178_v29 = vpop.eup %3177 }
 0xcf1   :  { %1623 = vrot.lane.b32.xlu0 %v3178_v29, %s3314_s12 }
 0xcf6   :  { %v3180_v30 = vpop.eup %3179 }
 0xcf7   :  { %1694 = vrot.lane.b32.xlu1 %v3180_v30, %s3314_s12 }
 0xcf8   :  { %v3182_v31 = vpop.eup %3181 }
 0xcf9   :  { %1696 = vrot.lane.b32.xlu0 %v3182_v31, %s3314_s12 }
 0xcfa   :  { %v1637_v33 = vpop.permute.xlu1 %1636 }
 0xcfb   :  { %vm1641_vm10 = vcmp.eq.s32.totalorder %v1637_v33, 1 }
 0xcfc   :  { %v3982_v36 = vsel %vm1641_vm10, %v1615_v17, %v3823_v16  ;;  %v1640_v35 = vpop.permute.xlu0 %1639  ;;  %vm1643_vm15 = vmpackc.low %vm1641_vm10, %vm1641_vm10 }
 0xcfd   :  { %vm1642_vm11 = vcmp.eq.s32.totalorder %v1640_v35, 1  ;;  %v1645_v4 = vsel %vm1643_vm15, 65537, %v3313_v6 }
 0xcfe   :  { %v1709_v40 = vpop.permute.xlu1 %1708  ;;  %v3985_v7 = vsel %vm1642_vm11, %v1616_v22, %v3829_v18  ;;  %vm1644_vm14 = vmpackc.low %vm1642_vm11, %vm1642_vm11 }
 0xcff   :  { %vm1713_vm12 = vcmp.eq.s32.totalorder %v1709_v40, 1  ;;  %v1646_v16 = vsel %vm1644_vm14, 65537, %v3313_v6 }
 0xd00   :  { %v3989_v43 = vsel %vm1713_vm12, %v1688_v26, %v3833_v19  ;;  %v1712_v39 = vpop.permute.xlu0 %1711  ;;  %v2705_v51 = vcombine.low %v1645_v4, %v1646_v16  ;;  %vm1715_vm3 = vmpackc.low %vm1713_vm12, %vm1713_vm12 }
 0xd01   :  { %vm1714_vm13 = vcmp.eq.s32.totalorder %v1712_v39, 1  ;;  %v1717_v10 = vsel %vm1715_vm3, 65537, %v3313_v6 }
 0xd02   :  { %v3992_v46 = vsel %vm1714_vm13, %v1689_v27, %v3843_v23  ;;  %vm1716_vm0 = vmpackc.low %vm1714_vm13, %vm1714_vm13  ;;  %vm1650_vm4 = vcmp.ne.s16.totalorder %v2705_v51, 0  ;;  %v365_v27 = vadd.f32 %v3759_v59, %v3883_v53 }
 0xd03   :  { %v1718_v23 = vsel %vm1716_vm0, 65537, %v3313_v6 }
 0xd61   :  { %v1622_v38 = vpop.permute.xlu1 %1621 }
 0xd62   :  { %v1627_v11 = vmul.f32 %v3925_v42, %v1622_v38  ;;  %v2710_v42 = vcombine.low %v1717_v10, %v1718_v23 }
 0xd63   :  { %v1624_v18 = vpop.permute.xlu0 %1623 }
 0xd64   :  { %v1628_v3 = vmul.f32 %v3928_v37, %v1624_v18  ;;  %vm1722_vm5 = vcmp.ne.s16.totalorder %v2710_v42, 0 }
 0xd66   :  { %v1632_v19 = vpack.c.bf16 %v1628_v3, %v1627_v11 }
 0xd68   :  { %v4002_v63 = vsel %vm1650_vm4, %v1632_v19, %v3867_v34 }
 0xd69   :  { %v1695_v14 = vpop.permute.xlu1 %1694  ;;  %1731 = vrot.lane.b32.xlu1 %v4002_v63, %s3315_s21 }
 0xd6a   :  { %v1700_v37 = vmul.f32 %v3933_v50, %v1695_v14 }
 0xd6b   :  { %v1697_v62 = vpop.permute.xlu0 %1696 }
 0xd6c   :  { %v1701_v2 = vmul.f32 %v3942_v9, %v1697_v62 }
 0xd6e   :  { %v1704_v15 = vpack.c.bf16 %v1701_v2, %v1700_v37 }
 0xd70   :  { %v4010_v17 = vsel %vm1722_vm5, %v1704_v15, %v3875_v45  ;;  %v354_v45 = vadd.f32 %v3759_v59, %v3881_v49 }
 0xd71   :  { %1783 = vrot.lane.b32.xlu0 %v4010_v17, %s3315_s21 }
 0xddb   :  { %v1732_v34 = vpop.permute.xlu1 %1731 }
 0xddc   :  { %2940 = vmatmul.mubr.msk.bf16.vlgmr.msra.gmra.mrb[36].mxu0 %vm56_vm1, %v1732_v34 }
 0xddd   :  { %2952 = vmatpush3.bf16.msra.mxu0 %v3734_v47  ;;  %2955 = vmatprep.mubr.msk.bf16.mxu0 %vm3312_vm2, %v3311_v1 }
 0xdde   :  { %2953 = vmatprep.subr.bf16.mxu0 %v3311_v1 }
 0xde1   :  { %2954 = vmatpush3.bf16.msra.mxu0 %v3743_v48 }
 0xde2   :  { %2967 = vmatprep.subr.bf16.mxu0 %v3311_v1 }
 0xde3   :  { %v1784_v50 = vpop.permute.xlu0 %1783 }
 0xde4   :  { %2948 = vmatmul.mubr.msk.bf16.vlgmr.msra.gmra.mrb[36].mxu1 %vm56_vm1, %v1784_v50 }
 0xde5   :  { %2960 = vmatpush3.bf16.msra.mxu1 %v3734_v47  ;;  %2963 = vmatprep.mubr.msk.bf16.mxu1 %vm3312_vm2, %v3311_v1 }
 0xde6   :  { %2961 = vmatprep.subr.bf16.mxu1 %v3311_v1 }
 0xde9   :  { %2962 = vmatpush3.bf16.msra.mxu1 %v3743_v48 }
 0xdea   :  { %2975 = vmatprep.subr.bf16.mxu1 %v3311_v1 }
 0xeaf   :  { %v1770_v9 = vpop.f32.mrb[36].mxu0 }
 0xeb0   :  { %v1777_v20 = vadd.f32 %v1770_v9, %v354_v45  ;;  %v2941_v22 = vpop.f32.mrb[37].mxu0 }
 0xeb1   :  { %v1773_v21 = vpop.f32.mrb[38].mxu0  ;;  %v1884_v22 = vsel %vm2716_vm7, 1, %v3313_v6  ;;  %vm2732_vm7 = vcmp.gt.s32.totalorder %v3956_v13, 6 }
 0xeb2   :  { %3183 = vtanh.f32 %v1777_v20  ;;  %v1778_v25 = vadd.f32 %v1773_v21, %v357_v5  ;;  %v2942_v26 = vpop.f32.mrb[39].mxu0  ;;  %v2713_v53 = vmul.f32 -1.442695, %v1777_v20  ;;  %v1883_v20 = vsel %vm2715_vm6, 1, %v3313_v6 }
 0xeb3   :  { %v1955_v21 = vsel %vm2720_vm8, 1, %v3313_v6  ;;  %vm2728_vm6 = vcmp.gt.s32.totalorder %v3950_v12, 6  ;;  %vm2733_vm8 = vcmp.gt.s32.totalorder %v3965_v56, 6 }
 0xeb4   :  { %3185 = vtanh.f32 %v1778_v25  ;;  %v2714_v40 = vmul.f32 -1.442695, %v1778_v25  ;;  %v1956_v25 = vsel %vm2721_vm9, 1, %v3313_v6 }
 0xeb7   :  { %v1822_v24 = vpop.f32.mrb[36].mxu1 }
 0xeb8   :  { %v1829_v32 = vadd.f32 %v1822_v24, %v362_v28  ;;  %v2949_v49 = vpop.f32.mrb[37].mxu1 }
 0xeb9   :  { %v1825_v29 = vpop.f32.mrb[38].mxu1 }
 0xeba   :  { %3187 = vtanh.f32 %v1829_v32  ;;  %v1830_v30 = vadd.f32 %v1825_v29, %v365_v27  ;;  %v2950_v8 = vpop.f32.mrb[39].mxu1  ;;  %v2718_v39 = vmul.f32 -1.442695, %v1829_v32 }
 0xebc   :  { %v3184_v31 = vpop.eup %3183  ;;  %3189 = vtanh.f32 %v1830_v30  ;;  %v2719_v16 = vmul.f32 -1.442695, %v1830_v30 }
 0xebd   :  { %1849 = vrot.lane.b32.xlu1 %v3184_v31, %s3314_s12  ;;  %3191 = vpow2.f32 %v2713_v53 }
 0xebe   :  { %v3186_v33 = vpop.eup %3185  ;;  %3193 = vpow2.f32 %v2714_v40 }
 0xebf   :  { %1851 = vrot.lane.b32.xlu0 %v3186_v33, %s3314_s12  ;;  %3195 = vpow2.f32 %v2718_v39 }
 0xec0   :  { %3197 = vpow2.f32 %v2719_v16 }
 0xec4   :  { %v3188_v35 = vpop.eup %3187 }
 0xec5   :  { %1922 = vrot.lane.b32.xlu1 %v3188_v35, %s3314_s12 }
 0xec6   :  { %v3190_v55 = vpop.eup %3189 }
 0xec7   :  { %1924 = vrot.lane.b32.xlu0 %v3190_v55, %s3314_s12  ;;  %v3192_v38 = vpop.eup %3191 }
 0xec8   :  { %v3194_v4 = vpop.eup %3193  ;;  %v1837_v51 = vadd.f32 1.0, %v3192_v38 }
 0xec9   :  { %v1838_v18 = vadd.f32 1.0, %v3194_v4  ;;  %v3196_v11 = vpop.eup %3195 }
 0xeca   :  { %3199 = vrcp.f32 %v1837_v51  ;;  %v3198_v3 = vpop.eup %3197  ;;  %v1910_v19 = vadd.f32 1.0, %v3196_v11 }
 0xecb   :  { %3201 = vrcp.f32 %v1838_v18  ;;  %v1911_v23 = vadd.f32 1.0, %v3198_v3 }
 0xecc   :  { %3203 = vrcp.f32 %v1910_v19 }
 0xecd   :  { %3205 = vrcp.f32 %v1911_v23 }
 0xed4   :  { %v4040_v14 = vpop.eup %3199 }
 0xed5   :  { %v4043_v62 = vpop.eup %3201  ;;  %v1845_v26 = vmul.f32 %v4040_v14, %v3982_v36 }
 0xed6   :  { %v4048_v15 = vpop.eup %3203  ;;  %v1846_v27 = vmul.f32 %v4043_v62, %v3985_v7 }
 0xed7   :  { %v4052_v45 = vpop.eup %3205  ;;  %v1918_v29 = vmul.f32 %v4048_v15, %v3989_v43 }
 0xed8   :  { %v1919_v31 = vmul.f32 %v4052_v45, %v3992_v46 }
 0xf2f   :  { %v1850_v10 = vpop.permute.xlu1 %1849 }
 0xf30   :  { %v1855_v42 = vmul.f32 %v4040_v14, %v1850_v10 }
 0xf31   :  { %v1852_v37 = vpop.permute.xlu0 %1851 }
 0xf32   :  { %1859 = vrot.lane.b32.xlu1 %v1855_v42, %s3314_s12  ;;  %v1856_v2 = vmul.f32 %v4043_v62, %v1852_v37 }
 0xf34   :  { %1861 = vrot.lane.b32.xlu0 %v1856_v2, %s3314_s12 }
 0xf37   :  { %v1923_v34 = vpop.permute.xlu1 %1922 }
 0xf38   :  { %v1928_v50 = vmul.f32 %v4048_v15, %v1923_v34 }
 0xf39   :  { %v1925_v9 = vpop.permute.xlu0 %1924 }
 0xf3a   :  { %1932 = vrot.lane.b32.xlu1 %v1928_v50, %s3314_s12  ;;  %v1929_v5 = vmul.f32 %v4052_v45, %v1925_v9 }
 0xf3c   :  { %1934 = vrot.lane.b32.xlu0 %v1929_v5, %s3314_s12 }
 0xf3e   :  { %1886 = vperm.xlu1 %3001, %v1883_v20  }
 0xf40   :  { %1889 = vperm.xlu0 %3000, %v1884_v22  }
 0xf42   :  { %1958 = vperm.xlu1 %3001, %v1955_v21  }
 0xf44   :  { %1961 = vperm.xlu0 %3000, %v1956_v25   ;;  %v373_v25 = vadd.f32 %v3759_v59, %v3893_v52 }
 0xfa4   :  { %v1860_v28 = vpop.permute.xlu1 %1859 }
 0xfa5   :  { %v1865_v24 = vadd.f32 %v1860_v28, %v1845_v26 }
 0xfa6   :  { %v1862_v32 = vpop.permute.xlu0 %1861 }
 0xfa7   :  { %3207 = vtanh.f32 %v1865_v24  ;;  %v1866_v49 = vadd.f32 %v1862_v32, %v1846_v27  ;;  %v378_v32 = vadd.f32 %v3759_v59, %v3887_v44 }
 0xfa9   :  { %3209 = vtanh.f32 %v1866_v49 }
 0xfac   :  { %v1933_v30 = vpop.permute.xlu1 %1932 }
 0xfad   :  { %v1938_v8 = vadd.f32 %v1933_v30, %v1918_v29 }
 0xfae   :  { %v1935_v33 = vpop.permute.xlu0 %1934 }
 0xfaf   :  { %3211 = vtanh.f32 %v1938_v8  ;;  %v1939_v35 = vadd.f32 %v1935_v33, %v1919_v31 }
 0xfb1   :  { %v3208_v55 = vpop.eup %3207  ;;  %3213 = vtanh.f32 %v1939_v35 }
 0xfb2   :  { %1871 = vrot.lane.b32.xlu1 %v3208_v55, %s3314_s12 }
 0xfb3   :  { %v3210_v53 = vpop.eup %3209 }
 0xfb4   :  { %1873 = vrot.lane.b32.xlu0 %v3210_v53, %s3314_s12 }
 0xfb9   :  { %v3212_v40 = vpop.eup %3211 }
 0xfba   :  { %1944 = vrot.lane.b32.xlu1 %v3212_v40, %s3314_s12 }
 0xfbb   :  { %v3214_v39 = vpop.eup %3213 }
 0xfbc   :  { %1946 = vrot.lane.b32.xlu0 %v3214_v39, %s3314_s12 }
 0xfbd   :  { %v1887_v16 = vpop.permute.xlu1 %1886 }
 0xfbe   :  { %vm1891_vm10 = vcmp.eq.s32.totalorder %v1887_v16, 1 }
 0xfbf   :  { %v4077_v38 = vsel %vm1891_vm10, %v1865_v24, %v3982_v36  ;;  %v1890_v4 = vpop.permute.xlu0 %1889  ;;  %vm1893_vm15 = vmpackc.low %vm1891_vm10, %vm1891_vm10 }
 0xfc0   :  { %vm1892_vm11 = vcmp.eq.s32.totalorder %v1890_v4, 1  ;;  %v1895_v10 = vsel %vm1893_vm15, 65537, %v3313_v6 }
 0xfc1   :  { %v1959_v51 = vpop.permute.xlu1 %1958  ;;  %v4080_v18 = vsel %vm1892_vm11, %v1866_v49, %v3985_v7  ;;  %vm1894_vm14 = vmpackc.low %vm1892_vm11, %vm1892_vm11 }
 0xfc2   :  { %vm1963_vm12 = vcmp.eq.s32.totalorder %v1959_v51, 1  ;;  %v1896_v36 = vsel %vm1894_vm14, 65537, %v3313_v6 }
 0xfc3   :  { %v4084_v11 = vsel %vm1963_vm12, %v1938_v8, %v3989_v43  ;;  %v1962_v3 = vpop.permute.xlu0 %1961  ;;  %v2717_v42 = vcombine.low %v1895_v10, %v1896_v36  ;;  %vm1965_vm4 = vmpackc.low %vm1963_vm12, %vm1963_vm12 }
 0xfc4   :  { %vm1964_vm13 = vcmp.eq.s32.totalorder %v1962_v3, 1  ;;  %v1967_v9 = vsel %vm1965_vm4, 65537, %v3313_v6 }
 0xfc5   :  { %v4087_v19 = vsel %vm1964_vm13, %v1939_v35, %v3992_v46  ;;  %vm1966_vm0 = vmpackc.low %vm1964_vm13, %vm1964_vm13  ;;  %vm1900_vm3 = vcmp.ne.s16.totalorder %v2717_v42, 0 }
 0xfc6   :  { %v1968_v46 = vsel %vm1966_vm0, 65537, %v3313_v6 }
0x1024   :  { %v1872_v23 = vpop.permute.xlu1 %1871 }
0x1025   :  { %v1877_v37 = vmul.f32 %v4040_v14, %v1872_v23  ;;  %v2722_v14 = vcombine.low %v1967_v9, %v1968_v46 }
0x1026   :  { %v1874_v7 = vpop.permute.xlu0 %1873 }
0x1027   :  { %v1878_v2 = vmul.f32 %v4043_v62, %v1874_v7  ;;  %vm1972_vm5 = vcmp.ne.s16.totalorder %v2722_v14, 0 }
0x1029   :  { %v1882_v43 = vpack.c.bf16 %v1878_v2, %v1877_v37 }
0x102b   :  { %v4097_v34 = vsel %vm1900_vm3, %v1882_v43, %v4002_v63 }
0x102c   :  { %v1945_v50 = vpop.permute.xlu1 %1944  ;;  %1981 = vrot.lane.b32.xlu1 %v4097_v34, %s3315_s21 }
0x102d   :  { %v1950_v62 = vmul.f32 %v4048_v15, %v1945_v50 }
0x102e   :  { %v1947_v5 = vpop.permute.xlu0 %1946 }
0x102f   :  { %v1951_v20 = vmul.f32 %v4052_v45, %v1947_v5 }
0x1031   :  { %v1954_v22 = vpack.c.bf16 %v1951_v20, %v1950_v62  ;;  %v2134_v20 = vsel %vm2728_vm6, 1, %v3313_v6  ;;  %vm2744_vm6 = vcmp.gt.s32.totalorder %v3956_v13, 7 }
0x1033   :  { %v4105_v21 = vsel %vm1972_vm5, %v1954_v22, %v4010_v17  ;;  %v370_v17 = vadd.f32 %v3759_v59, %v3889_v61  ;;  %v2205_v22 = vsel %vm2732_vm7, 1, %v3313_v6  ;;  %vm2739_vm5 = vcmp.gt.s32.totalorder %v3939_v0, 7 }
0x1034   :  { %2033 = vrot.lane.b32.xlu0 %v4105_v21, %s3315_s21  ;;  %vm2745_vm7 = vcmp.gt.s32.totalorder %v3965_v56, 7 }
0x109e   :  { %v1982_v63 = vpop.permute.xlu1 %1981 }
0x109f   :  { %2956 = vmatmul.mubr.msk.bf16.vlgmr.msra.gmra.mrb[40].mxu0 %vm56_vm1, %v1982_v63  ;;  %v2206_v63 = vsel %vm2733_vm8, 1, %v3313_v6 }
0x10a0   :  { %2968 = vmatpush3.bf16.msra.mxu0 %v3734_v47  ;;  %2971 = vmatprep.mubr.msk.bf16.mxu0 %vm3312_vm2, %v3311_v1 }
0x10a1   :  { %2969 = vmatprep.subr.bf16.mxu0 %v3311_v1 }
0x10a4   :  { %2970 = vmatpush3.bf16.msra.mxu0 %v3743_v48 }
0x10a6   :  { %v2034_v15 = vpop.permute.xlu0 %2033 }
0x10a7   :  { %2964 = vmatmul.mubr.msk.bf16.vlgmr.msra.gmra.mrb[40].mxu1 %vm56_vm1, %v2034_v15 }
0x10a8   :  { %2976 = vmatpush3.bf16.msra.mxu1 %v3734_v47  ;;  %2979 = vmatprep.mubr.msk.bf16.mxu1 %vm3312_vm2, %v3311_v1  ;;  %vm2727_vm2 = vcmp.gt.s32.totalorder %v3939_v0, 6  ;;  %v2455_v0 = vsel %vm2744_vm6, 1, %v3313_v6 }
0x10a9   :  { %2977 = vmatprep.subr.bf16.mxu1 %v3311_v1  ;;  %v2133_v62 = vsel %vm2727_vm2, 1, %v3313_v6  ;;  %vm2740_vm2 = vcmp.gt.s32.totalorder %v3950_v12, 7 }
0x10ac   :  { %2978 = vmatpush3.bf16.msra.mxu1 %v3743_v48  ;;  %v381_v48 = vadd.f32 %v3759_v59, %v3891_v41 }
0x1172   :  { %v2020_v45 = vpop.f32.mrb[40].mxu0 }
0x1173   :  { %v2027_v26 = vadd.f32 %v2020_v45, %v370_v17  ;;  %v2957_v28 = vpop.f32.mrb[41].mxu0 }
0x1174   :  { %v2023_v24 = vpop.f32.mrb[42].mxu0 }
0x1175   :  { %3215 = vtanh.f32 %v2027_v26  ;;  %v2028_v27 = vadd.f32 %v2023_v24, %v373_v25  ;;  %v2958_v47 = vpop.f32.mrb[43].mxu0  ;;  %v2725_v59 = vmul.f32 -1.442695, %v2027_v26 }
0x1177   :  { %3217 = vtanh.f32 %v2028_v27  ;;  %v2726_v41 = vmul.f32 -1.442695, %v2028_v27 }
0x117a   :  { %v2072_v1 = vpop.f32.mrb[40].mxu1 }
0x117b   :  { %v2079_v49 = vadd.f32 %v2072_v1, %v378_v32  ;;  %v2965_v61 = vpop.f32.mrb[41].mxu1 }
0x117c   :  { %v2075_v29 = vpop.f32.mrb[42].mxu1 }
0x117d   :  { %3219 = vtanh.f32 %v2079_v49  ;;  %v2080_v30 = vadd.f32 %v2075_v29, %v381_v48  ;;  %v2966_v52 = vpop.f32.mrb[43].mxu1  ;;  %v2730_v35 = vmul.f32 -1.442695, %v2079_v49 }
0x117f   :  { %v3216_v8 = vpop.eup %3215  ;;  %3221 = vtanh.f32 %v2080_v30  ;;  %v2731_v55 = vmul.f32 -1.442695, %v2080_v30 }
0x1180   :  { %2099 = vrot.lane.b32.xlu1 %v3216_v8, %s3314_s12  ;;  %3223 = vpow2.f32 %v2725_v59 }
0x1181   :  { %v3218_v31 = vpop.eup %3217  ;;  %3225 = vpow2.f32 %v2726_v41 }
0x1182   :  { %2101 = vrot.lane.b32.xlu0 %v3218_v31, %s3314_s12  ;;  %3227 = vpow2.f32 %v2730_v35 }
0x1183   :  { %3229 = vpow2.f32 %v2731_v55 }
0x1187   :  { %v3220_v33 = vpop.eup %3219 }
0x1188   :  { %2172 = vrot.lane.b32.xlu1 %v3220_v33, %s3314_s12 }
0x1189   :  { %v3222_v44 = vpop.eup %3221 }
0x118a   :  { %2174 = vrot.lane.b32.xlu0 %v3222_v44, %s3314_s12  ;;  %v3224_v53 = vpop.eup %3223 }
0x118b   :  { %v3226_v40 = vpop.eup %3225  ;;  %v2087_v39 = vadd.f32 1.0, %v3224_v53 }
0x118c   :  { %v2088_v16 = vadd.f32 1.0, %v3226_v40  ;;  %v3228_v4 = vpop.eup %3227 }
0x118d   :  { %3231 = vrcp.f32 %v2087_v39  ;;  %v3230_v51 = vpop.eup %3229  ;;  %v2160_v3 = vadd.f32 1.0, %v3228_v4 }
0x118e   :  { %3233 = vrcp.f32 %v2088_v16  ;;  %v2161_v36 = vadd.f32 1.0, %v3230_v51 }
0x118f   :  { %3235 = vrcp.f32 %v2160_v3 }
0x1190   :  { %3237 = vrcp.f32 %v2161_v36 }
0x1197   :  { %v4133_v23 = vpop.eup %3231 }
0x1198   :  { %v4136_v7 = vpop.eup %3233  ;;  %v2095_v15 = vmul.f32 %v4133_v23, %v4077_v38 }
0x1199   :  { %v4141_v43 = vpop.eup %3235  ;;  %v2096_v25 = vmul.f32 %v4136_v7, %v4080_v18 }
0x119a   :  { %v4145_v9 = vpop.eup %3237  ;;  %v2168_v24 = vmul.f32 %v4141_v43, %v4084_v11 }
0x119b   :  { %v2169_v32 = vmul.f32 %v4145_v9, %v4087_v19 }
0x11f2   :  { %v2100_v10 = vpop.permute.xlu1 %2099 }
0x11f3   :  { %v2105_v42 = vmul.f32 %v4133_v23, %v2100_v10 }
0x11f4   :  { %v2102_v37 = vpop.permute.xlu0 %2101 }
0x11f5   :  { %2109 = vrot.lane.b32.xlu1 %v2105_v42, %s3314_s12  ;;  %v2106_v2 = vmul.f32 %v4136_v7, %v2102_v37 }
0x11f7   :  { %2111 = vrot.lane.b32.xlu0 %v2106_v2, %s3314_s12 }
0x11fa   :  { %v2173_v46 = vpop.permute.xlu1 %2172 }
0x11fb   :  { %v2178_v50 = vmul.f32 %v4141_v43, %v2173_v46 }
0x11fc   :  { %v2175_v14 = vpop.permute.xlu0 %2174 }
0x11fd   :  { %2182 = vrot.lane.b32.xlu1 %v2178_v50, %s3314_s12  ;;  %v2179_v5 = vmul.f32 %v4145_v9, %v2175_v14 }
0x11ff   :  { %2184 = vrot.lane.b32.xlu0 %v2179_v5, %s3314_s12 }
0x1201   :  { %2136 = vperm.xlu1 %3001, %v2133_v62  }
0x1203   :  { %2139 = vperm.xlu0 %3000, %v2134_v20  }
0x1205   :  { %2208 = vperm.xlu1 %3001, %v2205_v22  }
0x1207   :  { %2211 = vperm.xlu0 %3000, %v2206_v63  }
0x1267   :  { %v2110_v17 = vpop.permute.xlu1 %2109 }
0x1268   :  { %v2115_v45 = vadd.f32 %v2110_v17, %v2095_v15 }
0x1269   :  { %v2112_v26 = vpop.permute.xlu0 %2111 }
0x126a   :  { %3239 = vtanh.f32 %v2115_v45  ;;  %v2116_v28 = vadd.f32 %v2112_v26, %v2096_v25 }
0x126c   :  { %3241 = vtanh.f32 %v2116_v28 }
0x126f   :  { %v2183_v27 = vpop.permute.xlu1 %2182 }
0x1270   :  { %v2188_v47 = vadd.f32 %v2183_v27, %v2168_v24 }
0x1271   :  { %v2185_v1 = vpop.permute.xlu0 %2184 }
0x1272   :  { %3243 = vtanh.f32 %v2188_v47  ;;  %v2189_v48 = vadd.f32 %v2185_v1, %v2169_v32 }
0x1274   :  { %v3240_v49 = vpop.eup %3239  ;;  %3245 = vtanh.f32 %v2189_v48 }
0x1275   :  { %2121 = vrot.lane.b32.xlu1 %v3240_v49, %s3314_s12 }
0x1276   :  { %v3242_v61 = vpop.eup %3241 }
0x1277   :  { %2123 = vrot.lane.b32.xlu0 %v3242_v61, %s3314_s12 }
0x127c   :  { %v3244_v29 = vpop.eup %3243 }
0x127d   :  { %2194 = vrot.lane.b32.xlu1 %v3244_v29, %s3314_s12 }
0x127e   :  { %v3246_v30 = vpop.eup %3245 }
0x127f   :  { %2196 = vrot.lane.b32.xlu0 %v3246_v30, %s3314_s12 }
0x1280   :  { %v2137_v52 = vpop.permute.xlu1 %2136 }
0x1281   :  { %vm2141_vm9 = vcmp.eq.s32.totalorder %v2137_v52, 1 }
0x1282   :  { %v4170_v8 = vsel %vm2141_vm9, %v2115_v45, %v4077_v38  ;;  %v2140_v31 = vpop.permute.xlu0 %2139  ;;  %vm2143_vm14 = vmpackc.low %vm2141_vm9, %vm2141_vm9 }
0x1283   :  { %vm2142_vm10 = vcmp.eq.s32.totalorder %v2140_v31, 1  ;;  %v2145_v53 = vsel %vm2143_vm14, 65537, %v3313_v6 }
0x1284   :  { %v2209_v33 = vpop.permute.xlu1 %2208  ;;  %v4173_v44 = vsel %vm2142_vm10, %v2116_v28, %v4080_v18  ;;  %vm2144_vm13 = vmpackc.low %vm2142_vm10, %vm2142_vm10 }
0x1285   :  { %vm2213_vm11 = vcmp.eq.s32.totalorder %v2209_v33, 1  ;;  %v2146_v38 = vsel %vm2144_vm13, 65537, %v3313_v6 }
0x1286   :  { %v4177_v59 = vsel %vm2213_vm11, %v2188_v47, %v4084_v11  ;;  %v2212_v41 = vpop.permute.xlu0 %2211  ;;  %v2729_v40 = vcombine.low %v2145_v53, %v2146_v38  ;;  %vm2215_vm3 = vmpackc.low %vm2213_vm11, %vm2213_vm11 }
0x1287   :  { %vm2214_vm12 = vcmp.eq.s32.totalorder %v2212_v41, 1  ;;  %v2217_v3 = vsel %vm2215_vm3, 65537, %v3313_v6 }
0x1288   :  { %v4180_v35 = vsel %vm2214_vm12, %v2189_v48, %v4087_v19  ;;  %vm2216_vm15 = vmpackc.low %vm2214_vm12, %vm2214_vm12  ;;  %vm2150_vm0 = vcmp.ne.s16.totalorder %v2729_v40, 0 }
0x1289   :  { %v2218_v19 = vsel %vm2216_vm15, 65537, %v3313_v6 }
0x128a   :  { %v2734_v36 = vcombine.low %v2217_v3, %v2218_v19  ;;  %v2383_v3 = vsel %vm2739_vm5, 1, %v3313_v6 }
0x128c   :  { %vm2222_vm4 = vcmp.ne.s16.totalorder %v2734_v36, 0  ;;  %v2384_v36 = vsel %vm2740_vm2, 1, %v3313_v6 }
0x12e7   :  { %v2122_v55 = vpop.permute.xlu1 %2121 }
0x12e8   :  { %v2127_v39 = vmul.f32 %v4133_v23, %v2122_v55 }
0x12e9   :  { %v2124_v18 = vpop.permute.xlu0 %2123 }
0x12ea   :  { %v2128_v16 = vmul.f32 %v4136_v7, %v2124_v18 }
0x12ec   :  { %v2132_v11 = vpack.c.bf16 %v2128_v16, %v2127_v39 }
0x12ee   :  { %v4190_v4 = vsel %vm2150_vm0, %v2132_v11, %v4097_v34 }
0x12ef   :  { %v2195_v51 = vpop.permute.xlu1 %2194  ;;  %2231 = vrot.lane.b32.xlu1 %v4190_v4, %s3315_s21 }
0x12f0   :  { %v2200_v10 = vmul.f32 %v4141_v43, %v2195_v51  ;;  %v3286_v43 = vld [vmem:[%s4316_s4] ss:$0 sm:$0xff] }
0x12f1   :  { %v2197_v23 = vpop.permute.xlu0 %2196  ;;  %v386_v46 = vadd.f32 %v3286_v43, %v3902_v58  ;;  %v394_v22 = vadd.f32 %v3286_v43, %v3900_v57  ;;  %v397_v15 = vadd.f32 %v3286_v43, %v3904_v60 }
0x12f2   :  { %v2201_v42 = vmul.f32 %v4145_v9, %v2197_v23  ;;  %v389_v9 = vadd.f32 %v3286_v43, %v3907_v54  ;;  %v2456_v23 = vsel %vm2745_vm7, 1, %v3313_v6 }
0x12f4   :  { %v2204_v7 = vpack.c.bf16 %v2201_v42, %v2200_v10 }
0x12f6   :  { %v4198_v37 = vsel %vm2222_vm4, %v2204_v7, %v4105_v21 }
0x12f7   :  { %2283 = vrot.lane.b32.xlu0 %v4198_v37, %s3315_s21 }
0x1361   :  { %v2232_v34 = vpop.permute.xlu1 %2231 }
0x1362   :  { %2972 = vmatmul.mubr.msk.bf16.vlgmr.msra.gmra.mrb[44].mxu0 %vm56_vm1, %v2232_v34 }
0x1369   :  { %v2284_v2 = vpop.permute.xlu0 %2283 }
0x136a   :  { %2980 = vmatmul.mubr.msk.bf16.vlgmr.msra.gmra.mrb[44].mxu1 %vm56_vm1, %v2284_v2 }
0x1435   :  { %v2270_v50 = vpop.f32.mrb[44].mxu0 }
0x1436   :  { %v2277_v21 = vadd.f32 %v2270_v50, %v386_v46  ;;  %v2973_v14 = vpop.f32.mrb[45].mxu0 }
0x1437   :  { %v2273_v5 = vpop.f32.mrb[46].mxu0 }
0x1438   :  { %3247 = vtanh.f32 %v2277_v21  ;;  %v2278_v62 = vadd.f32 %v2273_v5, %v389_v9  ;;  %v2974_v20 = vpop.f32.mrb[47].mxu0  ;;  %v2737_v60 = vmul.f32 -1.442695, %v2277_v21 }
0x143a   :  { %3249 = vtanh.f32 %v2278_v62  ;;  %v2738_v27 = vmul.f32 -1.442695, %v2278_v62 }
0x143d   :  { %v2322_v63 = vpop.f32.mrb[44].mxu1 }
0x143e   :  { %v2329_v17 = vadd.f32 %v2322_v63, %v394_v22  ;;  %v2981_v45 = vpop.f32.mrb[45].mxu1 }
0x143f   :  { %v2325_v25 = vpop.f32.mrb[46].mxu1 }
0x1440   :  { %3251 = vtanh.f32 %v2329_v17  ;;  %v2330_v58 = vadd.f32 %v2325_v25, %v397_v15  ;;  %v2982_v26 = vpop.f32.mrb[47].mxu1  ;;  %v2742_v47 = vmul.f32 -1.442695, %v2329_v17 }
0x1442   :  { %v3248_v28 = vpop.eup %3247  ;;  %3253 = vtanh.f32 %v2330_v58  ;;  %v2743_v32 = vmul.f32 -1.442695, %v2330_v58  ;;  %v3021_v58 = vld [vmem:[%s4317_s5] sm:$0xff]  }
0x1443   :  { %2349 = vrot.lane.b32.xlu1 %v3248_v28, %s3314_s12  ;;  %3255 = vpow2.f32 %v2737_v60  ;;  %2983 = vmatprep.subr.bf16.mxu0 %v3021_v58  ;;  %v3022_v60 = vld [vmem:[%s4317_s5 + $0x8] sm:$0xff]   ;;  %s3316_s5 = smov 96  }
0x1444   :  { %v3250_v54 = vpop.eup %3249  ;;  %3257 = vpow2.f32 %v2738_v27  ;;  %2984 = vmatpush3.bf16.msra.mxu0 %v3021_v58 }
0x1445   :  { %2351 = vrot.lane.b32.xlu0 %v3250_v54, %s3314_s12  ;;  %3259 = vpow2.f32 %v2742_v47  ;;  %2985 = vmatprep.subr.bf16.mxu0 %v3022_v60 }
0x1446   :  { %3261 = vpow2.f32 %v2743_v32 }
0x1448   :  { %2986 = vmatpush3.bf16.msra.mxu0 %v3022_v60 }
0x144a   :  { %v3252_v24 = vpop.eup %3251 }
0x144b   :  { %2422 = vrot.lane.b32.xlu1 %v3252_v24, %s3314_s12 }
0x144c   :  { %v3254_v57 = vpop.eup %3253 }
0x144d   :  { %2424 = vrot.lane.b32.xlu0 %v3254_v57, %s3314_s12  ;;  %v3256_v1 = vpop.eup %3255 }
0x144e   :  { %v3258_v48 = vpop.eup %3257  ;;  %v2337_v49 = vadd.f32 1.0, %v3256_v1 }
0x144f   :  { %v2338_v61 = vadd.f32 1.0, %v3258_v48  ;;  %v3260_v29 = vpop.eup %3259 }
0x1450   :  { %3263 = vrcp.f32 %v2337_v49  ;;  %v3262_v30 = vpop.eup %3261  ;;  %v2410_v52 = vadd.f32 1.0, %v3260_v29 }
0x1451   :  { %3265 = vrcp.f32 %v2338_v61  ;;  %v2411_v31 = vadd.f32 1.0, %v3262_v30 }
0x1452   :  { %3267 = vrcp.f32 %v2410_v52 }
0x1453   :  { %3269 = vrcp.f32 %v2411_v31 }
0x145a   :  { %v4215_v33 = vpop.eup %3263 }
0x145b   :  { %v4218_v55 = vpop.eup %3265  ;;  %v2345_v10 = vmul.f32 %v4215_v33, %v4170_v8 }
0x145c   :  { %v4223_v18 = vpop.eup %3267  ;;  %v2346_v13 = vmul.f32 %v4218_v55, %v4173_v44 }
0x145d   :  { %v4227_v11 = vpop.eup %3269  ;;  %v2418_v56 = vmul.f32 %v4223_v18, %v4177_v59 }
0x145e   :  { %v2419_v46 = vmul.f32 %v4227_v11, %v4180_v35 }
0x14b5   :  { %v2350_v41 = vpop.permute.xlu1 %2349 }
0x14b6   :  { %v2355_v38 = vmul.f32 %v4215_v33, %v2350_v41 }
0x14b7   :  { %v2352_v53 = vpop.permute.xlu0 %2351 }
0x14b8   :  { %2359 = vrot.lane.b32.xlu1 %v2355_v38, %s3314_s12  ;;  %v2356_v40 = vmul.f32 %v4218_v55, %v2352_v53  ;;  %v2747_v53 = vld [vmem:[%s4318_s6] ss:$0 sm:$0xff] }
0x14ba   :  { %2361 = vrot.lane.b32.xlu0 %v2356_v40, %s3314_s12 }
0x14bd   :  { %v2423_v39 = vpop.permute.xlu1 %2422 }
0x14be   :  { %v2428_v16 = vmul.f32 %v4223_v18, %v2423_v39 }
0x14bf   :  { %v2425_v19 = vpop.permute.xlu0 %2424 }
0x14c0   :  { %2432 = vrot.lane.b32.xlu1 %v2428_v16, %s3314_s12  ;;  %v2429_v51 = vmul.f32 %v4227_v11, %v2425_v19 }
0x14c2   :  { %2434 = vrot.lane.b32.xlu0 %v2429_v51, %s3314_s12 }
0x14c4   :  { %2386 = vperm.xlu1 %3001, %v2383_v3  }
0x14c6   :  { %2389 = vperm.xlu0 %3000, %v2384_v36  }
0x14c8   :  { %2458 = vperm.xlu1 %3001, %v2455_v0  }
0x14ca   :  { %2461 = vperm.xlu0 %3000, %v2456_v23  }
0x152a   :  { %v2360_v12 = vpop.permute.xlu1 %2359 }
0x152b   :  { %v2365_v42 = vadd.f32 %v2360_v12, %v2345_v10 }
0x152c   :  { %v2362_v7 = vpop.permute.xlu0 %2361 }
0x152d   :  { %3271 = vtanh.f32 %v2365_v42  ;;  %v4243_v34 = vadd.f32 %v2362_v7, %v2346_v13 }
0x152f   :  { %3273 = vtanh.f32 %v4243_v34 }
0x1532   :  { %v2433_v2 = vpop.permute.xlu1 %2432 }
0x1533   :  { %v2438_v43 = vadd.f32 %v2433_v2, %v2418_v56 }
0x1534   :  { %v2435_v50 = vpop.permute.xlu0 %2434 }
0x1535   :  { %3275 = vtanh.f32 %v2438_v43  ;;  %v2439_v9 = vadd.f32 %v2435_v50, %v2419_v46 }
0x1537   :  { %v3272_v21 = vpop.eup %3271  ;;  %3277 = vtanh.f32 %v2439_v9 }
0x1538   :  { %2371 = vrot.lane.b32.xlu1 %v3272_v21, %s3314_s12 }
0x1539   :  { %v3274_v14 = vpop.eup %3273 }
0x153a   :  { %2373 = vrot.lane.b32.xlu0 %v3274_v14, %s3314_s12 }
0x153f   :  { %v3276_v5 = vpop.eup %3275 }
0x1540   :  { %2444 = vrot.lane.b32.xlu1 %v3276_v5, %s3314_s12 }
0x1541   :  { %v3278_v62 = vpop.eup %3277 }
0x1542   :  { %2446 = vrot.lane.b32.xlu0 %v3278_v62, %s3314_s12 }
0x1543   :  { %v2387_v20 = vpop.permute.xlu1 %2386 }
0x1544   :  { %vm2391_vm9 = vcmp.eq.s32.totalorder %v2387_v20, 1 }
0x1545   :  { %v2390_v22 = vpop.permute.xlu0 %2389  ;;  %vm2393_vm11 = vmpackc.low %vm2391_vm9, %vm2391_vm9  ;;  %v2402_v61 = vsel %vm2391_vm9, %v2365_v42, %v4170_v8 }
0x1546   :  { %vm2392_vm8 = vcmp.eq.s32.totalorder %v2390_v22, 1  ;;  %v2395_v25 = vsel %vm2393_vm11, 65537, %v3313_v6 }
0x1547   :  { %vm2394_vm10 = vmpackc.low %vm2392_vm8, %vm2392_vm8  ;;  %v2459_v63 = vpop.permute.xlu1 %2458 }
0x1548   :  { %v2396_v17 = vsel %vm2394_vm10, 65537, %v3313_v6  ;;  %vm2463_vm13 = vcmp.eq.s32.totalorder %v2459_v63, 1 }
0x1549   :  { %v2462_v15 = vpop.permute.xlu0 %2461  ;;  %v2741_v26 = vcombine.low %v2395_v25, %v2396_v17  ;;  %vm2465_vm0 = vmpackc.low %vm2463_vm13, %vm2463_vm13 }
0x154a   :  { %vm2464_vm12 = vcmp.eq.s32.totalorder %v2462_v15, 1  ;;  %v2467_v1 = vsel %vm2465_vm0, 65537, %v3313_v6 }
0x154b   :  { %vm2466_vm14 = vmpackc.low %vm2464_vm12, %vm2464_vm12  ;;  %vm2400_vm15 = vcmp.ne.s16.totalorder %v2741_v26, 0  ;;  %v2475_v8 = vsel %vm2464_vm12, %v2439_v9, %v4180_v35 }
0x154c   :  { %v2468_v27 = vsel %vm2466_vm14, 65537, %v3313_v6  ;;  %v2403_v6 = vsel %vm2392_vm8, %v4243_v34, %v4173_v44 }
0x154d   :  { %v2746_v48 = vcombine.low %v2467_v1, %v2468_v27 }
0x154f   :  { %vm2472_vm3 = vcmp.ne.s16.totalorder %v2746_v48, 0 }
0x15aa   :  { %v2372_v45 = vpop.permute.xlu1 %2371 }
0x15ab   :  { %v2377_v54 = vmul.f32 %v4215_v33, %v2372_v45 }
0x15ac   :  { %v2374_v28 = vpop.permute.xlu0 %2373 }
0x15ad   :  { %v2378_v24 = vmul.f32 %v4218_v55, %v2374_v28 }
0x15af   :  { %v2382_v57 = vpack.c.bf16 %v2378_v24, %v2377_v54 }
0x15b1   :  { %v2401_v47 = vsel %vm2400_vm15, %v2382_v57, %v4190_v4  ;;  %v2474_v4 = vsel %vm2463_vm13, %v2438_v43, %v4177_v59 }
0x15b2   :  { %v2445_v32 = vpop.permute.xlu1 %2444  ;;  %2477 = vrot.lane.b32.xlu1 %v2401_v47, %s3315_s21 }
0x15b3   :  { %v2450_v29 = vmul.f32 %v4223_v18, %v2445_v32 }
0x15b4   :  { %v2447_v49 = vpop.permute.xlu0 %2446 }
0x15b5   :  { %v2451_v30 = vmul.f32 %v4227_v11, %v2447_v49 }
0x15b6   :  { %2488 = vrot.lane.b32.xlu1 %v2402_v61, %s3316_s5 }
0x15b7   :  { %v2454_v52 = vpack.c.bf16 %v2451_v30, %v2450_v29 }
0x15b9   :  { %v2473_v31 = vsel %vm2472_vm3, %v2454_v52, %v4198_v37 }
0x15ba   :  { %2498 = vrot.lane.b32.xlu1 %v2474_v4, %s3316_s5  ;;  %2482 = vrot.lane.b32.xlu0 %v2473_v31, %s3315_s21 }
0x15be   :  { %2490 = vrot.lane.b32.xlu0 %v2403_v6, %s3316_s5 }
0x15c2   :  { %2500 = vrot.lane.b32.xlu0 %v2475_v8, %s3316_s5 }
0x1624   :  { %v2478_v33 = vpop.permute.xlu1 %2477 }
0x1625   :  { %2480 = vst.msk [vmem:[#allocation3] sm:$0xff] %vm56_vm1, %v2478_v33 }
0x1628   :  { %v2489_v41 = vpop.permute.xlu1 %2488 }
0x1629   :  { %2494 = vst.msk [vmem:[#allocation4] sm:$0xff] %vm56_vm1, %v2489_v41 }
0x162c   :  { %v2499_v59 = vpop.permute.xlu1 %2498  ;;  %v2483_v37 = vpop.permute.xlu0 %2482  ;;  %v2509_v38 = vld [vmem:[#allocation3] sm:$0xff] }
0x162d   :  { %2504 = vst.msk [vmem:[#allocation4 + $0x10] sm:$0xff] %vm56_vm1, %v2499_v59  ;;  %2485 = vst.msk [vmem:[#allocation3 + $0x8] sm:$0xff] %vm56_vm1, %v2483_v37  ;;  %2987 = vmatprep.mubr.msk.bf16.mxu0 %vm56_vm1, %v2509_v38 }
0x1630   :  { %v2491_v44 = vpop.permute.xlu0 %2490 }
0x1631   :  { %2495 = vst.msk [vmem:[#allocation4 + $0x8] sm:$0xff] %vm56_vm1, %v2491_v44 }
0x1634   :  { %v2501_v35 = vpop.permute.xlu0 %2500  ;;  %v2510_v55 = vld [vmem:[#allocation3 + $0x8] sm:$0xff] }
0x1635   :  { %2505 = vst.msk [vmem:[#allocation4 + $0x18] sm:$0xff] %vm56_vm1, %v2501_v35  ;;  %2988 = vmatmul.mubr.msk.bf16.vlgmr.msra.gmra.mrb[48].mxu0 %vm56_vm1, %v2510_v55 }
0x1708   :  { %v2989_v40 = vpop.f32.mrb[48].mxu0 }
0x1709   :  { %v2583_v18 = vadd.f32 %v2989_v40, %v2747_v53  ;;  %v2574_v39 = vpop.f32.mrb[49].mxu0 }
0x170a   :  { %v2575_v16 = vadd.f32 %v2747_v53, %v2574_v39  ;;  %v2990_v11 = vpop.f32.mrb[50].mxu0 }
0x170b   :  { %2591 = vst [vmem:[#allocation5 + $0x10] sm:$0xff] %v2583_v18  ;;  %v2586_v19 = vadd.f32 %v2990_v11, %v2747_v53  ;;  %v2577_v51 = vpop.f32.mrb[51].mxu0 }
0x170c   :  { %2589 = vst [vmem:[#allocation5] sm:$0xff] %v2575_v16  ;;  %v2578_v3 = vadd.f32 %v2747_v53, %v2577_v51 }
0x170d   :  { %2592 = vst [vmem:[#allocation5 + $0x18] sm:$0xff] %v2586_v19 }
0x170e   :  { %2590 = vst [vmem:[#allocation5 + $0x8] sm:$0xff] %v2578_v3 }
0x170f   :  { %3298 = shalt.err (!%p3295_p4)
}
0x1710   :  { %s3299_s25 = scalar_lea.hbm %s4319_s7, 512 }
0x1711   :  { %p3300_p5 = scmp.ne.s32.totalorder %s4319_s7, %s3299_s25  ;;  %p3303_p6 = scmp.lt.u32.totalorder %s3299_s25, %s4319_s7 }
0x1713   :  { %p3305_p7 = pnand %p3303_p6, %p3300_p5 }
0x1715   :  { %3308 = shalt.err (!%p3305_p7)
}
0x1716   :  { %s3318_s30 = smov 128   ;;  %s3319_s8 = smov 8  }
0x1717   :  { %2604 = dma.vmem_to_hbm [thread:$0]  %s2599_s22, 512, %s4319_s7, [#allocation6], %s3318_s30, %s3318_s30, %s3319_s8  }
0x1718   :  { %3309 = dma.done.wait [#allocation6], 512  }
0x1719   :  { %3310 = vsyncadd [#allocation6], 4294966784 }
0x171a   :  { %2608 = vsyncpa [#allocation6], 1 }

</bundles_post_ra>
